<compile_context>
chip_gen: v7x
topology: tpu7x:2x2x1
jax: 0.10.0
libtpu: 0.0.40
codegen_flags: <defaults>
</compile_context>

<pallas_src>
import functools

import jax
import jax.numpy as jnp
import numpy as np
from jax.experimental import pallas as pl
from jax.experimental.pallas import tpu as pltpu

LANE = 128
SUBLANE = 8


def _round_up(v, m):
    return ((v + m - 1) // m) * m


# -----------------------------------------------------------------------------
# Pallas kernel: whole sequence, all layers, final FC — one invocation.
# -----------------------------------------------------------------------------
def _decoder_kernel(x_ref, h0_ref, c0_ref, wih_ref, whh_ref, b_ref,
                    fcw_ref, fcb_ref,
                    pred_ref, hout_ref, cout_ref,
                    hbuf_ref, xg_ref,
                    *, num_layers, seq_len, batch_pad, pad):
    L, T, BP, P = num_layers, seq_len, batch_pad, pad

    for l in range(L):
        # ---- Non-recurrent input projection for the WHOLE sequence at once:
        # large-M lane-dense matmul, bias broadcast on the VPU.
        src_ref = x_ref if l == 0 else hbuf_ref
        xg_ref[...] = (jnp.dot(src_ref[...], wih_ref[l],
                               preferred_element_type=jnp.float32)
                       + b_ref[l])

        # Recurrent state carried as values; W_hh^T loaded once per layer and
        # reused as the staged RHS across all T steps.
        # TODO(synk): stage W_hh explicitly with pltpu.matmul_push_rhs /
        #   matmul_acc_lhs / matmul_pop to guarantee a single weight push.
        h = h0_ref[l]
        c = c0_ref[l]
        whh = whh_ref[l]

        # Serial recurrence (T small & static here -> unrolled Python loop).
        # TODO(synk): for long T use a time-chunk grid / lax.fori_loop(unroll=4).
        for t in range(T):
            gates = xg_ref[pl.ds(t * BP, BP), :] + jnp.dot(
                h, whh, preferred_element_type=jnp.float32)
            # PyTorch gate order (i, f, g, o); each slice is 128-lane aligned.
            i_g = jax.nn.sigmoid(gates[:, 0 * P:1 * P])
            f_g = jax.nn.sigmoid(gates[:, 1 * P:2 * P])
            g_g = jnp.tanh(gates[:, 2 * P:3 * P])
            o_g = jax.nn.sigmoid(gates[:, 3 * P:4 * P])
            c = f_g * c + i_g * g_g
            h = o_g * jnp.tanh(c)
            # Full (8,128)-tile, unmasked store (BP is a multiple of 8).
            hbuf_ref[pl.ds(t * BP, BP), :] = h

        hout_ref[l] = h
        cout_ref[l] = c

    # Single batched, lane-dense final projection over all T*BP rows.
    pred = jnp.dot(hbuf_ref[...], fcw_ref[...],
                   preferred_element_type=jnp.float32) + fcb_ref[...]
    pred_ref[...] = pred.astype(pred_ref.dtype)


# -----------------------------------------------------------------------------
# One-time host-side parameter packing (numpy; out of the per-call path).
# No batch size is baked into the packed parameters.
# -----------------------------------------------------------------------------
def pack_decoder_params(params, *, output_dim, hidden_dim, num_layers):
    H = hidden_dim
    P = _round_up(max(hidden_dim, output_dim), LANE)
    L = num_layers

    wih = np.zeros((L, P, 4 * P), np.float32)    # W_ih^T, lane-band padded
    whh = np.zeros((L, P, 4 * P), np.float32)    # W_hh^T, lane-band padded
    bias = np.zeros((L, 1, 4 * P), np.float32)   # b_ih + b_hh
    for l in range(L):
        w_ih, w_hh, b_ih, b_hh = (np.asarray(p, np.float32)
                                  for p in params["lstm"][l])
        in_sz = w_ih.shape[1]
        b_sum = b_ih + b_hh
        # Scatter each gate block into its lane-aligned 128-wide column band.
        # Padded weight rows / bias lanes are zero -> padded gate columns stay
        # exactly 0, which (with zero-padded h0/c0) keeps padded state at 0.
        for g in range(4):
            wih[l, :in_sz, g * P:g * P + H] = w_ih[g * H:(g + 1) * H, :].T
            whh[l, :H, g * P:g * P + H] = w_hh[g * H:(g + 1) * H, :].T
            bias[l, 0, g * P:g * P + H] = b_sum[g * H:(g + 1) * H]

    fcw = np.zeros((P, P), np.float32)           # lane-dense padded FC
    fcw[:H, :output_dim] = np.asarray(params["fc_w"], np.float32).T
    fcb = np.zeros((1, P), np.float32)
    fcb[0, :output_dim] = np.asarray(params["fc_b"], np.float32)

    # TODO(synk): cast wih/whh/fcw to bfloat16 on v6e/v7x (keep f32 accum).
    return tuple(jnp.asarray(a) for a in (wih, whh, bias, fcw, fcb))


# -----------------------------------------------------------------------------
# Jitted wrapper: pad/transpose glue + pallas_call + un-pad.
# -----------------------------------------------------------------------------
@functools.partial(jax.jit, static_argnames=("output_dim", "hidden_dim"))
def decoder_forward(x, hidden, cell, wih, whh, bias, fcw, fcb, *,
                    output_dim, hidden_dim):
    B, T, D = x.shape
    L = wih.shape[0]
    P = fcw.shape[0]
    H = hidden_dim
    BP = _round_up(B, SUBLANE)     # batch padded to full sublane tiles

    # NOTE: padding MUST be zeros — padded feature lanes of h0/c0 starting at
    # exactly 0 is what keeps the padded gate/state columns inert.
    x_tbf = jnp.transpose(x.astype(jnp.float32), (1, 0, 2))        # (T, B, D)
    x_tbf = jnp.pad(x_tbf, ((0, 0), (0, BP - B), (0, P - D)))      # (T, BP, P)
    x_flat = x_tbf.reshape(T * BP, P)                              # lane-dense
    h0 = jnp.pad(hidden.astype(jnp.float32), ((0, 0), (0, BP - B), (0, P - H)))
    c0 = jnp.pad(cell.astype(jnp.float32), ((0, 0), (0, BP - B), (0, P - H)))

    # Scoped-VMEM limit sized from the actual resident set (+margin).
    f32 = 4
    resident = f32 * (
        T * BP * P                 # x
        + 2 * L * BP * P           # h0, c0
        + 2 * L * P * 4 * P        # wih, whh
        + L * 4 * P                # bias
        + P * P + P                # fc weights
        + T * BP * P               # pred out
        + 2 * L * BP * P           # h/c out
        + T * BP * P               # hbuf scratch
        + T * BP * 4 * P           # xg scratch
    )
    vmem_limit = int(min(max(2 * resident + (4 << 20), 32 << 20), 100 << 20))

    vmem_spec = pl.BlockSpec(memory_space=pltpu.MemorySpace.VMEM)

    pred_flat, h_out, c_out = pl.pallas_call(
        functools.partial(_decoder_kernel, num_layers=L, seq_len=T,
                          batch_pad=BP, pad=P),
        out_shape=(
            jax.ShapeDtypeStruct((T * BP, P), jnp.float32),   # lane-dense pred
            jax.ShapeDtypeStruct((L, BP, P), jnp.float32),    # hidden (padded)
            jax.ShapeDtypeStruct((L, BP, P), jnp.float32),    # cell (padded)
        ),
        in_specs=[vmem_spec] * 8,
        out_specs=(vmem_spec, vmem_spec, vmem_spec),
        scratch_shapes=[
            pltpu.VMEM((T * BP, P), jnp.float32),        # per-layer seq buffer
            pltpu.VMEM((T * BP, 4 * P), jnp.float32),    # x @ W_ih^T + b
        ],
        compiler_params=pltpu.CompilerParams(vmem_limit_bytes=vmem_limit),
    )(x_flat, h0, c0, wih, whh, bias, fcw, fcb)

    pred = jnp.transpose(
        pred_flat.reshape(T, BP, P)[:, :B, :output_dim], (1, 0, 2))  # (B,T,O)
    return pred, h_out[:, :B, :H], c_out[:, :B, :H]


# -----------------------------------------------------------------------------
# Pure-JAX reference (mirrors torch.nn.LSTM + nn.Linear semantics).
# -----------------------------------------------------------------------------
def decoder_reference(x, hidden, cell, params, *, hidden_dim, num_layers):
    B, T, _ = x.shape
    H = hidden_dim
    hs = [hidden[l] for l in range(num_layers)]
    cs = [cell[l] for l in range(num_layers)]
    outs = []
    for t in range(T):
        inp = x[:, t, :]
        for l in range(num_layers):
            w_ih, w_hh, b_ih, b_hh = params["lstm"][l]
            gates = inp @ w_ih.T + hs[l] @ w_hh.T + b_ih + b_hh
            i_g = jax.nn.sigmoid(gates[:, 0 * H:1 * H])
            f_g = jax.nn.sigmoid(gates[:, 1 * H:2 * H])
            g_g = jnp.tanh(gates[:, 2 * H:3 * H])
            o_g = jax.nn.sigmoid(gates[:, 3 * H:4 * H])
            cs[l] = f_g * cs[l] + i_g * g_g
            hs[l] = o_g * jnp.tanh(cs[l])
            inp = hs[l]
        outs.append(inp)
    out = jnp.stack(outs, axis=1)                      # (B, T, H)
    pred = out @ params["fc_w"].T + params["fc_b"]
    return pred, jnp.stack(hs), jnp.stack(cs)


# -----------------------------------------------------------------------------
# Main
# -----------------------------------------------------------------------------
if __name__ == "__main__":
    output_dim, hidden_dim, num_layers = 4, 32, 2
    B, T = 2, 8

    key = jax.random.PRNGKey(0)
    keys = jax.random.split(key, 4 + 4 * num_layers)
    k = 1.0 / np.sqrt(hidden_dim)

    # Deterministic synthetic parameters (same shapes as nn.LSTM / nn.Linear).
    lstm_params = []
    for l in range(num_layers):
        in_sz = output_dim if l == 0 else hidden_dim
        kk = keys[4 + 4 * l: 8 + 4 * l]
        w_ih = jax.random.uniform(kk[0], (4 * hidden_dim, in_sz), jnp.float32, -k, k)
        w_hh = jax.random.uniform(kk[1], (4 * hidden_dim, hidden_dim), jnp.float32, -k, k)
        b_ih = jax.random.uniform(kk[2], (4 * hidden_dim,), jnp.float32, -k, k)
        b_hh = jax.random.uniform(kk[3], (4 * hidden_dim,), jnp.float32, -k, k)
        lstm_params.append((w_ih, w_hh, b_ih, b_hh))
    params = {
        "lstm": lstm_params,
        "fc_w": jax.random.uniform(keys[0], (output_dim, hidden_dim), jnp.float32, -k, k),
        "fc_b": jax.random.uniform(keys[1], (output_dim,), jnp.float32, -k, k),
    }

    x = jax.random.normal(keys[2], (B, T, output_dim), jnp.float32)
    hk, ck = jax.random.split(keys[3])
    hidden = jax.random.normal(hk, (num_layers, B, hidden_dim), jnp.float32)
    cell = jax.random.normal(ck, (num_layers, B, hidden_dim), jnp.float32)

    # Pack parameters once (host-side), then run the jitted Pallas forward.
    packed = pack_decoder_params(params, output_dim=output_dim,
                                 hidden_dim=hidden_dim, num_layers=num_layers)

    pred, h_out, c_out = decoder_forward(
        x, hidden, cell, *packed, output_dim=output_dim, hidden_dim=hidden_dim)
    jax.block_until_ready((pred, h_out, c_out))

    # Sanity check against a pure-JAX reference of the PyTorch semantics.
    pred_r, h_r, c_r = decoder_reference(
        x, hidden, cell, params, hidden_dim=hidden_dim, num_layers=num_layers)
    np.testing.assert_allclose(np.asarray(pred), np.asarray(pred_r), rtol=1e-4, atol=1e-4)
    np.testing.assert_allclose(np.asarray(h_out), np.asarray(h_r), rtol=1e-4, atol=1e-4)
    np.testing.assert_allclose(np.asarray(c_out), np.asarray(c_r), rtol=1e-4, atol=1e-4)

    print("KERNEL_OK")
</pallas_src>

<mosaic_0001>
module attributes {stable_mosaic.version = 11 : i64} {
  func.func @_decoder_kernel(%arg0: memref<64x128xf32, #tpu.memory_space<vmem>>, %arg1: memref<2x8x128xf32, #tpu.memory_space<vmem>>, %arg2: memref<2x8x128xf32, #tpu.memory_space<vmem>>, %arg3: memref<2x128x512xf32, #tpu.memory_space<vmem>>, %arg4: memref<2x128x512xf32, #tpu.memory_space<vmem>>, %arg5: memref<2x1x512xf32, #tpu.memory_space<vmem>>, %arg6: memref<128x128xf32, #tpu.memory_space<vmem>>, %arg7: memref<1x128xf32, #tpu.memory_space<vmem>>, %arg8: memref<64x128xf32, #tpu.memory_space<vmem>>, %arg9: memref<2x8x128xf32, #tpu.memory_space<vmem>>, %arg10: memref<2x8x128xf32, #tpu.memory_space<vmem>>, %arg11: memref<64x128xf32, #tpu.memory_space<vmem>>, %arg12: memref<64x512xf32, #tpu.memory_space<vmem>>) attributes {dimension_semantics = [], scalar_prefetch = 0 : i64, scratch_operands = 2 : i64, tpu.core_type = #tpu.core_type<tc>} {
    %c0 = arith.constant 0 : index
    %c0_0 = arith.constant 0 : index
    %0 = vector.load %arg0[%c0, %c0_0] : memref<64x128xf32, #tpu.memory_space<vmem>>, vector<64x128xf32>
    %c0_1 = arith.constant 0 : index
    %c0_2 = arith.constant 0 : index
    %c0_3 = arith.constant 0 : index
    %1 = vector.load %arg3[%c0_1, %c0_2, %c0_3] : memref<2x128x512xf32, #tpu.memory_space<vmem>>, vector<1x128x512xf32>
    %2 = vector.shape_cast %1 : vector<1x128x512xf32> to vector<128x512xf32>
    %cst = arith.constant dense<0.000000e+00> : vector<64x512xf32>
    %3 = tpu.matmul %0, %2, %cst {dimension_numbers = #tpu.dot_dimension_numbers<[1], [0], [0], [1], [0, 0, 1, 1], [], []>} : vector<64x128xf32>, vector<128x512xf32>, vector<64x512xf32> -> vector<64x512xf32>
    %c0_4 = arith.constant 0 : index
    %c0_5 = arith.constant 0 : index
    %c0_6 = arith.constant 0 : index
    %4 = vector.load %arg5[%c0_4, %c0_5, %c0_6] : memref<2x1x512xf32, #tpu.memory_space<vmem>>, vector<1x1x512xf32>
    %5 = vector.shape_cast %4 : vector<1x1x512xf32> to vector<1x512xf32>
    %6 = vector.broadcast %5 : vector<1x512xf32> to vector<64x512xf32>
    %7 = arith.addf %3, %6 : vector<64x512xf32>
    %c0_7 = arith.constant 0 : index
    %c0_8 = arith.constant 0 : index
    %8 = vector.load %arg12[%c0_7, %c0_8] : memref<64x512xf32, #tpu.memory_space<vmem>>, vector<64x512xf32>
    tpu.vector_store %arg12[%c0_7, %c0_8], %7 {strides = array<i32>} : memref<64x512xf32, #tpu.memory_space<vmem>>, vector<64x512xf32>,
    %c0_9 = arith.constant 0 : index
    %c0_10 = arith.constant 0 : index
    %c0_11 = arith.constant 0 : index
    %9 = vector.load %arg1[%c0_9, %c0_10, %c0_11] : memref<2x8x128xf32, #tpu.memory_space<vmem>>, vector<1x8x128xf32>
    %10 = vector.shape_cast %9 : vector<1x8x128xf32> to vector<8x128xf32>
    %c0_12 = arith.constant 0 : index
    %c0_13 = arith.constant 0 : index
    %c0_14 = arith.constant 0 : index
    %11 = vector.load %arg2[%c0_12, %c0_13, %c0_14] : memref<2x8x128xf32, #tpu.memory_space<vmem>>, vector<1x8x128xf32>
    %12 = vector.shape_cast %11 : vector<1x8x128xf32> to vector<8x128xf32>
    %c0_15 = arith.constant 0 : index
    %c0_16 = arith.constant 0 : index
    %c0_17 = arith.constant 0 : index
    %13 = vector.load %arg4[%c0_15, %c0_16, %c0_17] : memref<2x128x512xf32, #tpu.memory_space<vmem>>, vector<1x128x512xf32>
    %14 = vector.shape_cast %13 : vector<1x128x512xf32> to vector<128x512xf32>
    %c0_18 = arith.constant 0 : index
    %c0_19 = arith.constant 0 : index
    %15 = vector.load %arg12[%c0_18, %c0_19] : memref<64x512xf32, #tpu.memory_space<vmem>>, vector<8x512xf32>
    %cst_20 = arith.constant dense<0.000000e+00> : vector<8x512xf32>
    %16 = tpu.matmul %10, %14, %cst_20 {dimension_numbers = #tpu.dot_dimension_numbers<[1], [0], [0], [1], [0, 0, 1, 1], [], []>} : vector<8x128xf32>, vector<128x512xf32>, vector<8x512xf32> -> vector<8x512xf32>
    %17 = arith.addf %15, %16 : vector<8x512xf32>
    %18 = vector.extract_strided_slice %17 {offsets = [0, 0], sizes = [8, 128], strides = [1, 1]} : vector<8x512xf32> to vector<8x128xf32>
    %19 = arith.negf %18 : vector<8x128xf32>
    %20 = math.exp %19 : vector<8x128xf32>
    %cst_21 = arith.constant 1.000000e+00 : f32
    %21 = vector.broadcast %cst_21 : f32 to vector<8x128xf32>
    %22 = arith.addf %21, %20 : vector<8x128xf32>
    %23 = arith.divf %21, %22 : vector<8x128xf32>
    %24 = vector.extract_strided_slice %17 {offsets = [0, 128], sizes = [8, 128], strides = [1, 1]} : vector<8x512xf32> to vector<8x128xf32>
    %25 = arith.negf %24 : vector<8x128xf32>
    %26 = math.exp %25 : vector<8x128xf32>
    %cst_22 = arith.constant 1.000000e+00 : f32
    %27 = vector.broadcast %cst_22 : f32 to vector<8x128xf32>
    %28 = arith.addf %27, %26 : vector<8x128xf32>
    %29 = arith.divf %27, %28 : vector<8x128xf32>
    %30 = vector.extract_strided_slice %17 {offsets = [0, 256], sizes = [8, 128], strides = [1, 1]} : vector<8x512xf32> to vector<8x128xf32>
    %31 = math.tanh %30 : vector<8x128xf32>
    %32 = vector.extract_strided_slice %17 {offsets = [0, 384], sizes = [8, 128], strides = [1, 1]} : vector<8x512xf32> to vector<8x128xf32>
    %33 = arith.negf %32 : vector<8x128xf32>
    %34 = math.exp %33 : vector<8x128xf32>
    %cst_23 = arith.constant 1.000000e+00 : f32
    %35 = vector.broadcast %cst_23 : f32 to vector<8x128xf32>
    %36 = arith.addf %35, %34 : vector<8x128xf32>
    %37 = arith.divf %35, %36 : vector<8x128xf32>
    %38 = arith.mulf %29, %12 : vector<8x128xf32>
    %39 = arith.mulf %23, %31 : vector<8x128xf32>
    %40 = arith.addf %38, %39 : vector<8x128xf32>
    %41 = math.tanh %40 : vector<8x128xf32>
    %42 = arith.mulf %37, %41 : vector<8x128xf32>
    %c0_24 = arith.constant 0 : index
    %c0_25 = arith.constant 0 : index
    %43 = vector.load %arg11[%c0_24, %c0_25] : memref<64x128xf32, #tpu.memory_space<vmem>>, vector<8x128xf32>
    tpu.vector_store %arg11[%c0_24, %c0_25], %42 {strides = array<i32>} : memref<64x128xf32, #tpu.memory_space<vmem>>, vector<8x128xf32>,
    %c8 = arith.constant 8 : index
    %c0_26 = arith.constant 0 : index
    %44 = vector.load %arg12[%c8, %c0_26] : memref<64x512xf32, #tpu.memory_space<vmem>>, vector<8x512xf32>
    %cst_27 = arith.constant dense<0.000000e+00> : vector<8x512xf32>
    %45 = tpu.matmul %42, %14, %cst_27 {dimension_numbers = #tpu.dot_dimension_numbers<[1], [0], [0], [1], [0, 0, 1, 1], [], []>} : vector<8x128xf32>, vector<128x512xf32>, vector<8x512xf32> -> vector<8x512xf32>
    %46 = arith.addf %44, %45 : vector<8x512xf32>
    %47 = vector.extract_strided_slice %46 {offsets = [0, 0], sizes = [8, 128], strides = [1, 1]} : vector<8x512xf32> to vector<8x128xf32>
    %48 = arith.negf %47 : vector<8x128xf32>
    %49 = math.exp %48 : vector<8x128xf32>
    %cst_28 = arith.constant 1.000000e+00 : f32
    %50 = vector.broadcast %cst_28 : f32 to vector<8x128xf32>
    %51 = arith.addf %50, %49 : vector<8x128xf32>
    %52 = arith.divf %50, %51 : vector<8x128xf32>
    %53 = vector.extract_strided_slice %46 {offsets = [0, 128], sizes = [8, 128], strides = [1, 1]} : vector<8x512xf32> to vector<8x128xf32>
    %54 = arith.negf %53 : vector<8x128xf32>
    %55 = math.exp %54 : vector<8x128xf32>
    %cst_29 = arith.constant 1.000000e+00 : f32
    %56 = vector.broadcast %cst_29 : f32 to vector<8x128xf32>
    %57 = arith.addf %56, %55 : vector<8x128xf32>
    %58 = arith.divf %56, %57 : vector<8x128xf32>
    %59 = vector.extract_strided_slice %46 {offsets = [0, 256], sizes = [8, 128], strides = [1, 1]} : vector<8x512xf32> to vector<8x128xf32>
    %60 = math.tanh %59 : vector<8x128xf32>
    %61 = vector.extract_strided_slice %46 {offsets = [0, 384], sizes = [8, 128], strides = [1, 1]} : vector<8x512xf32> to vector<8x128xf32>
    %62 = arith.negf %61 : vector<8x128xf32>
    %63 = math.exp %62 : vector<8x128xf32>
    %cst_30 = arith.constant 1.000000e+00 : f32
    %64 = vector.broadcast %cst_30 : f32 to vector<8x128xf32>
    %65 = arith.addf %64, %63 : vector<8x128xf32>
    %66 = arith.divf %64, %65 : vector<8x128xf32>
    %67 = arith.mulf %58, %40 : vector<8x128xf32>
    %68 = arith.mulf %52, %60 : vector<8x128xf32>
    %69 = arith.addf %67, %68 : vector<8x128xf32>
    %70 = math.tanh %69 : vector<8x128xf32>
    %71 = arith.mulf %66, %70 : vector<8x128xf32>
    %c8_31 = arith.constant 8 : index
    %c0_32 = arith.constant 0 : index
    %72 = vector.load %arg11[%c8_31, %c0_32] : memref<64x128xf32, #tpu.memory_space<vmem>>, vector<8x128xf32>
    tpu.vector_store %arg11[%c8_31, %c0_32], %71 {strides = array<i32>} : memref<64x128xf32, #tpu.memory_space<vmem>>, vector<8x128xf32>,
    %c16 = arith.constant 16 : index
    %c0_33 = arith.constant 0 : index
    %73 = vector.load %arg12[%c16, %c0_33] : memref<64x512xf32, #tpu.memory_space<vmem>>, vector<8x512xf32>
    %cst_34 = arith.constant dense<0.000000e+00> : vector<8x512xf32>
    %74 = tpu.matmul %71, %14, %cst_34 {dimension_numbers = #tpu.dot_dimension_numbers<[1], [0], [0], [1], [0, 0, 1, 1], [], []>} : vector<8x128xf32>, vector<128x512xf32>, vector<8x512xf32> -> vector<8x512xf32>
    %75 = arith.addf %73, %74 : vector<8x512xf32>
    %76 = vector.extract_strided_slice %75 {offsets = [0, 0], sizes = [8, 128], strides = [1, 1]} : vector<8x512xf32> to vector<8x128xf32>
    %77 = arith.negf %76 : vector<8x128xf32>
    %78 = math.exp %77 : vector<8x128xf32>
    %cst_35 = arith.constant 1.000000e+00 : f32
    %79 = vector.broadcast %cst_35 : f32 to vector<8x128xf32>
    %80 = arith.addf %79, %78 : vector<8x128xf32>
    %81 = arith.divf %79, %80 : vector<8x128xf32>
    %82 = vector.extract_strided_slice %75 {offsets = [0, 128], sizes = [8, 128], strides = [1, 1]} : vector<8x512xf32> to vector<8x128xf32>
    %83 = arith.negf %82 : vector<8x128xf32>
    %84 = math.exp %83 : vector<8x128xf32>
    %cst_36 = arith.constant 1.000000e+00 : f32
    %85 = vector.broadcast %cst_36 : f32 to vector<8x128xf32>
    %86 = arith.addf %85, %84 : vector<8x128xf32>
    %87 = arith.divf %85, %86 : vector<8x128xf32>
    %88 = vector.extract_strided_slice %75 {offsets = [0, 256], sizes = [8, 128], strides = [1, 1]} : vector<8x512xf32> to vector<8x128xf32>
    %89 = math.tanh %88 : vector<8x128xf32>
    %90 = vector.extract_strided_slice %75 {offsets = [0, 384], sizes = [8, 128], strides = [1, 1]} : vector<8x512xf32> to vector<8x128xf32>
    %91 = arith.negf %90 : vector<8x128xf32>
    %92 = math.exp %91 : vector<8x128xf32>
    %cst_37 = arith.constant 1.000000e+00 : f32
    %93 = vector.broadcast %cst_37 : f32 to vector<8x128xf32>
    %94 = arith.addf %93, %92 : vector<8x128xf32>
    %95 = arith.divf %93, %94 : vector<8x128xf32>
    %96 = arith.mulf %87, %69 : vector<8x128xf32>
    %97 = arith.mulf %81, %89 : vector<8x128xf32>
    %98 = arith.addf %96, %97 : vector<8x128xf32>
    %99 = math.tanh %98 : vector<8x128xf32>
    %100 = arith.mulf %95, %99 : vector<8x128xf32>
    %c16_38 = arith.constant 16 : index
    %c0_39 = arith.constant 0 : index
    %101 = vector.load %arg11[%c16_38, %c0_39] : memref<64x128xf32, #tpu.memory_space<vmem>>, vector<8x128xf32>
    tpu.vector_store %arg11[%c16_38, %c0_39], %100 {strides = array<i32>} : memref<64x128xf32, #tpu.memory_space<vmem>>, vector<8x128xf32>,
    %c24 = arith.constant 24 : index
    %c0_40 = arith.constant 0 : index
    %102 = vector.load %arg12[%c24, %c0_40] : memref<64x512xf32, #tpu.memory_space<vmem>>, vector<8x512xf32>
    %cst_41 = arith.constant dense<0.000000e+00> : vector<8x512xf32>
    %103 = tpu.matmul %100, %14, %cst_41 {dimension_numbers = #tpu.dot_dimension_numbers<[1], [0], [0], [1], [0, 0, 1, 1], [], []>} : vector<8x128xf32>, vector<128x512xf32>, vector<8x512xf32> -> vector<8x512xf32>
    %104 = arith.addf %102, %103 : vector<8x512xf32>
    %105 = vector.extract_strided_slice %104 {offsets = [0, 0], sizes = [8, 128], strides = [1, 1]} : vector<8x512xf32> to vector<8x128xf32>
    %106 = arith.negf %105 : vector<8x128xf32>
    %107 = math.exp %106 : vector<8x128xf32>
    %cst_42 = arith.constant 1.000000e+00 : f32
    %108 = vector.broadcast %cst_42 : f32 to vector<8x128xf32>
    %109 = arith.addf %108, %107 : vector<8x128xf32>
    %110 = arith.divf %108, %109 : vector<8x128xf32>
    %111 = vector.extract_strided_slice %104 {offsets = [0, 128], sizes = [8, 128], strides = [1, 1]} : vector<8x512xf32> to vector<8x128xf32>
    %112 = arith.negf %111 : vector<8x128xf32>
    %113 = math.exp %112 : vector<8x128xf32>
    %cst_43 = arith.constant 1.000000e+00 : f32
    %114 = vector.broadcast %cst_43 : f32 to vector<8x128xf32>
    %115 = arith.addf %114, %113 : vector<8x128xf32>
    %116 = arith.divf %114, %115 : vector<8x128xf32>
    %117 = vector.extract_strided_slice %104 {offsets = [0, 256], sizes = [8, 128], strides = [1, 1]} : vector<8x512xf32> to vector<8x128xf32>
    %118 = math.tanh %117 : vector<8x128xf32>
    %119 = vector.extract_strided_slice %104 {offsets = [0, 384], sizes = [8, 128], strides = [1, 1]} : vector<8x512xf32> to vector<8x128xf32>
    %120 = arith.negf %119 : vector<8x128xf32>
    %121 = math.exp %120 : vector<8x128xf32>
    %cst_44 = arith.constant 1.000000e+00 : f32
    %122 = vector.broadcast %cst_44 : f32 to vector<8x128xf32>
    %123 = arith.addf %122, %121 : vector<8x128xf32>
    %124 = arith.divf %122, %123 : vector<8x128xf32>
    %125 = arith.mulf %116, %98 : vector<8x128xf32>
    %126 = arith.mulf %110, %118 : vector<8x128xf32>
    %127 = arith.addf %125, %126 : vector<8x128xf32>
    %128 = math.tanh %127 : vector<8x128xf32>
    %129 = arith.mulf %124, %128 : vector<8x128xf32>
    %c24_45 = arith.constant 24 : index
    %c0_46 = arith.constant 0 : index
    %130 = vector.load %arg11[%c24_45, %c0_46] : memref<64x128xf32, #tpu.memory_space<vmem>>, vector<8x128xf32>
    tpu.vector_store %arg11[%c24_45, %c0_46], %129 {strides = array<i32>} : memref<64x128xf32, #tpu.memory_space<vmem>>, vector<8x128xf32>,
    %c32 = arith.constant 32 : index
    %c0_47 = arith.constant 0 : index
    %131 = vector.load %arg12[%c32, %c0_47] : memref<64x512xf32, #tpu.memory_space<vmem>>, vector<8x512xf32>
    %cst_48 = arith.constant dense<0.000000e+00> : vector<8x512xf32>
    %132 = tpu.matmul %129, %14, %cst_48 {dimension_numbers = #tpu.dot_dimension_numbers<[1], [0], [0], [1], [0, 0, 1, 1], [], []>} : vector<8x128xf32>, vector<128x512xf32>, vector<8x512xf32> -> vector<8x512xf32>
    %133 = arith.addf %131, %132 : vector<8x512xf32>
    %134 = vector.extract_strided_slice %133 {offsets = [0, 0], sizes = [8, 128], strides = [1, 1]} : vector<8x512xf32> to vector<8x128xf32>
    %135 = arith.negf %134 : vector<8x128xf32>
    %136 = math.exp %135 : vector<8x128xf32>
    %cst_49 = arith.constant 1.000000e+00 : f32
    %137 = vector.broadcast %cst_49 : f32 to vector<8x128xf32>
    %138 = arith.addf %137, %136 : vector<8x128xf32>
    %139 = arith.divf %137, %138 : vector<8x128xf32>
    %140 = vector.extract_strided_slice %133 {offsets = [0, 128], sizes = [8, 128], strides = [1, 1]} : vector<8x512xf32> to vector<8x128xf32>
    %141 = arith.negf %140 : vector<8x128xf32>
    %142 = math.exp %141 : vector<8x128xf32>
    %cst_50 = arith.constant 1.000000e+00 : f32
    %143 = vector.broadcast %cst_50 : f32 to vector<8x128xf32>
    %144 = arith.addf %143, %142 : vector<8x128xf32>
    %145 = arith.divf %143, %144 : vector<8x128xf32>
    %146 = vector.extract_strided_slice %133 {offsets = [0, 256], sizes = [8, 128], strides = [1, 1]} : vector<8x512xf32> to vector<8x128xf32>
    %147 = math.tanh %146 : vector<8x128xf32>
    %148 = vector.extract_strided_slice %133 {offsets = [0, 384], sizes = [8, 128], strides = [1, 1]} : vector<8x512xf32> to vector<8x128xf32>
    %149 = arith.negf %148 : vector<8x128xf32>
    %150 = math.exp %149 : vector<8x128xf32>
    %cst_51 = arith.constant 1.000000e+00 : f32
    %151 = vector.broadcast %cst_51 : f32 to vector<8x128xf32>
    %152 = arith.addf %151, %150 : vector<8x128xf32>
    %153 = arith.divf %151, %152 : vector<8x128xf32>
    %154 = arith.mulf %145, %127 : vector<8x128xf32>
    %155 = arith.mulf %139, %147 : vector<8x128xf32>
    %156 = arith.addf %154, %155 : vector<8x128xf32>
    %157 = math.tanh %156 : vector<8x128xf32>
    %158 = arith.mulf %153, %157 : vector<8x128xf32>
    %c32_52 = arith.constant 32 : index
    %c0_53 = arith.constant 0 : index
    %159 = vector.load %arg11[%c32_52, %c0_53] : memref<64x128xf32, #tpu.memory_space<vmem>>, vector<8x128xf32>
    tpu.vector_store %arg11[%c32_52, %c0_53], %158 {strides = array<i32>} : memref<64x128xf32, #tpu.memory_space<vmem>>, vector<8x128xf32>,
    %c40 = arith.constant 40 : index
    %c0_54 = arith.constant 0 : index
    %160 = vector.load %arg12[%c40, %c0_54] : memref<64x512xf32, #tpu.memory_space<vmem>>, vector<8x512xf32>
    %cst_55 = arith.constant dense<0.000000e+00> : vector<8x512xf32>
    %161 = tpu.matmul %158, %14, %cst_55 {dimension_numbers = #tpu.dot_dimension_numbers<[1], [0], [0], [1], [0, 0, 1, 1], [], []>} : vector<8x128xf32>, vector<128x512xf32>, vector<8x512xf32> -> vector<8x512xf32>
    %162 = arith.addf %160, %161 : vector<8x512xf32>
    %163 = vector.extract_strided_slice %162 {offsets = [0, 0], sizes = [8, 128], strides = [1, 1]} : vector<8x512xf32> to vector<8x128xf32>
    %164 = arith.negf %163 : vector<8x128xf32>
    %165 = math.exp %164 : vector<8x128xf32>
    %cst_56 = arith.constant 1.000000e+00 : f32
    %166 = vector.broadcast %cst_56 : f32 to vector<8x128xf32>
    %167 = arith.addf %166, %165 : vector<8x128xf32>
    %168 = arith.divf %166, %167 : vector<8x128xf32>
    %169 = vector.extract_strided_slice %162 {offsets = [0, 128], sizes = [8, 128], strides = [1, 1]} : vector<8x512xf32> to vector<8x128xf32>
    %170 = arith.negf %169 : vector<8x128xf32>
    %171 = math.exp %170 : vector<8x128xf32>
    %cst_57 = arith.constant 1.000000e+00 : f32
    %172 = vector.broadcast %cst_57 : f32 to vector<8x128xf32>
    %173 = arith.addf %172, %171 : vector<8x128xf32>
    %174 = arith.divf %172, %173 : vector<8x128xf32>
    %175 = vector.extract_strided_slice %162 {offsets = [0, 256], sizes = [8, 128], strides = [1, 1]} : vector<8x512xf32> to vector<8x128xf32>
    %176 = math.tanh %175 : vector<8x128xf32>
    %177 = vector.extract_strided_slice %162 {offsets = [0, 384], sizes = [8, 128], strides = [1, 1]} : vector<8x512xf32> to vector<8x128xf32>
    %178 = arith.negf %177 : vector<8x128xf32>
    %179 = math.exp %178 : vector<8x128xf32>
    %cst_58 = arith.constant 1.000000e+00 : f32
    %180 = vector.broadcast %cst_58 : f32 to vector<8x128xf32>
    %181 = arith.addf %180, %179 : vector<8x128xf32>
    %182 = arith.divf %180, %181 : vector<8x128xf32>
    %183 = arith.mulf %174, %156 : vector<8x128xf32>
    %184 = arith.mulf %168, %176 : vector<8x128xf32>
    %185 = arith.addf %183, %184 : vector<8x128xf32>
    %186 = math.tanh %185 : vector<8x128xf32>
    %187 = arith.mulf %182, %186 : vector<8x128xf32>
    %c40_59 = arith.constant 40 : index
    %c0_60 = arith.constant 0 : index
    %188 = vector.load %arg11[%c40_59, %c0_60] : memref<64x128xf32, #tpu.memory_space<vmem>>, vector<8x128xf32>
    tpu.vector_store %arg11[%c40_59, %c0_60], %187 {strides = array<i32>} : memref<64x128xf32, #tpu.memory_space<vmem>>, vector<8x128xf32>,
    %c48 = arith.constant 48 : index
    %c0_61 = arith.constant 0 : index
    %189 = vector.load %arg12[%c48, %c0_61] : memref<64x512xf32, #tpu.memory_space<vmem>>, vector<8x512xf32>
    %cst_62 = arith.constant dense<0.000000e+00> : vector<8x512xf32>
    %190 = tpu.matmul %187, %14, %cst_62 {dimension_numbers = #tpu.dot_dimension_numbers<[1], [0], [0], [1], [0, 0, 1, 1], [], []>} : vector<8x128xf32>, vector<128x512xf32>, vector<8x512xf32> -> vector<8x512xf32>
    %191 = arith.addf %189, %190 : vector<8x512xf32>
    %192 = vector.extract_strided_slice %191 {offsets = [0, 0], sizes = [8, 128], strides = [1, 1]} : vector<8x512xf32> to vector<8x128xf32>
    %193 = arith.negf %192 : vector<8x128xf32>
    %194 = math.exp %193 : vector<8x128xf32>
    %cst_63 = arith.constant 1.000000e+00 : f32
    %195 = vector.broadcast %cst_63 : f32 to vector<8x128xf32>
    %196 = arith.addf %195, %194 : vector<8x128xf32>
    %197 = arith.divf %195, %196 : vector<8x128xf32>
    %198 = vector.extract_strided_slice %191 {offsets = [0, 128], sizes = [8, 128], strides = [1, 1]} : vector<8x512xf32> to vector<8x128xf32>
    %199 = arith.negf %198 : vector<8x128xf32>
    %200 = math.exp %199 : vector<8x128xf32>
    %cst_64 = arith.constant 1.000000e+00 : f32
    %201 = vector.broadcast %cst_64 : f32 to vector<8x128xf32>
    %202 = arith.addf %201, %200 : vector<8x128xf32>
    %203 = arith.divf %201, %202 : vector<8x128xf32>
    %204 = vector.extract_strided_slice %191 {offsets = [0, 256], sizes = [8, 128], strides = [1, 1]} : vector<8x512xf32> to vector<8x128xf32>
    %205 = math.tanh %204 : vector<8x128xf32>
    %206 = vector.extract_strided_slice %191 {offsets = [0, 384], sizes = [8, 128], strides = [1, 1]} : vector<8x512xf32> to vector<8x128xf32>
    %207 = arith.negf %206 : vector<8x128xf32>
    %208 = math.exp %207 : vector<8x128xf32>
    %cst_65 = arith.constant 1.000000e+00 : f32
    %209 = vector.broadcast %cst_65 : f32 to vector<8x128xf32>
    %210 = arith.addf %209, %208 : vector<8x128xf32>
    %211 = arith.divf %209, %210 : vector<8x128xf32>
    %212 = arith.mulf %203, %185 : vector<8x128xf32>
    %213 = arith.mulf %197, %205 : vector<8x128xf32>
    %214 = arith.addf %212, %213 : vector<8x128xf32>
    %215 = math.tanh %214 : vector<8x128xf32>
    %216 = arith.mulf %211, %215 : vector<8x128xf32>
    %c48_66 = arith.constant 48 : index
    %c0_67 = arith.constant 0 : index
    %217 = vector.load %arg11[%c48_66, %c0_67] : memref<64x128xf32, #tpu.memory_space<vmem>>, vector<8x128xf32>
    tpu.vector_store %arg11[%c48_66, %c0_67], %216 {strides = array<i32>} : memref<64x128xf32, #tpu.memory_space<vmem>>, vector<8x128xf32>,
    %c56 = arith.constant 56 : index
    %c0_68 = arith.constant 0 : index
    %218 = vector.load %arg12[%c56, %c0_68] : memref<64x512xf32, #tpu.memory_space<vmem>>, vector<8x512xf32>
    %cst_69 = arith.constant dense<0.000000e+00> : vector<8x512xf32>
    %219 = tpu.matmul %216, %14, %cst_69 {dimension_numbers = #tpu.dot_dimension_numbers<[1], [0], [0], [1], [0, 0, 1, 1], [], []>} : vector<8x128xf32>, vector<128x512xf32>, vector<8x512xf32> -> vector<8x512xf32>
    %220 = arith.addf %218, %219 : vector<8x512xf32>
    %221 = vector.extract_strided_slice %220 {offsets = [0, 0], sizes = [8, 128], strides = [1, 1]} : vector<8x512xf32> to vector<8x128xf32>
    %222 = arith.negf %221 : vector<8x128xf32>
    %223 = math.exp %222 : vector<8x128xf32>
    %cst_70 = arith.constant 1.000000e+00 : f32
    %224 = vector.broadcast %cst_70 : f32 to vector<8x128xf32>
    %225 = arith.addf %224, %223 : vector<8x128xf32>
    %226 = arith.divf %224, %225 : vector<8x128xf32>
    %227 = vector.extract_strided_slice %220 {offsets = [0, 128], sizes = [8, 128], strides = [1, 1]} : vector<8x512xf32> to vector<8x128xf32>
    %228 = arith.negf %227 : vector<8x128xf32>
    %229 = math.exp %228 : vector<8x128xf32>
    %cst_71 = arith.constant 1.000000e+00 : f32
    %230 = vector.broadcast %cst_71 : f32 to vector<8x128xf32>
    %231 = arith.addf %230, %229 : vector<8x128xf32>
    %232 = arith.divf %230, %231 : vector<8x128xf32>
    %233 = vector.extract_strided_slice %220 {offsets = [0, 256], sizes = [8, 128], strides = [1, 1]} : vector<8x512xf32> to vector<8x128xf32>
    %234 = math.tanh %233 : vector<8x128xf32>
    %235 = vector.extract_strided_slice %220 {offsets = [0, 384], sizes = [8, 128], strides = [1, 1]} : vector<8x512xf32> to vector<8x128xf32>
    %236 = arith.negf %235 : vector<8x128xf32>
    %237 = math.exp %236 : vector<8x128xf32>
    %cst_72 = arith.constant 1.000000e+00 : f32
    %238 = vector.broadcast %cst_72 : f32 to vector<8x128xf32>
    %239 = arith.addf %238, %237 : vector<8x128xf32>
    %240 = arith.divf %238, %239 : vector<8x128xf32>
    %241 = arith.mulf %232, %214 : vector<8x128xf32>
    %242 = arith.mulf %226, %234 : vector<8x128xf32>
    %243 = arith.addf %241, %242 : vector<8x128xf32>
    %244 = math.tanh %243 : vector<8x128xf32>
    %245 = arith.mulf %240, %244 : vector<8x128xf32>
    %c56_73 = arith.constant 56 : index
    %c0_74 = arith.constant 0 : index
    %246 = vector.load %arg11[%c56_73, %c0_74] : memref<64x128xf32, #tpu.memory_space<vmem>>, vector<8x128xf32>
    tpu.vector_store %arg11[%c56_73, %c0_74], %245 {strides = array<i32>} : memref<64x128xf32, #tpu.memory_space<vmem>>, vector<8x128xf32>,
    %c0_75 = arith.constant 0 : index
    %c0_76 = arith.constant 0 : index
    %c0_77 = arith.constant 0 : index
    %247 = vector.load %arg9[%c0_75, %c0_76, %c0_77] : memref<2x8x128xf32, #tpu.memory_space<vmem>>, vector<1x8x128xf32>
    %248 = vector.shape_cast %247 : vector<1x8x128xf32> to vector<8x128xf32>
    %249 = vector.shape_cast %245 : vector<8x128xf32> to vector<1x8x128xf32>
    tpu.vector_store %arg9[%c0_75, %c0_76, %c0_77], %249 {strides = array<i32>} : memref<2x8x128xf32, #tpu.memory_space<vmem>>, vector<1x8x128xf32>,
    %c0_78 = arith.constant 0 : index
    %c0_79 = arith.constant 0 : index
    %c0_80 = arith.constant 0 : index
    %250 = vector.load %arg10[%c0_78, %c0_79, %c0_80] : memref<2x8x128xf32, #tpu.memory_space<vmem>>, vector<1x8x128xf32>
    %251 = vector.shape_cast %250 : vector<1x8x128xf32> to vector<8x128xf32>
    %252 = vector.shape_cast %243 : vector<8x128xf32> to vector<1x8x128xf32>
    tpu.vector_store %arg10[%c0_78, %c0_79, %c0_80], %252 {strides = array<i32>} : memref<2x8x128xf32, #tpu.memory_space<vmem>>, vector<1x8x128xf32>,
    %c0_81 = arith.constant 0 : index
    %c0_82 = arith.constant 0 : index
    %253 = vector.load %arg11[%c0_81, %c0_82] : memref<64x128xf32, #tpu.memory_space<vmem>>, vector<64x128xf32>
    %c1 = arith.constant 1 : index
    %c0_83 = arith.constant 0 : index
    %c0_84 = arith.constant 0 : index
    %254 = vector.load %arg3[%c1, %c0_83, %c0_84] : memref<2x128x512xf32, #tpu.memory_space<vmem>>, vector<1x128x512xf32>
    %255 = vector.shape_cast %254 : vector<1x128x512xf32> to vector<128x512xf32>
    %cst_85 = arith.constant dense<0.000000e+00> : vector<64x512xf32>
    %256 = tpu.matmul %253, %255, %cst_85 {dimension_numbers = #tpu.dot_dimension_numbers<[1], [0], [0], [1], [0, 0, 1, 1], [], []>} : vector<64x128xf32>, vector<128x512xf32>, vector<64x512xf32> -> vector<64x512xf32>
    %c1_86 = arith.constant 1 : index
    %c0_87 = arith.constant 0 : index
    %c0_88 = arith.constant 0 : index
    %257 = vector.load %arg5[%c1_86, %c0_87, %c0_88] : memref<2x1x512xf32, #tpu.memory_space<vmem>>, vector<1x1x512xf32>
    %258 = vector.shape_cast %257 : vector<1x1x512xf32> to vector<1x512xf32>
    %259 = vector.broadcast %258 : vector<1x512xf32> to vector<64x512xf32>
    %260 = arith.addf %256, %259 : vector<64x512xf32>
    %c0_89 = arith.constant 0 : index
    %c0_90 = arith.constant 0 : index
    %261 = vector.load %arg12[%c0_89, %c0_90] : memref<64x512xf32, #tpu.memory_space<vmem>>, vector<64x512xf32>
    tpu.vector_store %arg12[%c0_89, %c0_90], %260 {strides = array<i32>} : memref<64x512xf32, #tpu.memory_space<vmem>>, vector<64x512xf32>,
    %c1_91 = arith.constant 1 : index
    %c0_92 = arith.constant 0 : index
    %c0_93 = arith.constant 0 : index
    %262 = vector.load %arg1[%c1_91, %c0_92, %c0_93] : memref<2x8x128xf32, #tpu.memory_space<vmem>>, vector<1x8x128xf32>
    %263 = vector.shape_cast %262 : vector<1x8x128xf32> to vector<8x128xf32>
    %c1_94 = arith.constant 1 : index
    %c0_95 = arith.constant 0 : index
    %c0_96 = arith.constant 0 : index
    %264 = vector.load %arg2[%c1_94, %c0_95, %c0_96] : memref<2x8x128xf32, #tpu.memory_space<vmem>>, vector<1x8x128xf32>
    %265 = vector.shape_cast %264 : vector<1x8x128xf32> to vector<8x128xf32>
    %c1_97 = arith.constant 1 : index
    %c0_98 = arith.constant 0 : index
    %c0_99 = arith.constant 0 : index
    %266 = vector.load %arg4[%c1_97, %c0_98, %c0_99] : memref<2x128x512xf32, #tpu.memory_space<vmem>>, vector<1x128x512xf32>
    %267 = vector.shape_cast %266 : vector<1x128x512xf32> to vector<128x512xf32>
    %c0_100 = arith.constant 0 : index
    %c0_101 = arith.constant 0 : index
    %268 = vector.load %arg12[%c0_100, %c0_101] : memref<64x512xf32, #tpu.memory_space<vmem>>, vector<8x512xf32>
    %cst_102 = arith.constant dense<0.000000e+00> : vector<8x512xf32>
    %269 = tpu.matmul %263, %267, %cst_102 {dimension_numbers = #tpu.dot_dimension_numbers<[1], [0], [0], [1], [0, 0, 1, 1], [], []>} : vector<8x128xf32>, vector<128x512xf32>, vector<8x512xf32> -> vector<8x512xf32>
    %270 = arith.addf %268, %269 : vector<8x512xf32>
    %271 = vector.extract_strided_slice %270 {offsets = [0, 0], sizes = [8, 128], strides = [1, 1]} : vector<8x512xf32> to vector<8x128xf32>
    %272 = arith.negf %271 : vector<8x128xf32>
    %273 = math.exp %272 : vector<8x128xf32>
    %cst_103 = arith.constant 1.000000e+00 : f32
    %274 = vector.broadcast %cst_103 : f32 to vector<8x128xf32>
    %275 = arith.addf %274, %273 : vector<8x128xf32>
    %276 = arith.divf %274, %275 : vector<8x128xf32>
    %277 = vector.extract_strided_slice %270 {offsets = [0, 128], sizes = [8, 128], strides = [1, 1]} : vector<8x512xf32> to vector<8x128xf32>
    %278 = arith.negf %277 : vector<8x128xf32>
    %279 = math.exp %278 : vector<8x128xf32>
    %cst_104 = arith.constant 1.000000e+00 : f32
    %280 = vector.broadcast %cst_104 : f32 to vector<8x128xf32>
    %281 = arith.addf %280, %279 : vector<8x128xf32>
    %282 = arith.divf %280, %281 : vector<8x128xf32>
    %283 = vector.extract_strided_slice %270 {offsets = [0, 256], sizes = [8, 128], strides = [1, 1]} : vector<8x512xf32> to vector<8x128xf32>
    %284 = math.tanh %283 : vector<8x128xf32>
    %285 = vector.extract_strided_slice %270 {offsets = [0, 384], sizes = [8, 128], strides = [1, 1]} : vector<8x512xf32> to vector<8x128xf32>
    %286 = arith.negf %285 : vector<8x128xf32>
    %287 = math.exp %286 : vector<8x128xf32>
    %cst_105 = arith.constant 1.000000e+00 : f32
    %288 = vector.broadcast %cst_105 : f32 to vector<8x128xf32>
    %289 = arith.addf %288, %287 : vector<8x128xf32>
    %290 = arith.divf %288, %289 : vector<8x128xf32>
    %291 = arith.mulf %282, %265 : vector<8x128xf32>
    %292 = arith.mulf %276, %284 : vector<8x128xf32>
    %293 = arith.addf %291, %292 : vector<8x128xf32>
    %294 = math.tanh %293 : vector<8x128xf32>
    %295 = arith.mulf %290, %294 : vector<8x128xf32>
    %c0_106 = arith.constant 0 : index
    %c0_107 = arith.constant 0 : index
    %296 = vector.load %arg11[%c0_106, %c0_107] : memref<64x128xf32, #tpu.memory_space<vmem>>, vector<8x128xf32>
    tpu.vector_store %arg11[%c0_106, %c0_107], %295 {strides = array<i32>} : memref<64x128xf32, #tpu.memory_space<vmem>>, vector<8x128xf32>,
    %c8_108 = arith.constant 8 : index
    %c0_109 = arith.constant 0 : index
    %297 = vector.load %arg12[%c8_108, %c0_109] : memref<64x512xf32, #tpu.memory_space<vmem>>, vector<8x512xf32>
    %cst_110 = arith.constant dense<0.000000e+00> : vector<8x512xf32>
    %298 = tpu.matmul %295, %267, %cst_110 {dimension_numbers = #tpu.dot_dimension_numbers<[1], [0], [0], [1], [0, 0, 1, 1], [], []>} : vector<8x128xf32>, vector<128x512xf32>, vector<8x512xf32> -> vector<8x512xf32>
    %299 = arith.addf %297, %298 : vector<8x512xf32>
    %300 = vector.extract_strided_slice %299 {offsets = [0, 0], sizes = [8, 128], strides = [1, 1]} : vector<8x512xf32> to vector<8x128xf32>
    %301 = arith.negf %300 : vector<8x128xf32>
    %302 = math.exp %301 : vector<8x128xf32>
    %cst_111 = arith.constant 1.000000e+00 : f32
    %303 = vector.broadcast %cst_111 : f32 to vector<8x128xf32>
    %304 = arith.addf %303, %302 : vector<8x128xf32>
    %305 = arith.divf %303, %304 : vector<8x128xf32>
    %306 = vector.extract_strided_slice %299 {offsets = [0, 128], sizes = [8, 128], strides = [1, 1]} : vector<8x512xf32> to vector<8x128xf32>
    %307 = arith.negf %306 : vector<8x128xf32>
    %308 = math.exp %307 : vector<8x128xf32>
    %cst_112 = arith.constant 1.000000e+00 : f32
    %309 = vector.broadcast %cst_112 : f32 to vector<8x128xf32>
    %310 = arith.addf %309, %308 : vector<8x128xf32>
    %311 = arith.divf %309, %310 : vector<8x128xf32>
    %312 = vector.extract_strided_slice %299 {offsets = [0, 256], sizes = [8, 128], strides = [1, 1]} : vector<8x512xf32> to vector<8x128xf32>
    %313 = math.tanh %312 : vector<8x128xf32>
    %314 = vector.extract_strided_slice %299 {offsets = [0, 384], sizes = [8, 128], strides = [1, 1]} : vector<8x512xf32> to vector<8x128xf32>
    %315 = arith.negf %314 : vector<8x128xf32>
    %316 = math.exp %315 : vector<8x128xf32>
    %cst_113 = arith.constant 1.000000e+00 : f32
    %317 = vector.broadcast %cst_113 : f32 to vector<8x128xf32>
    %318 = arith.addf %317, %316 : vector<8x128xf32>
    %319 = arith.divf %317, %318 : vector<8x128xf32>
    %320 = arith.mulf %311, %293 : vector<8x128xf32>
    %321 = arith.mulf %305, %313 : vector<8x128xf32>
    %322 = arith.addf %320, %321 : vector<8x128xf32>
    %323 = math.tanh %322 : vector<8x128xf32>
    %324 = arith.mulf %319, %323 : vector<8x128xf32>
    %c8_114 = arith.constant 8 : index
    %c0_115 = arith.constant 0 : index
    %325 = vector.load %arg11[%c8_114, %c0_115] : memref<64x128xf32, #tpu.memory_space<vmem>>, vector<8x128xf32>
    tpu.vector_store %arg11[%c8_114, %c0_115], %324 {strides = array<i32>} : memref<64x128xf32, #tpu.memory_space<vmem>>, vector<8x128xf32>,
    %c16_116 = arith.constant 16 : index
    %c0_117 = arith.constant 0 : index
    %326 = vector.load %arg12[%c16_116, %c0_117] : memref<64x512xf32, #tpu.memory_space<vmem>>, vector<8x512xf32>
    %cst_118 = arith.constant dense<0.000000e+00> : vector<8x512xf32>
    %327 = tpu.matmul %324, %267, %cst_118 {dimension_numbers = #tpu.dot_dimension_numbers<[1], [0], [0], [1], [0, 0, 1, 1], [], []>} : vector<8x128xf32>, vector<128x512xf32>, vector<8x512xf32> -> vector<8x512xf32>
    %328 = arith.addf %326, %327 : vector<8x512xf32>
    %329 = vector.extract_strided_slice %328 {offsets = [0, 0], sizes = [8, 128], strides = [1, 1]} : vector<8x512xf32> to vector<8x128xf32>
    %330 = arith.negf %329 : vector<8x128xf32>
    %331 = math.exp %330 : vector<8x128xf32>
    %cst_119 = arith.constant 1.000000e+00 : f32
    %332 = vector.broadcast %cst_119 : f32 to vector<8x128xf32>
    %333 = arith.addf %332, %331 : vector<8x128xf32>
    %334 = arith.divf %332, %333 : vector<8x128xf32>
    %335 = vector.extract_strided_slice %328 {offsets = [0, 128], sizes = [8, 128], strides = [1, 1]} : vector<8x512xf32> to vector<8x128xf32>
    %336 = arith.negf %335 : vector<8x128xf32>
    %337 = math.exp %336 : vector<8x128xf32>
    %cst_120 = arith.constant 1.000000e+00 : f32
    %338 = vector.broadcast %cst_120 : f32 to vector<8x128xf32>
    %339 = arith.addf %338, %337 : vector<8x128xf32>
    %340 = arith.divf %338, %339 : vector<8x128xf32>
    %341 = vector.extract_strided_slice %328 {offsets = [0, 256], sizes = [8, 128], strides = [1, 1]} : vector<8x512xf32> to vector<8x128xf32>
    %342 = math.tanh %341 : vector<8x128xf32>
    %343 = vector.extract_strided_slice %328 {offsets = [0, 384], sizes = [8, 128], strides = [1, 1]} : vector<8x512xf32> to vector<8x128xf32>
    %344 = arith.negf %343 : vector<8x128xf32>
    %345 = math.exp %344 : vector<8x128xf32>
    %cst_121 = arith.constant 1.000000e+00 : f32
    %346 = vector.broadcast %cst_121 : f32 to vector<8x128xf32>
    %347 = arith.addf %346, %345 : vector<8x128xf32>
    %348 = arith.divf %346, %347 : vector<8x128xf32>
    %349 = arith.mulf %340, %322 : vector<8x128xf32>
    %350 = arith.mulf %334, %342 : vector<8x128xf32>
    %351 = arith.addf %349, %350 : vector<8x128xf32>
    %352 = math.tanh %351 : vector<8x128xf32>
    %353 = arith.mulf %348, %352 : vector<8x128xf32>
    %c16_122 = arith.constant 16 : index
    %c0_123 = arith.constant 0 : index
    %354 = vector.load %arg11[%c16_122, %c0_123] : memref<64x128xf32, #tpu.memory_space<vmem>>, vector<8x128xf32>
    tpu.vector_store %arg11[%c16_122, %c0_123], %353 {strides = array<i32>} : memref<64x128xf32, #tpu.memory_space<vmem>>, vector<8x128xf32>,
    %c24_124 = arith.constant 24 : index
    %c0_125 = arith.constant 0 : index
    %355 = vector.load %arg12[%c24_124, %c0_125] : memref<64x512xf32, #tpu.memory_space<vmem>>, vector<8x512xf32>
    %cst_126 = arith.constant dense<0.000000e+00> : vector<8x512xf32>
    %356 = tpu.matmul %353, %267, %cst_126 {dimension_numbers = #tpu.dot_dimension_numbers<[1], [0], [0], [1], [0, 0, 1, 1], [], []>} : vector<8x128xf32>, vector<128x512xf32>, vector<8x512xf32> -> vector<8x512xf32>
    %357 = arith.addf %355, %356 : vector<8x512xf32>
    %358 = vector.extract_strided_slice %357 {offsets = [0, 0], sizes = [8, 128], strides = [1, 1]} : vector<8x512xf32> to vector<8x128xf32>
    %359 = arith.negf %358 : vector<8x128xf32>
    %360 = math.exp %359 : vector<8x128xf32>
    %cst_127 = arith.constant 1.000000e+00 : f32
    %361 = vector.broadcast %cst_127 : f32 to vector<8x128xf32>
    %362 = arith.addf %361, %360 : vector<8x128xf32>
    %363 = arith.divf %361, %362 : vector<8x128xf32>
    %364 = vector.extract_strided_slice %357 {offsets = [0, 128], sizes = [8, 128], strides = [1, 1]} : vector<8x512xf32> to vector<8x128xf32>
    %365 = arith.negf %364 : vector<8x128xf32>
    %366 = math.exp %365 : vector<8x128xf32>
    %cst_128 = arith.constant 1.000000e+00 : f32
    %367 = vector.broadcast %cst_128 : f32 to vector<8x128xf32>
    %368 = arith.addf %367, %366 : vector<8x128xf32>
    %369 = arith.divf %367, %368 : vector<8x128xf32>
    %370 = vector.extract_strided_slice %357 {offsets = [0, 256], sizes = [8, 128], strides = [1, 1]} : vector<8x512xf32> to vector<8x128xf32>
    %371 = math.tanh %370 : vector<8x128xf32>
    %372 = vector.extract_strided_slice %357 {offsets = [0, 384], sizes = [8, 128], strides = [1, 1]} : vector<8x512xf32> to vector<8x128xf32>
    %373 = arith.negf %372 : vector<8x128xf32>
    %374 = math.exp %373 : vector<8x128xf32>
    %cst_129 = arith.constant 1.000000e+00 : f32
    %375 = vector.broadcast %cst_129 : f32 to vector<8x128xf32>
    %376 = arith.addf %375, %374 : vector<8x128xf32>
    %377 = arith.divf %375, %376 : vector<8x128xf32>
    %378 = arith.mulf %369, %351 : vector<8x128xf32>
    %379 = arith.mulf %363, %371 : vector<8x128xf32>
    %380 = arith.addf %378, %379 : vector<8x128xf32>
    %381 = math.tanh %380 : vector<8x128xf32>
    %382 = arith.mulf %377, %381 : vector<8x128xf32>
    %c24_130 = arith.constant 24 : index
    %c0_131 = arith.constant 0 : index
    %383 = vector.load %arg11[%c24_130, %c0_131] : memref<64x128xf32, #tpu.memory_space<vmem>>, vector<8x128xf32>
    tpu.vector_store %arg11[%c24_130, %c0_131], %382 {strides = array<i32>} : memref<64x128xf32, #tpu.memory_space<vmem>>, vector<8x128xf32>,
    %c32_132 = arith.constant 32 : index
    %c0_133 = arith.constant 0 : index
    %384 = vector.load %arg12[%c32_132, %c0_133] : memref<64x512xf32, #tpu.memory_space<vmem>>, vector<8x512xf32>
    %cst_134 = arith.constant dense<0.000000e+00> : vector<8x512xf32>
    %385 = tpu.matmul %382, %267, %cst_134 {dimension_numbers = #tpu.dot_dimension_numbers<[1], [0], [0], [1], [0, 0, 1, 1], [], []>} : vector<8x128xf32>, vector<128x512xf32>, vector<8x512xf32> -> vector<8x512xf32>
    %386 = arith.addf %384, %385 : vector<8x512xf32>
    %387 = vector.extract_strided_slice %386 {offsets = [0, 0], sizes = [8, 128], strides = [1, 1]} : vector<8x512xf32> to vector<8x128xf32>
    %388 = arith.negf %387 : vector<8x128xf32>
    %389 = math.exp %388 : vector<8x128xf32>
    %cst_135 = arith.constant 1.000000e+00 : f32
    %390 = vector.broadcast %cst_135 : f32 to vector<8x128xf32>
    %391 = arith.addf %390, %389 : vector<8x128xf32>
    %392 = arith.divf %390, %391 : vector<8x128xf32>
    %393 = vector.extract_strided_slice %386 {offsets = [0, 128], sizes = [8, 128], strides = [1, 1]} : vector<8x512xf32> to vector<8x128xf32>
    %394 = arith.negf %393 : vector<8x128xf32>
    %395 = math.exp %394 : vector<8x128xf32>
    %cst_136 = arith.constant 1.000000e+00 : f32
    %396 = vector.broadcast %cst_136 : f32 to vector<8x128xf32>
    %397 = arith.addf %396, %395 : vector<8x128xf32>
    %398 = arith.divf %396, %397 : vector<8x128xf32>
    %399 = vector.extract_strided_slice %386 {offsets = [0, 256], sizes = [8, 128], strides = [1, 1]} : vector<8x512xf32> to vector<8x128xf32>
    %400 = math.tanh %399 : vector<8x128xf32>
    %401 = vector.extract_strided_slice %386 {offsets = [0, 384], sizes = [8, 128], strides = [1, 1]} : vector<8x512xf32> to vector<8x128xf32>
    %402 = arith.negf %401 : vector<8x128xf32>
    %403 = math.exp %402 : vector<8x128xf32>
    %cst_137 = arith.constant 1.000000e+00 : f32
    %404 = vector.broadcast %cst_137 : f32 to vector<8x128xf32>
    %405 = arith.addf %404, %403 : vector<8x128xf32>
    %406 = arith.divf %404, %405 : vector<8x128xf32>
    %407 = arith.mulf %398, %380 : vector<8x128xf32>
    %408 = arith.mulf %392, %400 : vector<8x128xf32>
    %409 = arith.addf %407, %408 : vector<8x128xf32>
    %410 = math.tanh %409 : vector<8x128xf32>
    %411 = arith.mulf %406, %410 : vector<8x128xf32>
    %c32_138 = arith.constant 32 : index
    %c0_139 = arith.constant 0 : index
    %412 = vector.load %arg11[%c32_138, %c0_139] : memref<64x128xf32, #tpu.memory_space<vmem>>, vector<8x128xf32>
    tpu.vector_store %arg11[%c32_138, %c0_139], %411 {strides = array<i32>} : memref<64x128xf32, #tpu.memory_space<vmem>>, vector<8x128xf32>,
    %c40_140 = arith.constant 40 : index
    %c0_141 = arith.constant 0 : index
    %413 = vector.load %arg12[%c40_140, %c0_141] : memref<64x512xf32, #tpu.memory_space<vmem>>, vector<8x512xf32>
    %cst_142 = arith.constant dense<0.000000e+00> : vector<8x512xf32>
    %414 = tpu.matmul %411, %267, %cst_142 {dimension_numbers = #tpu.dot_dimension_numbers<[1], [0], [0], [1], [0, 0, 1, 1], [], []>} : vector<8x128xf32>, vector<128x512xf32>, vector<8x512xf32> -> vector<8x512xf32>
    %415 = arith.addf %413, %414 : vector<8x512xf32>
    %416 = vector.extract_strided_slice %415 {offsets = [0, 0], sizes = [8, 128], strides = [1, 1]} : vector<8x512xf32> to vector<8x128xf32>
    %417 = arith.negf %416 : vector<8x128xf32>
    %418 = math.exp %417 : vector<8x128xf32>
    %cst_143 = arith.constant 1.000000e+00 : f32
    %419 = vector.broadcast %cst_143 : f32 to vector<8x128xf32>
    %420 = arith.addf %419, %418 : vector<8x128xf32>
    %421 = arith.divf %419, %420 : vector<8x128xf32>
    %422 = vector.extract_strided_slice %415 {offsets = [0, 128], sizes = [8, 128], strides = [1, 1]} : vector<8x512xf32> to vector<8x128xf32>
    %423 = arith.negf %422 : vector<8x128xf32>
    %424 = math.exp %423 : vector<8x128xf32>
    %cst_144 = arith.constant 1.000000e+00 : f32
    %425 = vector.broadcast %cst_144 : f32 to vector<8x128xf32>
    %426 = arith.addf %425, %424 : vector<8x128xf32>
    %427 = arith.divf %425, %426 : vector<8x128xf32>
    %428 = vector.extract_strided_slice %415 {offsets = [0, 256], sizes = [8, 128], strides = [1, 1]} : vector<8x512xf32> to vector<8x128xf32>
    %429 = math.tanh %428 : vector<8x128xf32>
    %430 = vector.extract_strided_slice %415 {offsets = [0, 384], sizes = [8, 128], strides = [1, 1]} : vector<8x512xf32> to vector<8x128xf32>
    %431 = arith.negf %430 : vector<8x128xf32>
    %432 = math.exp %431 : vector<8x128xf32>
    %cst_145 = arith.constant 1.000000e+00 : f32
    %433 = vector.broadcast %cst_145 : f32 to vector<8x128xf32>
    %434 = arith.addf %433, %432 : vector<8x128xf32>
    %435 = arith.divf %433, %434 : vector<8x128xf32>
    %436 = arith.mulf %427, %409 : vector<8x128xf32>
    %437 = arith.mulf %421, %429 : vector<8x128xf32>
    %438 = arith.addf %436, %437 : vector<8x128xf32>
    %439 = math.tanh %438 : vector<8x128xf32>
    %440 = arith.mulf %435, %439 : vector<8x128xf32>
    %c40_146 = arith.constant 40 : index
    %c0_147 = arith.constant 0 : index
    %441 = vector.load %arg11[%c40_146, %c0_147] : memref<64x128xf32, #tpu.memory_space<vmem>>, vector<8x128xf32>
    tpu.vector_store %arg11[%c40_146, %c0_147], %440 {strides = array<i32>} : memref<64x128xf32, #tpu.memory_space<vmem>>, vector<8x128xf32>,
    %c48_148 = arith.constant 48 : index
    %c0_149 = arith.constant 0 : index
    %442 = vector.load %arg12[%c48_148, %c0_149] : memref<64x512xf32, #tpu.memory_space<vmem>>, vector<8x512xf32>
    %cst_150 = arith.constant dense<0.000000e+00> : vector<8x512xf32>
    %443 = tpu.matmul %440, %267, %cst_150 {dimension_numbers = #tpu.dot_dimension_numbers<[1], [0], [0], [1], [0, 0, 1, 1], [], []>} : vector<8x128xf32>, vector<128x512xf32>, vector<8x512xf32> -> vector<8x512xf32>
    %444 = arith.addf %442, %443 : vector<8x512xf32>
    %445 = vector.extract_strided_slice %444 {offsets = [0, 0], sizes = [8, 128], strides = [1, 1]} : vector<8x512xf32> to vector<8x128xf32>
    %446 = arith.negf %445 : vector<8x128xf32>
    %447 = math.exp %446 : vector<8x128xf32>
    %cst_151 = arith.constant 1.000000e+00 : f32
    %448 = vector.broadcast %cst_151 : f32 to vector<8x128xf32>
    %449 = arith.addf %448, %447 : vector<8x128xf32>
    %450 = arith.divf %448, %449 : vector<8x128xf32>
    %451 = vector.extract_strided_slice %444 {offsets = [0, 128], sizes = [8, 128], strides = [1, 1]} : vector<8x512xf32> to vector<8x128xf32>
    %452 = arith.negf %451 : vector<8x128xf32>
    %453 = math.exp %452 : vector<8x128xf32>
    %cst_152 = arith.constant 1.000000e+00 : f32
    %454 = vector.broadcast %cst_152 : f32 to vector<8x128xf32>
    %455 = arith.addf %454, %453 : vector<8x128xf32>
    %456 = arith.divf %454, %455 : vector<8x128xf32>
    %457 = vector.extract_strided_slice %444 {offsets = [0, 256], sizes = [8, 128], strides = [1, 1]} : vector<8x512xf32> to vector<8x128xf32>
    %458 = math.tanh %457 : vector<8x128xf32>
    %459 = vector.extract_strided_slice %444 {offsets = [0, 384], sizes = [8, 128], strides = [1, 1]} : vector<8x512xf32> to vector<8x128xf32>
    %460 = arith.negf %459 : vector<8x128xf32>
    %461 = math.exp %460 : vector<8x128xf32>
    %cst_153 = arith.constant 1.000000e+00 : f32
    %462 = vector.broadcast %cst_153 : f32 to vector<8x128xf32>
    %463 = arith.addf %462, %461 : vector<8x128xf32>
    %464 = arith.divf %462, %463 : vector<8x128xf32>
    %465 = arith.mulf %456, %438 : vector<8x128xf32>
    %466 = arith.mulf %450, %458 : vector<8x128xf32>
    %467 = arith.addf %465, %466 : vector<8x128xf32>
    %468 = math.tanh %467 : vector<8x128xf32>
    %469 = arith.mulf %464, %468 : vector<8x128xf32>
    %c48_154 = arith.constant 48 : index
    %c0_155 = arith.constant 0 : index
    %470 = vector.load %arg11[%c48_154, %c0_155] : memref<64x128xf32, #tpu.memory_space<vmem>>, vector<8x128xf32>
    tpu.vector_store %arg11[%c48_154, %c0_155], %469 {strides = array<i32>} : memref<64x128xf32, #tpu.memory_space<vmem>>, vector<8x128xf32>,
    %c56_156 = arith.constant 56 : index
    %c0_157 = arith.constant 0 : index
    %471 = vector.load %arg12[%c56_156, %c0_157] : memref<64x512xf32, #tpu.memory_space<vmem>>, vector<8x512xf32>
    %cst_158 = arith.constant dense<0.000000e+00> : vector<8x512xf32>
    %472 = tpu.matmul %469, %267, %cst_158 {dimension_numbers = #tpu.dot_dimension_numbers<[1], [0], [0], [1], [0, 0, 1, 1], [], []>} : vector<8x128xf32>, vector<128x512xf32>, vector<8x512xf32> -> vector<8x512xf32>
    %473 = arith.addf %471, %472 : vector<8x512xf32>
    %474 = vector.extract_strided_slice %473 {offsets = [0, 0], sizes = [8, 128], strides = [1, 1]} : vector<8x512xf32> to vector<8x128xf32>
    %475 = arith.negf %474 : vector<8x128xf32>
    %476 = math.exp %475 : vector<8x128xf32>
    %cst_159 = arith.constant 1.000000e+00 : f32
    %477 = vector.broadcast %cst_159 : f32 to vector<8x128xf32>
    %478 = arith.addf %477, %476 : vector<8x128xf32>
    %479 = arith.divf %477, %478 : vector<8x128xf32>
    %480 = vector.extract_strided_slice %473 {offsets = [0, 128], sizes = [8, 128], strides = [1, 1]} : vector<8x512xf32> to vector<8x128xf32>
    %481 = arith.negf %480 : vector<8x128xf32>
    %482 = math.exp %481 : vector<8x128xf32>
    %cst_160 = arith.constant 1.000000e+00 : f32
    %483 = vector.broadcast %cst_160 : f32 to vector<8x128xf32>
    %484 = arith.addf %483, %482 : vector<8x128xf32>
    %485 = arith.divf %483, %484 : vector<8x128xf32>
    %486 = vector.extract_strided_slice %473 {offsets = [0, 256], sizes = [8, 128], strides = [1, 1]} : vector<8x512xf32> to vector<8x128xf32>
    %487 = math.tanh %486 : vector<8x128xf32>
    %488 = vector.extract_strided_slice %473 {offsets = [0, 384], sizes = [8, 128], strides = [1, 1]} : vector<8x512xf32> to vector<8x128xf32>
    %489 = arith.negf %488 : vector<8x128xf32>
    %490 = math.exp %489 : vector<8x128xf32>
    %cst_161 = arith.constant 1.000000e+00 : f32
    %491 = vector.broadcast %cst_161 : f32 to vector<8x128xf32>
    %492 = arith.addf %491, %490 : vector<8x128xf32>
    %493 = arith.divf %491, %492 : vector<8x128xf32>
    %494 = arith.mulf %485, %467 : vector<8x128xf32>
    %495 = arith.mulf %479, %487 : vector<8x128xf32>
    %496 = arith.addf %494, %495 : vector<8x128xf32>
    %497 = math.tanh %496 : vector<8x128xf32>
    %498 = arith.mulf %493, %497 : vector<8x128xf32>
    %c56_162 = arith.constant 56 : index
    %c0_163 = arith.constant 0 : index
    %499 = vector.load %arg11[%c56_162, %c0_163] : memref<64x128xf32, #tpu.memory_space<vmem>>, vector<8x128xf32>
    tpu.vector_store %arg11[%c56_162, %c0_163], %498 {strides = array<i32>} : memref<64x128xf32, #tpu.memory_space<vmem>>, vector<8x128xf32>,
    %c1_164 = arith.constant 1 : index
    %c0_165 = arith.constant 0 : index
    %c0_166 = arith.constant 0 : index
    %500 = vector.load %arg9[%c1_164, %c0_165, %c0_166] : memref<2x8x128xf32, #tpu.memory_space<vmem>>, vector<1x8x128xf32>
    %501 = vector.shape_cast %500 : vector<1x8x128xf32> to vector<8x128xf32>
    %502 = vector.shape_cast %498 : vector<8x128xf32> to vector<1x8x128xf32>
    tpu.vector_store %arg9[%c1_164, %c0_165, %c0_166], %502 {strides = array<i32>} : memref<2x8x128xf32, #tpu.memory_space<vmem>>, vector<1x8x128xf32>,
    %c1_167 = arith.constant 1 : index
    %c0_168 = arith.constant 0 : index
    %c0_169 = arith.constant 0 : index
    %503 = vector.load %arg10[%c1_167, %c0_168, %c0_169] : memref<2x8x128xf32, #tpu.memory_space<vmem>>, vector<1x8x128xf32>
    %504 = vector.shape_cast %503 : vector<1x8x128xf32> to vector<8x128xf32>
    %505 = vector.shape_cast %496 : vector<8x128xf32> to vector<1x8x128xf32>
    tpu.vector_store %arg10[%c1_167, %c0_168, %c0_169], %505 {strides = array<i32>} : memref<2x8x128xf32, #tpu.memory_space<vmem>>, vector<1x8x128xf32>,
    %c0_170 = arith.constant 0 : index
    %c0_171 = arith.constant 0 : index
    %506 = vector.load %arg11[%c0_170, %c0_171] : memref<64x128xf32, #tpu.memory_space<vmem>>, vector<64x128xf32>
    %c0_172 = arith.constant 0 : index
    %c0_173 = arith.constant 0 : index
    %507 = vector.load %arg6[%c0_172, %c0_173] : memref<128x128xf32, #tpu.memory_space<vmem>>, vector<128x128xf32>
    %cst_174 = arith.constant dense<0.000000e+00> : vector<64x128xf32>
    %508 = tpu.matmul %506, %507, %cst_174 {dimension_numbers = #tpu.dot_dimension_numbers<[1], [0], [0], [1], [0, 0, 1, 1], [], []>} : vector<64x128xf32>, vector<128x128xf32>, vector<64x128xf32> -> vector<64x128xf32>
    %c0_175 = arith.constant 0 : index
    %c0_176 = arith.constant 0 : index
    %509 = vector.load %arg7[%c0_175, %c0_176] : memref<1x128xf32, #tpu.memory_space<vmem>>, vector<1x128xf32>
    %510 = vector.broadcast %509 : vector<1x128xf32> to vector<64x128xf32>
    %511 = arith.addf %508, %510 : vector<64x128xf32>
    %c0_177 = arith.constant 0 : index
    %c0_178 = arith.constant 0 : index
    %512 = vector.load %arg8[%c0_177, %c0_178] : memref<64x128xf32, #tpu.memory_space<vmem>>, vector<64x128xf32>
    tpu.vector_store %arg8[%c0_177, %c0_178], %511 {strides = array<i32>} : memref<64x128xf32, #tpu.memory_space<vmem>>, vector<64x128xf32>,
    return
  }
}

</mosaic_0001>

<bundles_post_ra>
// kernel: decoder_forward.1
= control target key start
LH: loop header
LB: loop body
LE: loop exit
PB: predicated region body
PF: predicated region fallthrough
CT: control target
= control target key end

     0   :  { %16 = vsyncpa [#allocation5], 0  ;;  %s6813_s0 = inlined_call_operand.vmem [shape: f32[64,128], index: 0, kind: input, shape index: {}]   ;;  %s6814_s1 = inlined_call_operand.vmem [shape: f32[2,8,128], index: 1, kind: input, shape index: {}]   ;;  %s6815_s2 = inlined_call_operand.vmem [shape: f32[2,8,128], index: 2, kind: input, shape index: {}]   ;;  %s6816_s3 = inlined_call_operand.hbm [shape: f32[2,128,512], index: 3, kind: input, shape index: {}]   ;;  %s6817_s4 = inlined_call_operand.hbm [shape: f32[2,128,512], index: 4, kind: input, shape index: {}]   ;;  %s6818_s5 = inlined_call_operand.vmem [shape: f32[2,1,512], index: 5, kind: input, shape index: {}]   ;;  %s6819_s6 = inlined_call_operand.vmem [shape: f32[128,128], index: 6, kind: input, shape index: {}]   ;;  %s6820_s7 = inlined_call_operand.vmem [shape: f32[1,128], index: 7, kind: input, shape index: {}]   ;;  %s6821_s8 = inlined_call_operand.vmem [shape: f32[64,128], index: 8, kind: output, shape index: {0}]   ;;  %s6822_s9 = inlined_call_operand.vmem [shape: f32[2,8,128], index: 9, kind: output, shape index: {1}]   ;;  %s6823_s10 = inlined_call_operand.vmem [shape: f32[2,8,128], index: 10, kind: output, shape index: {2}]  }
   0x1   :  { %17 = vsyncpa [#allocation7], 0  ;;  %s5608_s13 = smov [#allocation4]   ;;  %s5560_s17 = scalar_lea.hbm %s6816_s3, 16384 }
   0x2   :  { %s29_s14 = sshll.u32 %s5608_s13, 4  ;;  %p5561_p0 = scmp.ne.s32.totalorder %s6816_s3, %s5560_s17  ;;  %s30_s14 = int_to_ptr.vmem [resolvable:$true] %s29_s14 }
   0x3   :  { %p5564_p1 = scmp.lt.u32.totalorder %s5560_s17, %s6816_s3 }
   0x5   :  { %p5566_p2 = pnand %p5564_p1, %p5561_p0 }
   0x7   :  { %5569 = shalt.err (!%p5566_p2)
}
   0x8   :  { %s5570_s22 = scalar_lea.vmem %s30_s14, 16384  ;;  %p5575_p4 = scmp.lt.s32.totalorder %s30_s14, %s30_s14 }
   0x9   :  { %p5571_p3 = scmp.ne.s32.totalorder %s30_s14, %s5570_s22  ;;  %p5576_p5 = scmp.lt.s32.totalorder %s5570_s22, %s5570_s22 }
   0xb   :  { %p5577_p6 = por %p5576_p5, %p5575_p4 }
   0xd   :  { %p5578_p7 = pnand %p5577_p6, %p5571_p3 }
   0xf   :  { %5581 = shalt.err (!%p5578_p7)
}
  0x10   :  { %s5609_s23 = smov 512   ;;  %s5610_s24 = smov 32  }
  0x11   :  { %35 = dma.hbm_to_vmem [thread:$0]  %s6816_s3, 16384, %s30_s14, [#allocation5], %s5609_s23, %s5609_s23, %s5610_s24  }
  0x12   :  { %s5611_s27 = smov [#allocation6]   ;;  %s5582_s11 = scalar_lea.hbm %s6817_s4, 16384 }
  0x13   :  { %s41_s28 = sshll.u32 %s5611_s27, 4  ;;  %p5583_p8 = scmp.ne.s32.totalorder %s6817_s4, %s5582_s11  ;;  %s42_s28 = int_to_ptr.vmem [resolvable:$true] %s41_s28 }
  0x14   :  { %p5586_p9 = scmp.lt.u32.totalorder %s5582_s11, %s6817_s4 }
  0x16   :  { %p5588_p10 = pnand %p5586_p9, %p5583_p8 }
  0x18   :  { %5591 = shalt.err (!%p5588_p10)
}
  0x19   :  { %s5592_s17 = scalar_lea.vmem %s42_s28, 16384  ;;  %p5597_p12 = scmp.lt.s32.totalorder %s42_s28, %s42_s28 }
  0x1a   :  { %p5593_p11 = scmp.ne.s32.totalorder %s42_s28, %s5592_s17  ;;  %p5598_p13 = scmp.lt.s32.totalorder %s5592_s17, %s5592_s17 }
  0x1c   :  { %p5599_p0 = por %p5598_p13, %p5597_p12 }
  0x1e   :  { %p5600_p1 = pnand %p5599_p0, %p5593_p11 }
  0x20   :  { %5603 = shalt.err (!%p5600_p1)
}
  0x21   :  { %47 = dma.hbm_to_vmem [thread:$0]  %s6817_s4, 16384, %s42_s28, [#allocation7], %s5609_s23, %s5609_s23, %s5610_s24  }
  0x22   :  { %5604 = dma.done.wait [#allocation5], 16384  }
  0x23   :  { %5605 = vsyncadd [#allocation5], 4294950912 }
  0x24   :  { %5606 = dma.done.wait [#allocation7], 16384  }
  0x25   :  { %5607 = vsyncadd [#allocation7], 4294950912  ;;  %v6828_v0 = vmov 0.0   ;;  %v69_v1 = vld [vmem:[#allocation4 + $0x8] sm:$0xff]  ;;  %v68_v3 = vld [vmem:[#allocation4] sm:$0xff] }
  0x26   :  { %218 = vmatprep.mubr.f32.mxu1 %v6828_v0  ;;  %546 = vmatprep.mubr.f32.mxu0 %v6828_v0  ;;  %v73_v2 = vld [vmem:[#allocation4 + $0x28] sm:$0xff]  ;;  %v72_v5 = vld [vmem:[#allocation4 + $0x20] sm:$0xff] }
  0x27   :  { %v3987_v4 = vpack.c.bf16 %v73_v2, %v69_v1  ;;  %v415_v6 = vld [vmem:[#allocation6 + $0x8] sm:$0xff]  ;;  %v3989_v8 = vpack.c.bf16 %v72_v5, %v68_v3  ;;  %v414_v10 = vld [vmem:[#allocation6] sm:$0xff] }
  0x28   :  { %v419_v7 = vld [vmem:[#allocation6 + $0x28] sm:$0xff]  ;;  %v418_v11 = vld [vmem:[#allocation6 + $0x20] sm:$0xff] }
  0x29   :  { %v5694_v9 = vpack.c.bf16 %v419_v7, %v415_v6  ;;  %v77_v12 = vld [vmem:[#allocation4 + $0x48] sm:$0xff]  ;;  %3988 = vmatprep.subr.bf16.mxu1 %v3987_v4  ;;  %v5696_v13 = vpack.c.bf16 %v418_v11, %v414_v10  ;;  %v76_v15 = vld [vmem:[#allocation4 + $0x40] sm:$0xff] }
  0x2a   :  { %v81_v14 = vld [vmem:[#allocation4 + $0x68] sm:$0xff]  ;;  %v80_v16 = vld [vmem:[#allocation4 + $0x60] sm:$0xff]  ;;  %3990 = vmatpush1.bf16.msra.mxu1 %v3989_v8 }
  0x2b   :  { %4052 = vmatprep.subr.bf16.mxu0 %v5694_v9  ;;  %v3991_v17 = vpack.c.bf16 %v81_v14, %v77_v12  ;;  %v3993_v18 = vpack.c.bf16 %v80_v16, %v76_v15  ;;  %v423_v19 = vld [vmem:[#allocation6 + $0x48] sm:$0xff]  ;;  %v422_v21 = vld [vmem:[#allocation6 + $0x40] sm:$0xff] }
  0x2c   :  { %v427_v20 = vld [vmem:[#allocation6 + $0x68] sm:$0xff]  ;;  %4054 = vmatpush1.bf16.msra.mxu0 %v5696_v13  ;;  %v426_v23 = vld [vmem:[#allocation6 + $0x60] sm:$0xff] }
  0x2d   :  { %v5700_v22 = vpack.c.bf16 %v427_v20, %v423_v19  ;;  %v85_v24 = vld [vmem:[#allocation4 + $0x88] sm:$0xff]  ;;  %3992 = vmatprep.subr.bf16.mxu1 %v3991_v17  ;;  %v5702_v26 = vpack.c.bf16 %v426_v23, %v422_v21  ;;  %v84_v28 = vld [vmem:[#allocation4 + $0x80] sm:$0xff] }
  0x2e   :  { %v89_v25 = vld [vmem:[#allocation4 + $0xa8] sm:$0xff]  ;;  %v88_v29 = vld [vmem:[#allocation4 + $0xa0] sm:$0xff]  ;;  %3994 = vmatpush1.bf16.msra.mxu1 %v3993_v18 }
  0x2f   :  { %v3995_v27 = vpack.c.bf16 %v89_v25, %v85_v24  ;;  %v431_v30 = vld [vmem:[#allocation6 + $0x88] sm:$0xff]  ;;  %4056 = vmatprep.subr.bf16.mxu0 %v5700_v22  ;;  %v430_v32 = vld [vmem:[#allocation6 + $0x80] sm:$0xff]  ;;  %v3997_v34 = vpack.c.bf16 %v88_v29, %v84_v28 }
  0x30   :  { %v435_v31 = vld [vmem:[#allocation6 + $0xa8] sm:$0xff]  ;;  %v434_v33 = vld [vmem:[#allocation6 + $0xa0] sm:$0xff]  ;;  %4058 = vmatpush1.bf16.msra.mxu0 %v5702_v26 }
  0x31   :  { %v5705_v35 = vpack.c.bf16 %v435_v31, %v431_v30  ;;  %v93_v36 = vld [vmem:[#allocation4 + $0xc8] sm:$0xff]  ;;  %v92_v38 = vld [vmem:[#allocation4 + $0xc0] sm:$0xff]  ;;  %3996 = vmatprep.subr.bf16.mxu1 %v3995_v27  ;;  %v5708_v39 = vpack.c.bf16 %v434_v33, %v430_v32 }
  0x32   :  { %v97_v37 = vld [vmem:[#allocation4 + $0xe8] sm:$0xff]  ;;  %v96_v41 = vld [vmem:[#allocation4 + $0xe0] sm:$0xff]  ;;  %3998 = vmatpush1.bf16.msra.mxu1 %v3997_v34 }
  0x33   :  { %v3999_v40 = vpack.c.bf16 %v97_v37, %v93_v36  ;;  %v439_v42 = vld [vmem:[#allocation6 + $0xc8] sm:$0xff]  ;;  %4060 = vmatprep.subr.bf16.mxu0 %v5705_v35  ;;  %v438_v45 = vld [vmem:[#allocation6 + $0xc0] sm:$0xff]  ;;  %v4001_v49 = vpack.c.bf16 %v96_v41, %v92_v38  ;;  %v71_v37 = vld [vmem:[#allocation4 + $0x18] sm:$0xff] }
  0x34   :  { %v443_v43 = vld [vmem:[#allocation6 + $0xe8] sm:$0xff]  ;;  %v442_v46 = vld [vmem:[#allocation6 + $0xe0] sm:$0xff]  ;;  %4062 = vmatpush1.bf16.msra.mxu0 %v5708_v39  ;;  %v75_v38 = vld [vmem:[#allocation4 + $0x38] sm:$0xff] }
  0x35   :  { %v5711_v44 = vpack.c.bf16 %v443_v43, %v439_v42  ;;  %v101_v47 = vld [vmem:[#allocation4 + $0x108] sm:$0xff]  ;;  %4000 = vmatprep.subr.bf16.mxu1 %v3999_v40  ;;  %v5714_v52 = vpack.c.bf16 %v442_v46, %v438_v45  ;;  %v100_v54 = vld [vmem:[#allocation4 + $0x100] sm:$0xff]  ;;  %v4019_v42 = vpack.c.bf16 %v75_v38, %v71_v37  ;;  %v70_v43 = vld [vmem:[#allocation4 + $0x10] sm:$0xff] }
  0x36   :  { %v105_v48 = vld [vmem:[#allocation4 + $0x128] sm:$0xff]  ;;  %v104_v55 = vld [vmem:[#allocation4 + $0x120] sm:$0xff]  ;;  %4002 = vmatpush1.bf16.msra.mxu1 %v4001_v49  ;;  %v74_v45 = vld [vmem:[#allocation4 + $0x30] sm:$0xff] }
  0x37   :  { %v447_v50 = vld [vmem:[#allocation6 + $0x108] sm:$0xff]  ;;  %v4003_v53 = vpack.c.bf16 %v105_v48, %v101_v47  ;;  %v446_v56 = vld [vmem:[#allocation6 + $0x100] sm:$0xff]  ;;  %4064 = vmatprep.subr.bf16.mxu0 %v5711_v44  ;;  %v4005_v63 = vpack.c.bf16 %v104_v55, %v100_v54  ;;  %v79_v46 = vld [vmem:[#allocation4 + $0x58] sm:$0xff]  ;;  %v4021_v49 = vpack.c.bf16 %v74_v45, %v70_v43 }
  0x38   :  { %v451_v51 = vld [vmem:[#allocation6 + $0x128] sm:$0xff]  ;;  %v450_v58 = vld [vmem:[#allocation6 + $0x120] sm:$0xff]  ;;  %4066 = vmatpush1.bf16.msra.mxu0 %v5714_v52  ;;  %v83_v47 = vld [vmem:[#allocation4 + $0x78] sm:$0xff] }
  0x39   :  { %v5717_v57 = vpack.c.bf16 %v451_v51, %v447_v50  ;;  %v109_v59 = vld [vmem:[#allocation4 + $0x148] sm:$0xff]  ;;  %4004 = vmatprep.subr.bf16.mxu1 %v4003_v53  ;;  %v5720_v1 = vpack.c.bf16 %v450_v58, %v446_v56  ;;  %v108_v3 = vld [vmem:[#allocation4 + $0x140] sm:$0xff]  ;;  %v4023_v51 = vpack.c.bf16 %v83_v47, %v79_v46  ;;  %v78_v53 = vld [vmem:[#allocation4 + $0x50] sm:$0xff] }
  0x3a   :  { %v113_v60 = vld [vmem:[#allocation4 + $0x168] sm:$0xff]  ;;  %v112_v4 = vld [vmem:[#allocation4 + $0x160] sm:$0xff]  ;;  %4006 = vmatpush1.bf16.msra.mxu1 %v4005_v63  ;;  %v82_v54 = vld [vmem:[#allocation4 + $0x70] sm:$0xff] }
  0x3b   :  { %v455_v61 = vld [vmem:[#allocation6 + $0x148] sm:$0xff]  ;;  %v4007_v2 = vpack.c.bf16 %v113_v60, %v109_v59  ;;  %v454_v5 = vld [vmem:[#allocation6 + $0x140] sm:$0xff]  ;;  %4068 = vmatprep.subr.bf16.mxu0 %v5717_v57  ;;  %v4009_v14 = vpack.c.bf16 %v112_v4, %v108_v3  ;;  %v87_v55 = vld [vmem:[#allocation4 + $0x98] sm:$0xff]  ;;  %v4025_v59 = vpack.c.bf16 %v82_v54, %v78_v53 }
  0x3c   :  { %v459_v62 = vld [vmem:[#allocation6 + $0x168] sm:$0xff]  ;;  %v458_v7 = vld [vmem:[#allocation6 + $0x160] sm:$0xff]  ;;  %4070 = vmatpush1.bf16.msra.mxu0 %v5720_v1  ;;  %v91_v56 = vld [vmem:[#allocation4 + $0xb8] sm:$0xff] }
  0x3d   :  { %v5723_v6 = vpack.c.bf16 %v459_v62, %v455_v61  ;;  %v117_v8 = vld [vmem:[#allocation4 + $0x188] sm:$0xff]  ;;  %4008 = vmatprep.subr.bf16.mxu1 %v4007_v2  ;;  %v5726_v15 = vpack.c.bf16 %v458_v7, %v454_v5  ;;  %v116_v17 = vld [vmem:[#allocation4 + $0x180] sm:$0xff]  ;;  %v4027_v60 = vpack.c.bf16 %v91_v56, %v87_v55  ;;  %v86_v61 = vld [vmem:[#allocation4 + $0x90] sm:$0xff] }
  0x3e   :  { %v121_v10 = vld [vmem:[#allocation4 + $0x1a8] sm:$0xff]  ;;  %v120_v18 = vld [vmem:[#allocation4 + $0x1a0] sm:$0xff]  ;;  %4010 = vmatpush1.bf16.msra.mxu1 %v4009_v14  ;;  %v90_v62 = vld [vmem:[#allocation4 + $0xb0] sm:$0xff] }
  0x3f   :  { %v463_v11 = vld [vmem:[#allocation6 + $0x188] sm:$0xff]  ;;  %v4011_v16 = vpack.c.bf16 %v121_v10, %v117_v8  ;;  %v462_v19 = vld [vmem:[#allocation6 + $0x180] sm:$0xff]  ;;  %4072 = vmatprep.subr.bf16.mxu0 %v5723_v6  ;;  %v4013_v28 = vpack.c.bf16 %v120_v18, %v116_v17  ;;  %v95_v63 = vld [vmem:[#allocation4 + $0xd8] sm:$0xff]  ;;  %v4029_v4 = vpack.c.bf16 %v90_v62, %v86_v61 }
  0x40   :  { %v467_v12 = vld [vmem:[#allocation6 + $0x1a8] sm:$0xff]  ;;  %v466_v21 = vld [vmem:[#allocation6 + $0x1a0] sm:$0xff]  ;;  %4074 = vmatpush1.bf16.msra.mxu0 %v5726_v15  ;;  %v99_v2 = vld [vmem:[#allocation4 + $0xf8] sm:$0xff] }
  0x41   :  { %v5729_v20 = vpack.c.bf16 %v467_v12, %v463_v11  ;;  %v125_v23 = vld [vmem:[#allocation4 + $0x1c8] sm:$0xff]  ;;  %4012 = vmatprep.subr.bf16.mxu1 %v4011_v16  ;;  %v5732_v29 = vpack.c.bf16 %v466_v21, %v462_v19  ;;  %v124_v31 = vld [vmem:[#allocation4 + $0x1c0] sm:$0xff]  ;;  %v5769_v3 = vld [vmem:[%s6813_s0 + $0x10] sm:$0xff]  ;;  %v4031_v5 = vpack.c.bf16 %v99_v2, %v95_v63 }
  0x42   :  { %v129_v24 = vld [vmem:[#allocation4 + $0x1e8] sm:$0xff]  ;;  %v128_v32 = vld [vmem:[#allocation4 + $0x1e0] sm:$0xff]  ;;  %4014 = vmatpush1.bf16.msra.mxu1 %v4013_v28  ;;  %v94_v7 = vld [vmem:[#allocation4 + $0xd0] sm:$0xff] }
  0x43   :  { %v471_v25 = vld [vmem:[#allocation6 + $0x1c8] sm:$0xff]  ;;  %v4015_v30 = vpack.c.bf16 %v129_v24, %v125_v23  ;;  %v470_v33 = vld [vmem:[#allocation6 + $0x1c0] sm:$0xff]  ;;  %4076 = vmatprep.subr.bf16.mxu0 %v5729_v20  ;;  %v4017_v40 = vpack.c.bf16 %v128_v32, %v124_v31  ;;  %v98_v8 = vld [vmem:[#allocation4 + $0xf0] sm:$0xff] }
  0x44   :  { %v475_v27 = vld [vmem:[#allocation6 + $0x1e8] sm:$0xff]  ;;  %v474_v36 = vld [vmem:[#allocation6 + $0x1e0] sm:$0xff]  ;;  %4078 = vmatpush1.bf16.msra.mxu0 %v5732_v29  ;;  %v103_v10 = vld [vmem:[#allocation4 + $0x118] sm:$0xff]  ;;  %v4033_v14 = vpack.c.bf16 %v98_v8, %v94_v7 }
  0x45   :  { %v5735_v34 = vpack.c.bf16 %v475_v27, %v471_v25  ;;  %4016 = vmatprep.subr.bf16.mxu1 %v4015_v30  ;;  %v5738_v41 = vpack.c.bf16 %v474_v36, %v470_v33  ;;  %v5744_v48 = vld [vmem:[%s6813_s0] sm:$0xff]  ;;  %v5758_v58 = vld [vmem:[%s6813_s0 + $0x8] sm:$0xff]  ;;  %v107_v11 = vld [vmem:[#allocation4 + $0x138] sm:$0xff] }
  0x46   :  { %4018 = vmatpush1.bf16.msra.mxu1 %v4017_v40  ;;  %v5750_v50 = vld [vmem:[%s6814_s1] sm:$0xff]  ;;  %v5778_v12 = vld [vmem:[%s6813_s0 + $0x18] sm:$0xff]  ;;  %v4035_v16 = vpack.c.bf16 %v107_v11, %v103_v10  ;;  %v102_v17 = vld [vmem:[#allocation4 + $0x110] sm:$0xff] }
  0x47   :  { %4080 = vmatprep.subr.bf16.mxu0 %v5735_v34  ;;  %4020 = vmatprep.subr.bf16.mxu1 %v4019_v42  ;;  %v106_v18 = vld [vmem:[#allocation4 + $0x130] sm:$0xff]  ;;  %v111_v19 = vld [vmem:[#allocation4 + $0x158] sm:$0xff]  ;;  %v5787_v23 = vld [vmem:[%s6813_s0 + $0x20] sm:$0xff] }
  0x48   :  { %4082 = vmatpush1.bf16.msra.mxu0 %v5738_v41  ;;  %v115_v21 = vld [vmem:[#allocation4 + $0x178] sm:$0xff]  ;;  %v4037_v24 = vpack.c.bf16 %v106_v18, %v102_v17  ;;  %v110_v27 = vld [vmem:[#allocation4 + $0x150] sm:$0xff]  ;;  %v5796_v32 = vld [vmem:[%s6813_s0 + $0x28] sm:$0xff] }
  0x49   :  { %4116 = vmatprep.subr.bf16.mxu0 %v5694_v9  ;;  %219 = vmatmul.mubr.f32.vlgmr.msra.gmra.mrb[0].mxu1 %v5744_v48  ;;  %v4039_v25 = vpack.c.bf16 %v115_v21, %v111_v19  ;;  %v114_v28 = vld [vmem:[#allocation4 + $0x170] sm:$0xff]  ;;  %v119_v30 = vld [vmem:[#allocation4 + $0x198] sm:$0xff] }
  0x4a   :  { %4022 = vmatpush1.bf16.msra.mxu1 %v4021_v49  ;;  %224 = vmatprep.mubr.f32.mxu1 %v6828_v0  ;;  %v123_v31 = vld [vmem:[#allocation4 + $0x1b8] sm:$0xff]  ;;  %v4041_v33 = vpack.c.bf16 %v114_v28, %v110_v27  ;;  %v118_v37 = vld [vmem:[#allocation4 + $0x190] sm:$0xff] }
  0x4b   :  { %547 = vmatmul.mubr.f32.vlgmr.msra.gmra.mrb[0].mxu0 %v5750_v50  ;;  %4024 = vmatprep.subr.bf16.mxu1 %v4023_v51  ;;  %v4043_v36 = vpack.c.bf16 %v123_v31, %v119_v30  ;;  %v122_v38 = vld [vmem:[#allocation4 + $0x1b0] sm:$0xff]  ;;  %v127_v40 = vld [vmem:[#allocation4 + $0x1d8] sm:$0xff] }
  0x4c   :  { %4118 = vmatpush1.bf16.msra.mxu0 %v5696_v13  ;;  %721 = vmatprep.mubr.f32.mxu0 %v6828_v0  ;;  %v131_v42 = vld [vmem:[#allocation4 + $0x1f8] sm:$0xff]  ;;  %v5805_v43 = vld [vmem:[%s6813_s0 + $0x30] sm:$0xff]  ;;  %v4045_v45 = vpack.c.bf16 %v122_v38, %v118_v37 }
  0x4d   :  { %225 = vmatmul.mubr.f32.gmra.mrb[2].mxu1 %v5758_v58  ;;  %4120 = vmatprep.subr.bf16.mxu0 %v5700_v22  ;;  %v4047_v46 = vpack.c.bf16 %v131_v42, %v127_v40  ;;  %v126_v47 = vld [vmem:[#allocation4 + $0x1d0] sm:$0xff]  ;;  %v417_v51 = vld [vmem:[#allocation6 + $0x18] sm:$0xff] }
  0x4e   :  { %4026 = vmatpush1.bf16.msra.mxu1 %v4025_v59  ;;  %230 = vmatprep.mubr.f32.mxu1 %v6828_v0  ;;  %v130_v49 = vld [vmem:[#allocation4 + $0x1f0] sm:$0xff]  ;;  %v421_v53 = vld [vmem:[#allocation6 + $0x38] sm:$0xff] }
  0x4f   :  { %4028 = vmatprep.subr.bf16.mxu1 %v4027_v60  ;;  %v5814_v54 = vld [vmem:[%s6813_s0 + $0x38] sm:$0xff]  ;;  %v4049_v55 = vpack.c.bf16 %v130_v49, %v126_v47  ;;  %v5816_v56 = vpack.c.bf16 %v421_v53, %v417_v51  ;;  %v416_v59 = vld [vmem:[#allocation6 + $0x10] sm:$0xff] }
  0x50   :  { %4122 = vmatpush1.bf16.msra.mxu0 %v5702_v26  ;;  %v420_v60 = vld [vmem:[#allocation6 + $0x30] sm:$0xff]  ;;  %v425_v61 = vld [vmem:[#allocation6 + $0x58] sm:$0xff] }
  0x51   :  { %231 = vmatmul.mubr.f32.gmra.mrb[4].mxu1 %v5769_v3  ;;  %4124 = vmatprep.subr.bf16.mxu0 %v5705_v35  ;;  %v429_v62 = vld [vmem:[#allocation6 + $0x78] sm:$0xff]  ;;  %v5822_v63 = vpack.c.bf16 %v420_v60, %v416_v59  ;;  %v440_v21 = vld [vmem:[#allocation6 + $0xd0] sm:$0xff] }
  0x52   :  { %4030 = vmatpush1.bf16.msra.mxu1 %v4029_v4  ;;  %236 = vmatprep.mubr.f32.mxu1 %v6828_v0  ;;  %v5825_v2 = vpack.c.bf16 %v429_v62, %v425_v61  ;;  %v424_v4 = vld [vmem:[#allocation6 + $0x50] sm:$0xff]  ;;  %v433_v7 = vld [vmem:[#allocation6 + $0x98] sm:$0xff] }
  0x53   :  { %4032 = vmatprep.subr.bf16.mxu1 %v4031_v5  ;;  %v428_v5 = vld [vmem:[#allocation6 + $0x70] sm:$0xff]  ;;  %v437_v8 = vld [vmem:[#allocation6 + $0xb8] sm:$0xff] }
  0x54   :  { %4126 = vmatpush1.bf16.msra.mxu0 %v5708_v39  ;;  %v5832_v10 = vpack.c.bf16 %v428_v5, %v424_v4  ;;  %v5835_v11 = vpack.c.bf16 %v437_v8, %v433_v7  ;;  %v441_v17 = vld [vmem:[#allocation6 + $0xd8] sm:$0xff]  ;;  %v448_v30 = vld [vmem:[#allocation6 + $0x110] sm:$0xff] }
  0x55   :  { %237 = vmatmul.mubr.f32.gmra.mrb[6].mxu1 %v5778_v12  ;;  %4128 = vmatprep.subr.bf16.mxu0 %v5711_v44  ;;  %v445_v18 = vld [vmem:[#allocation6 + $0xf8] sm:$0xff]  ;;  %v452_v31 = vld [vmem:[#allocation6 + $0x130] sm:$0xff] }
  0x56   :  { %4034 = vmatpush1.bf16.msra.mxu1 %v4033_v14  ;;  %242 = vmatprep.mubr.f32.mxu1 %v6828_v0  ;;  %v432_v14 = vld [vmem:[#allocation6 + $0x90] sm:$0xff]  ;;  %v5843_v19 = vpack.c.bf16 %v445_v18, %v441_v17  ;;  %v453_v27 = vld [vmem:[#allocation6 + $0x138] sm:$0xff] }
  0x57   :  { %4036 = vmatprep.subr.bf16.mxu1 %v4035_v16  ;;  %v436_v16 = vld [vmem:[#allocation6 + $0xb0] sm:$0xff]  ;;  %v465_v42 = vld [vmem:[#allocation6 + $0x198] sm:$0xff] }
  0x58   :  { %4130 = vmatpush1.bf16.msra.mxu0 %v5714_v52  ;;  %v456_v38 = vld [vmem:[#allocation6 + $0x150] sm:$0xff]  ;;  %v473_v51 = vld [vmem:[#allocation6 + $0x1d8] sm:$0xff] }
  0x59   :  { %243 = vmatmul.mubr.f32.gmra.mrb[8].mxu1 %v5787_v23  ;;  %4132 = vmatprep.subr.bf16.mxu0 %v5717_v57  ;;  %v460_v40 = vld [vmem:[#allocation6 + $0x170] sm:$0xff]  ;;  %v477_v53 = vld [vmem:[#allocation6 + $0x1f8] sm:$0xff] }
  0x5a   :  { %4038 = vmatpush1.bf16.msra.mxu1 %v4037_v24  ;;  %248 = vmatprep.mubr.f32.mxu1 %v6828_v0  ;;  %v444_v24 = vld [vmem:[#allocation6 + $0xf0] sm:$0xff] }
  0x5b   :  { %4040 = vmatprep.subr.bf16.mxu1 %v4039_v25  ;;  %v449_v25 = vld [vmem:[#allocation6 + $0x118] sm:$0xff]  ;;  %v464_v47 = vld [vmem:[#allocation6 + $0x190] sm:$0xff] }
  0x5c   :  { %4134 = vmatpush1.bf16.msra.mxu0 %v5720_v1  ;;  %v5851_v28 = vpack.c.bf16 %v453_v27, %v449_v25  ;;  %v468_v49 = vld [vmem:[#allocation6 + $0x1b0] sm:$0xff] }
  0x5d   :  { %249 = vmatmul.mubr.f32.gmra.mrb[10].mxu1 %v5796_v32  ;;  %4136 = vmatprep.subr.bf16.mxu0 %v5723_v6  ;;  %v472_v59 = vld [vmem:[#allocation6 + $0x1d0] sm:$0xff] }
  0x5e   :  { %4042 = vmatpush1.bf16.msra.mxu1 %v4041_v33  ;;  %254 = vmatprep.mubr.f32.mxu1 %v6828_v0  ;;  %v457_v33 = vld [vmem:[#allocation6 + $0x158] sm:$0xff]  ;;  %v476_v60 = vld [vmem:[#allocation6 + $0x1f0] sm:$0xff] }
  0x5f   :  { %4044 = vmatprep.subr.bf16.mxu1 %v4043_v36  ;;  %v461_v36 = vld [vmem:[#allocation6 + $0x178] sm:$0xff]  ;;  %v5880_v61 = vpack.c.bf16 %v476_v60, %v472_v59 }
  0x60   :  { %4138 = vmatpush1.bf16.msra.mxu0 %v5726_v15  ;;  %v5859_v37 = vpack.c.bf16 %v461_v36, %v457_v33 }
  0x61   :  { %255 = vmatmul.mubr.f32.gmra.mrb[12].mxu1 %v5805_v43  ;;  %4140 = vmatprep.subr.bf16.mxu0 %v5729_v20 }
  0x62   :  { %4046 = vmatpush1.bf16.msra.mxu1 %v4045_v45  ;;  %260 = vmatprep.mubr.f32.mxu1 %v6828_v0  ;;  %v469_v45 = vld [vmem:[#allocation6 + $0x1b8] sm:$0xff] }
  0x63   :  { %4048 = vmatprep.subr.bf16.mxu1 %v4047_v46  ;;  %v5867_v46 = vpack.c.bf16 %v469_v45, %v465_v42 }
  0x64   :  { %4142 = vmatpush1.bf16.msra.mxu0 %v5732_v29 }
  0x65   :  { %261 = vmatmul.mubr.f32.gmra.mrb[14].mxu1 %v5814_v54  ;;  %4144 = vmatprep.subr.bf16.mxu0 %v5735_v34 }
  0x66   :  { %4050 = vmatpush1.bf16.msra.mxu1 %v4049_v55  ;;  %331 = vmatprep.mubr.f32.mxu1 %v6828_v0  ;;  %v5875_v55 = vpack.c.bf16 %v477_v53, %v473_v51 }
  0x67   :  { %4084 = vmatprep.subr.bf16.mxu1 %v5816_v56 }
  0x68   :  { %4146 = vmatpush1.bf16.msra.mxu0 %v5738_v41 }
  0x69   :  { %332 = vmatmul.mubr.f32.vlgmr.msra.gmra.mrb[16].mxu1 %v5744_v48  ;;  %4180 = vmatprep.subr.bf16.mxu0 %v5694_v9  ;;  %v5840_v48 = vpack.c.bf16 %v436_v16, %v432_v14 }
  0x6a   :  { %4086 = vmatpush1.bf16.msra.mxu1 %v5822_v63  ;;  %337 = vmatprep.mubr.f32.mxu1 %v6828_v0 }
  0x6b   :  { %4088 = vmatprep.subr.bf16.mxu1 %v5825_v2 }
  0x6d   :  { %338 = vmatmul.mubr.f32.gmra.mrb[18].mxu1 %v5758_v58  ;;  %v5848_v58 = vpack.c.bf16 %v444_v24, %v440_v21 }
  0x6e   :  { %4090 = vmatpush1.bf16.msra.mxu1 %v5832_v10  ;;  %343 = vmatprep.mubr.f32.mxu1 %v6828_v0 }
  0x6f   :  { %4092 = vmatprep.subr.bf16.mxu1 %v5835_v11 }
  0x71   :  { %344 = vmatmul.mubr.f32.gmra.mrb[20].mxu1 %v5769_v3  ;;  %v5856_v3 = vpack.c.bf16 %v452_v31, %v448_v30 }
  0x72   :  { %4094 = vmatpush1.bf16.msra.mxu1 %v5840_v48  ;;  %349 = vmatprep.mubr.f32.mxu1 %v6828_v0 }
  0x73   :  { %4096 = vmatprep.subr.bf16.mxu1 %v5843_v19 }
  0x75   :  { %350 = vmatmul.mubr.f32.gmra.mrb[22].mxu1 %v5778_v12  ;;  %v5864_v12 = vpack.c.bf16 %v460_v40, %v456_v38 }
  0x76   :  { %4098 = vmatpush1.bf16.msra.mxu1 %v5848_v58  ;;  %355 = vmatprep.mubr.f32.mxu1 %v6828_v0 }
  0x77   :  { %4100 = vmatprep.subr.bf16.mxu1 %v5851_v28 }
  0x79   :  { %356 = vmatmul.mubr.f32.gmra.mrb[24].mxu1 %v5787_v23  ;;  %v5872_v23 = vpack.c.bf16 %v468_v49, %v464_v47 }
  0x7a   :  { %4102 = vmatpush1.bf16.msra.mxu1 %v5856_v3  ;;  %361 = vmatprep.mubr.f32.mxu1 %v6828_v0 }
  0x7b   :  { %4104 = vmatprep.subr.bf16.mxu1 %v5859_v37 }
  0x7d   :  { %362 = vmatmul.mubr.f32.gmra.mrb[26].mxu1 %v5796_v32 }
  0x7e   :  { %4106 = vmatpush1.bf16.msra.mxu1 %v5864_v12  ;;  %367 = vmatprep.mubr.f32.mxu1 %v6828_v0 }
  0x7f   :  { %4108 = vmatprep.subr.bf16.mxu1 %v5867_v46 }
  0x81   :  { %368 = vmatmul.mubr.f32.gmra.mrb[28].mxu1 %v5805_v43 }
  0x82   :  { %4110 = vmatpush1.bf16.msra.mxu1 %v5872_v23  ;;  %373 = vmatprep.mubr.f32.mxu1 %v6828_v0 }
  0x83   :  { %4112 = vmatprep.subr.bf16.mxu1 %v5875_v55 }
  0x85   :  { %374 = vmatmul.mubr.f32.gmra.mrb[30].mxu1 %v5814_v54  ;;  %v132_v54 = vld [vmem:[%s6818_s5] sm:$0xf] }
  0x86   :  { %4114 = vmatpush1.bf16.msra.mxu1 %v5880_v61  ;;  %617 = vmatprep.mubr.f32.mxu1 %v6828_v0 }
  0x87   :  { %4148 = vmatprep.subr.bf16.mxu1 %v5816_v56 }
  0x89   :  { %618 = vmatmul.mubr.f32.vlgmr.msra.gmra.mrb[16].mxu1 %v5750_v50  ;;  %v134_v50 = vlaneseq }
  0x8a   :  { %4150 = vmatpush1.bf16.msra.mxu1 %v5822_v63  ;;  %792 = vmatprep.mubr.f32.mxu1 %v6828_v0 }
  0x8b   :  { %4152 = vmatprep.subr.bf16.mxu1 %v5825_v2  ;;  %v5905_v32 = vshrl.u32 %v134_v50, 7 }
  0x8d   :  { %6832 = vst [vmem:[#allocation10_spill] sm:$0xff] %v5905_v32  ;;  %v6827_v43 = vsub.s32 0, %v5905_v32  ;;  %v6824_v62 = vsub.s32 1, %v5905_v32 }
  0x8e   :  { %4154 = vmatpush1.bf16.msra.mxu1 %v5832_v10 }
  0x8f   :  { %4156 = vmatprep.subr.bf16.mxu1 %v5835_v11  ;;  %v137_v4 = vrot.slane %v132_v54, %v6827_v43  ;;  %v141_v5 = vrot.slane %v132_v54, %v6824_v62 }
  0x92   :  { %4158 = vmatpush1.bf16.msra.mxu1 %v5840_v48 }
  0x93   :  { %4160 = vmatprep.subr.bf16.mxu1 %v5843_v19 }
  0x96   :  { %4162 = vmatpush1.bf16.msra.mxu1 %v5848_v58 }
  0x97   :  { %4164 = vmatprep.subr.bf16.mxu1 %v5851_v28 }
  0x9a   :  { %4166 = vmatpush1.bf16.msra.mxu1 %v5856_v3 }
  0x9b   :  { %4168 = vmatprep.subr.bf16.mxu1 %v5859_v37 }
  0x9e   :  { %4170 = vmatpush1.bf16.msra.mxu1 %v5864_v12 }
  0x9f   :  { %4172 = vmatprep.subr.bf16.mxu1 %v5867_v46 }
  0xa2   :  { %4174 = vmatpush1.bf16.msra.mxu1 %v5872_v23 }
  0xa3   :  { %4176 = vmatprep.subr.bf16.mxu1 %v5875_v55 }
  0xa6   :  { %4178 = vmatpush1.bf16.msra.mxu1 %v5880_v61 }
  0xa7   :  { %4212 = vmatprep.subr.bf16.mxu1 %v5816_v56 }
 0x11c   :  { %v220_v7 = vpop.f32.mrb[0].mxu1 }
 0x11d   :  { %v221_v8 = vadd.f32 %v220_v7, %v137_v4  ;;  %v222_v14 = vpop.f32.mrb[1].mxu1 }
 0x11e   :  { %v548_v16 = vpop.f32.mrb[0].mxu0  ;;  %v223_v17 = vadd.f32 %v222_v14, %v141_v5 }
 0x11f   :  { %v550_v18 = vpop.f32.mrb[1].mxu0  ;;  %v624_v21 = vadd.f32 %v548_v16, %v221_v8 }
 0x120   :  { %v625_v24 = vadd.f32 %v550_v18, %v223_v17  ;;  %v226_v25 = vpop.f32.mrb[2].mxu1 }
 0x121   :  { %v5916_v27 = vadd.f32 %v226_v25, %v137_v4  ;;  %v228_v30 = vpop.f32.mrb[3].mxu1 }
 0x122   :  { %v5918_v31 = vadd.f32 %v228_v30, %v141_v5 }
 0x124   :  { %v232_v33 = vpop.f32.mrb[4].mxu1 }
 0x125   :  { %v5920_v36 = vadd.f32 %v232_v33, %v137_v4  ;;  %v234_v38 = vpop.f32.mrb[5].mxu1 }
 0x126   :  { %v5922_v40 = vadd.f32 %v234_v38, %v141_v5 }
 0x128   :  { %v238_v42 = vpop.f32.mrb[6].mxu1 }
 0x129   :  { %v5924_v45 = vadd.f32 %v238_v42, %v137_v4  ;;  %v240_v47 = vpop.f32.mrb[7].mxu1 }
 0x12a   :  { %v5926_v49 = vadd.f32 %v240_v47, %v141_v5  ;;  %v3866_v47 = vmul.f32 -1.442695, %v625_v24 }
 0x12c   :  { %v244_v51 = vpop.f32.mrb[8].mxu1  ;;  %5304 = vpow2.f32 %v3866_v47 }
 0x12d   :  { %v5928_v53 = vadd.f32 %v244_v51, %v137_v4  ;;  %v246_v59 = vpop.f32.mrb[9].mxu1  ;;  %v3865_v51 = vmul.f32 -1.442695, %v624_v21 }
 0x12e   :  { %v5930_v60 = vadd.f32 %v246_v59, %v141_v5  ;;  %v6825_v59 = vsub.s32 2, %v5905_v32 }
 0x12f   :  { %5306 = vpow2.f32 %v3865_v51 }
 0x130   :  { %v250_v50 = vpop.f32.mrb[10].mxu1 }
 0x131   :  { %v5932_v7 = vadd.f32 %v250_v50, %v137_v4  ;;  %v252_v8 = vpop.f32.mrb[11].mxu1 }
 0x132   :  { %v5934_v14 = vadd.f32 %v252_v8, %v141_v5  ;;  %v6826_v8 = vsub.s32 3, %v5905_v32 }
 0x134   :  { %v256_v16 = vpop.f32.mrb[12].mxu1 }
 0x135   :  { %v5936_v17 = vadd.f32 %v256_v16, %v137_v4  ;;  %v258_v18 = vpop.f32.mrb[13].mxu1 }
 0x136   :  { %v5938_v25 = vadd.f32 %v258_v18, %v141_v5  ;;  %v5305_v50 = vpop.eup %5304  ;;  %v5948_v18 = vrot.slane %v132_v54, %v6825_v59 }
 0x137   :  { %v637_v62 = vadd.f32 1.0, %v5305_v50  ;;  %v413_v50 = vld [vmem:[%s6815_s2] sm:$0xff] }
 0x138   :  { %v262_v30 = vpop.f32.mrb[14].mxu1 }
 0x139   :  { %v5940_v33 = vadd.f32 %v262_v30, %v137_v4  ;;  %v264_v38 = vpop.f32.mrb[15].mxu1  ;;  %v5307_v16 = vpop.eup %5306  ;;  %5308 = vrcp.f32 %v637_v62 }
 0x13a   :  { %v5942_v42 = vadd.f32 %v264_v38, %v141_v5  ;;  %v631_v4 = vadd.f32 1.0, %v5307_v16  ;;  %v5952_v5 = vrot.slane %v132_v54, %v6826_v8 }
 0x13c   :  { %6833 = vst [vmem:[#allocation11_spill] sm:$0xff] %v5942_v42  ;;  %5310 = vrcp.f32 %v631_v4 }
 0x143   :  { %v5309_v51 = vpop.eup %5308 }
 0x144   :  { %v647_v54 = vmul.f32 %v5309_v51, %v413_v50 }
 0x146   :  { %v5311_v16 = vpop.eup %5310 }
 0x15c   :  { %v619_v24 = vpop.f32.mrb[16].mxu1 }
 0x15d   :  { %v5203_v21 = vadd.f32 %v619_v24, %v5948_v18  ;;  %v621_v30 = vpop.f32.mrb[17].mxu1 }
 0x15e   :  { %v5204_v38 = vadd.f32 %v621_v30, %v5952_v5 }
 0x15f   :  { %5312 = vtanh.f32 %v5203_v21 }
 0x160   :  { %v3867_v47 = vmul.f32 -1.442695, %v5204_v38 }
 0x162   :  { %5314 = vpow2.f32 %v3867_v47 }
 0x169   :  { %v5313_v59 = vpop.eup %5312 }
 0x16a   :  { %v648_v8 = vmul.f32 %v5313_v59, %v5311_v16 }
 0x16c   :  { %v5315_v43 = vpop.eup %5314  ;;  %v5959_v62 = vadd.f32 %v648_v8, %v647_v54 }
 0x16d   :  { %v644_v24 = vadd.f32 1.0, %v5315_v43 }
 0x16e   :  { %5316 = vtanh.f32 %v5959_v62 }
 0x16f   :  { %5318 = vrcp.f32 %v644_v24 }
 0x178   :  { %v5317_v4 = vpop.eup %5316 }
 0x179   :  { %v5319_v21 = vpop.eup %5318 }
 0x17a   :  { %v5962_v30 = vmul.f32 %v5319_v21, %v5317_v4 }
 0x17c   :  { %722 = vmatmul.mubr.f32.vlgmr.msra.gmra.mrb[2].mxu0 %v5962_v30  ;;  %793 = vmatmul.mubr.f32.vlgmr.msra.gmra.mrb[18].mxu1 %v5962_v30 }
 0x17d   :  { %4182 = vmatpush1.bf16.msra.mxu0 %v5696_v13  ;;  %4214 = vmatpush1.bf16.msra.mxu1 %v5822_v63 }
 0x17e   :  { %4184 = vmatprep.subr.bf16.mxu0 %v5700_v22  ;;  %4216 = vmatprep.subr.bf16.mxu1 %v5825_v2 }
 0x17f   :  { %896 = vmatprep.mubr.f32.mxu0 %v6828_v0  ;;  %967 = vmatprep.mubr.f32.mxu1 %v6828_v0 }
 0x181   :  { %4186 = vmatpush1.bf16.msra.mxu0 %v5702_v26  ;;  %4218 = vmatpush1.bf16.msra.mxu1 %v5832_v10 }
 0x182   :  { %4188 = vmatprep.subr.bf16.mxu0 %v5705_v35  ;;  %4220 = vmatprep.subr.bf16.mxu1 %v5835_v11 }
 0x185   :  { %4190 = vmatpush1.bf16.msra.mxu0 %v5708_v39  ;;  %4222 = vmatpush1.bf16.msra.mxu1 %v5840_v48 }
 0x186   :  { %4192 = vmatprep.subr.bf16.mxu0 %v5711_v44  ;;  %4224 = vmatprep.subr.bf16.mxu1 %v5843_v19 }
 0x189   :  { %4194 = vmatpush1.bf16.msra.mxu0 %v5714_v52  ;;  %4226 = vmatpush1.bf16.msra.mxu1 %v5848_v58 }
 0x18a   :  { %4196 = vmatprep.subr.bf16.mxu0 %v5717_v57  ;;  %4228 = vmatprep.subr.bf16.mxu1 %v5851_v28 }
 0x18d   :  { %4198 = vmatpush1.bf16.msra.mxu0 %v5720_v1  ;;  %4230 = vmatpush1.bf16.msra.mxu1 %v5856_v3 }
 0x18e   :  { %4200 = vmatprep.subr.bf16.mxu0 %v5723_v6  ;;  %4232 = vmatprep.subr.bf16.mxu1 %v5859_v37 }
 0x191   :  { %4202 = vmatpush1.bf16.msra.mxu0 %v5726_v15  ;;  %4234 = vmatpush1.bf16.msra.mxu1 %v5864_v12 }
 0x192   :  { %4204 = vmatprep.subr.bf16.mxu0 %v5729_v20  ;;  %4236 = vmatprep.subr.bf16.mxu1 %v5867_v46 }
 0x195   :  { %4206 = vmatpush1.bf16.msra.mxu0 %v5732_v29  ;;  %4238 = vmatpush1.bf16.msra.mxu1 %v5872_v23 }
 0x196   :  { %4208 = vmatprep.subr.bf16.mxu0 %v5735_v34  ;;  %4240 = vmatprep.subr.bf16.mxu1 %v5875_v55 }
 0x199   :  { %4210 = vmatpush1.bf16.msra.mxu0 %v5738_v41  ;;  %4242 = vmatpush1.bf16.msra.mxu1 %v5880_v61 }
 0x19a   :  { %4244 = vmatprep.subr.bf16.mxu0 %v5694_v9  ;;  %4276 = vmatprep.subr.bf16.mxu1 %v5816_v56 }
 0x24f   :  { %v723_v43 = vpop.f32.mrb[2].mxu0  ;;  %v794_v59 = vpop.f32.mrb[18].mxu1 }
 0x250   :  { %v799_v8 = vadd.f32 %v723_v43, %v5916_v27  ;;  %v725_v38 = vpop.f32.mrb[3].mxu0  ;;  %v796_v47 = vpop.f32.mrb[19].mxu1  ;;  %v5205_v4 = vadd.f32 %v794_v59, %v5948_v18 }
 0x251   :  { %v800_v51 = vadd.f32 %v725_v38, %v5918_v31  ;;  %v5206_v54 = vadd.f32 %v796_v47, %v5952_v5 }
 0x252   :  { %v3868_v50 = vmul.f32 -1.442695, %v799_v8 }
 0x253   :  { %v3869_v16 = vmul.f32 -1.442695, %v800_v51  ;;  %v3870_v24 = vmul.f32 -1.442695, %v5206_v54 }
 0x254   :  { %5320 = vpow2.f32 %v3868_v50 }
 0x255   :  { %5322 = vpow2.f32 %v3869_v16 }
 0x256   :  { %5324 = vpow2.f32 %v3870_v24 }
 0x257   :  { %5326 = vtanh.f32 %v5205_v4 }
 0x25e   :  { %v5321_v21 = vpop.eup %5320 }
 0x25f   :  { %v5323_v0 = vpop.eup %5322  ;;  %v806_v32 = vadd.f32 1.0, %v5321_v21 }
 0x260   :  { %v812_v42 = vadd.f32 1.0, %v5323_v0  ;;  %v5325_v27 = vpop.eup %5324  ;;  %v6834_v0 = vmov 0.0  }
 0x261   :  { %5328 = vrcp.f32 %v806_v32  ;;  %v5327_v43 = vpop.eup %5326  ;;  %v819_v51 = vadd.f32 1.0, %v5325_v27 }
 0x262   :  { %5330 = vrcp.f32 %v812_v42 }
 0x263   :  { %5332 = vrcp.f32 %v819_v51 }
 0x26b   :  { %v5329_v31 = vpop.eup %5328 }
 0x26c   :  { %v5331_v8 = vpop.eup %5330  ;;  %v823_v38 = vmul.f32 %v5329_v31, %v5327_v43 }
 0x26d   :  { %v822_v50 = vmul.f32 %v5331_v8, %v5959_v62  ;;  %v5333_v59 = vpop.eup %5332 }
 0x26f   :  { %v6005_v47 = vadd.f32 %v823_v38, %v822_v50 }
 0x271   :  { %5334 = vtanh.f32 %v6005_v47 }
 0x27b   :  { %v5335_v16 = vpop.eup %5334 }
 0x27c   :  { %v6008_v54 = vmul.f32 %v5335_v16, %v5333_v59 }
 0x27e   :  { %897 = vmatmul.mubr.f32.vlgmr.msra.gmra.mrb[4].mxu0 %v6008_v54  ;;  %968 = vmatmul.mubr.f32.vlgmr.msra.gmra.mrb[20].mxu1 %v6008_v54 }
 0x27f   :  { %4246 = vmatpush1.bf16.msra.mxu0 %v5696_v13  ;;  %4278 = vmatpush1.bf16.msra.mxu1 %v5822_v63 }
 0x280   :  { %4248 = vmatprep.subr.bf16.mxu0 %v5700_v22  ;;  %4280 = vmatprep.subr.bf16.mxu1 %v5825_v2 }
 0x281   :  { %1071 = vmatprep.mubr.f32.mxu0 %v6834_v0  ;;  %1142 = vmatprep.mubr.f32.mxu1 %v6834_v0 }
 0x283   :  { %4250 = vmatpush1.bf16.msra.mxu0 %v5702_v26  ;;  %4282 = vmatpush1.bf16.msra.mxu1 %v5832_v10 }
 0x284   :  { %4252 = vmatprep.subr.bf16.mxu0 %v5705_v35  ;;  %4284 = vmatprep.subr.bf16.mxu1 %v5835_v11 }
 0x287   :  { %4254 = vmatpush1.bf16.msra.mxu0 %v5708_v39  ;;  %4286 = vmatpush1.bf16.msra.mxu1 %v5840_v48 }
 0x288   :  { %4256 = vmatprep.subr.bf16.mxu0 %v5711_v44  ;;  %4288 = vmatprep.subr.bf16.mxu1 %v5843_v19 }
 0x28b   :  { %4258 = vmatpush1.bf16.msra.mxu0 %v5714_v52  ;;  %4290 = vmatpush1.bf16.msra.mxu1 %v5848_v58 }
 0x28c   :  { %4260 = vmatprep.subr.bf16.mxu0 %v5717_v57  ;;  %4292 = vmatprep.subr.bf16.mxu1 %v5851_v28 }
 0x28f   :  { %4262 = vmatpush1.bf16.msra.mxu0 %v5720_v1  ;;  %4294 = vmatpush1.bf16.msra.mxu1 %v5856_v3 }
 0x290   :  { %4264 = vmatprep.subr.bf16.mxu0 %v5723_v6  ;;  %4296 = vmatprep.subr.bf16.mxu1 %v5859_v37 }
 0x293   :  { %4266 = vmatpush1.bf16.msra.mxu0 %v5726_v15  ;;  %4298 = vmatpush1.bf16.msra.mxu1 %v5864_v12 }
 0x294   :  { %4268 = vmatprep.subr.bf16.mxu0 %v5729_v20  ;;  %4300 = vmatprep.subr.bf16.mxu1 %v5867_v46 }
 0x297   :  { %4270 = vmatpush1.bf16.msra.mxu0 %v5732_v29  ;;  %4302 = vmatpush1.bf16.msra.mxu1 %v5872_v23 }
 0x298   :  { %4272 = vmatprep.subr.bf16.mxu0 %v5735_v34  ;;  %4304 = vmatprep.subr.bf16.mxu1 %v5875_v55 }
 0x29b   :  { %4274 = vmatpush1.bf16.msra.mxu0 %v5738_v41  ;;  %4306 = vmatpush1.bf16.msra.mxu1 %v5880_v61 }
 0x29c   :  { %4308 = vmatprep.subr.bf16.mxu0 %v5694_v9  ;;  %4340 = vmatprep.subr.bf16.mxu1 %v5816_v56 }
 0x351   :  { %v898_v32 = vpop.f32.mrb[4].mxu0  ;;  %v969_v42 = vpop.f32.mrb[20].mxu1 }
 0x352   :  { %v974_v62 = vadd.f32 %v898_v32, %v5920_v36  ;;  %v900_v24 = vpop.f32.mrb[5].mxu0  ;;  %v971_v4 = vpop.f32.mrb[21].mxu1  ;;  %v5207_v38 = vadd.f32 %v969_v42, %v5948_v18 }
 0x353   :  { %v975_v21 = vadd.f32 %v900_v24, %v5922_v40  ;;  %v5208_v31 = vadd.f32 %v971_v4, %v5952_v5 }
 0x354   :  { %v3871_v27 = vmul.f32 -1.442695, %v974_v62 }
 0x355   :  { %v3872_v43 = vmul.f32 -1.442695, %v975_v21  ;;  %v3873_v8 = vmul.f32 -1.442695, %v5208_v31 }
 0x356   :  { %5336 = vpow2.f32 %v3871_v27 }
 0x357   :  { %5338 = vpow2.f32 %v3872_v43 }
 0x358   :  { %5340 = vpow2.f32 %v3873_v8 }
 0x359   :  { %5342 = vtanh.f32 %v5207_v38 }
 0x360   :  { %v5337_v51 = vpop.eup %5336 }
 0x361   :  { %v5339_v50 = vpop.eup %5338  ;;  %v981_v59 = vadd.f32 1.0, %v5337_v51 }
 0x362   :  { %v987_v16 = vadd.f32 1.0, %v5339_v50  ;;  %v5341_v36 = vpop.eup %5340 }
 0x363   :  { %5344 = vrcp.f32 %v981_v59  ;;  %v5343_v32 = vpop.eup %5342  ;;  %v994_v21 = vadd.f32 1.0, %v5341_v36 }
 0x364   :  { %5346 = vrcp.f32 %v987_v16 }
 0x365   :  { %5348 = vrcp.f32 %v994_v21 }
 0x36d   :  { %v5345_v40 = vpop.eup %5344 }
 0x36e   :  { %v5347_v62 = vpop.eup %5346  ;;  %v998_v24 = vmul.f32 %v5345_v40, %v5343_v32 }
 0x36f   :  { %v997_v27 = vmul.f32 %v5347_v62, %v6005_v47  ;;  %v5349_v42 = vpop.eup %5348 }
 0x371   :  { %v6051_v4 = vadd.f32 %v998_v24, %v997_v27 }
 0x373   :  { %5350 = vtanh.f32 %v6051_v4 }
 0x37d   :  { %v5351_v43 = vpop.eup %5350 }
 0x37e   :  { %v6054_v31 = vmul.f32 %v5351_v43, %v5349_v42 }
 0x380   :  { %1072 = vmatmul.mubr.f32.vlgmr.msra.gmra.mrb[6].mxu0 %v6054_v31  ;;  %1143 = vmatmul.mubr.f32.vlgmr.msra.gmra.mrb[22].mxu1 %v6054_v31 }
 0x381   :  { %4310 = vmatpush1.bf16.msra.mxu0 %v5696_v13  ;;  %4342 = vmatpush1.bf16.msra.mxu1 %v5822_v63 }
 0x382   :  { %4312 = vmatprep.subr.bf16.mxu0 %v5700_v22  ;;  %4344 = vmatprep.subr.bf16.mxu1 %v5825_v2 }
 0x383   :  { %1246 = vmatprep.mubr.f32.mxu0 %v6834_v0  ;;  %1317 = vmatprep.mubr.f32.mxu1 %v6834_v0 }
 0x385   :  { %4314 = vmatpush1.bf16.msra.mxu0 %v5702_v26  ;;  %4346 = vmatpush1.bf16.msra.mxu1 %v5832_v10 }
 0x386   :  { %4316 = vmatprep.subr.bf16.mxu0 %v5705_v35  ;;  %4348 = vmatprep.subr.bf16.mxu1 %v5835_v11 }
 0x389   :  { %4318 = vmatpush1.bf16.msra.mxu0 %v5708_v39  ;;  %4350 = vmatpush1.bf16.msra.mxu1 %v5840_v48 }
 0x38a   :  { %4320 = vmatprep.subr.bf16.mxu0 %v5711_v44  ;;  %4352 = vmatprep.subr.bf16.mxu1 %v5843_v19 }
 0x38d   :  { %4322 = vmatpush1.bf16.msra.mxu0 %v5714_v52  ;;  %4354 = vmatpush1.bf16.msra.mxu1 %v5848_v58 }
 0x38e   :  { %4324 = vmatprep.subr.bf16.mxu0 %v5717_v57  ;;  %4356 = vmatprep.subr.bf16.mxu1 %v5851_v28 }
 0x391   :  { %4326 = vmatpush1.bf16.msra.mxu0 %v5720_v1  ;;  %4358 = vmatpush1.bf16.msra.mxu1 %v5856_v3 }
 0x392   :  { %4328 = vmatprep.subr.bf16.mxu0 %v5723_v6  ;;  %4360 = vmatprep.subr.bf16.mxu1 %v5859_v37 }
 0x395   :  { %4330 = vmatpush1.bf16.msra.mxu0 %v5726_v15  ;;  %4362 = vmatpush1.bf16.msra.mxu1 %v5864_v12 }
 0x396   :  { %4332 = vmatprep.subr.bf16.mxu0 %v5729_v20  ;;  %4364 = vmatprep.subr.bf16.mxu1 %v5867_v46 }
 0x399   :  { %4334 = vmatpush1.bf16.msra.mxu0 %v5732_v29  ;;  %4366 = vmatpush1.bf16.msra.mxu1 %v5872_v23 }
 0x39a   :  { %4336 = vmatprep.subr.bf16.mxu0 %v5735_v34  ;;  %4368 = vmatprep.subr.bf16.mxu1 %v5875_v55 }
 0x39d   :  { %4338 = vmatpush1.bf16.msra.mxu0 %v5738_v41  ;;  %4370 = vmatpush1.bf16.msra.mxu1 %v5880_v61 }
 0x39e   :  { %4372 = vmatprep.subr.bf16.mxu0 %v5694_v9  ;;  %4404 = vmatprep.subr.bf16.mxu1 %v5816_v56 }
 0x453   :  { %v1073_v47 = vpop.f32.mrb[6].mxu0  ;;  %v1144_v8 = vpop.f32.mrb[22].mxu1 }
 0x454   :  { %v1149_v38 = vadd.f32 %v1073_v47, %v5924_v45  ;;  %v1075_v51 = vpop.f32.mrb[7].mxu0  ;;  %v1146_v50 = vpop.f32.mrb[23].mxu1  ;;  %v5209_v62 = vadd.f32 %v1144_v8, %v5948_v18 }
 0x455   :  { %v1150_v59 = vadd.f32 %v1075_v51, %v5926_v49  ;;  %v5210_v32 = vadd.f32 %v1146_v50, %v5952_v5 }
 0x456   :  { %v3874_v16 = vmul.f32 -1.442695, %v1149_v38 }
 0x457   :  { %v3875_v36 = vmul.f32 -1.442695, %v1150_v59  ;;  %v3876_v40 = vmul.f32 -1.442695, %v5210_v32 }
 0x458   :  { %5352 = vpow2.f32 %v3874_v16 }
 0x459   :  { %5354 = vpow2.f32 %v3875_v36 }
 0x45a   :  { %5356 = vpow2.f32 %v3876_v40 }
 0x45b   :  { %5358 = vtanh.f32 %v5209_v62 }
 0x462   :  { %v5353_v24 = vpop.eup %5352 }
 0x463   :  { %v5355_v21 = vpop.eup %5354  ;;  %v1156_v27 = vadd.f32 1.0, %v5353_v24 }
 0x464   :  { %v1162_v42 = vadd.f32 1.0, %v5355_v21  ;;  %v5357_v45 = vpop.eup %5356 }
 0x465   :  { %5360 = vrcp.f32 %v1156_v27  ;;  %v5359_v43 = vpop.eup %5358  ;;  %v1169_v51 = vadd.f32 1.0, %v5357_v45 }
 0x466   :  { %5362 = vrcp.f32 %v1162_v42 }
 0x467   :  { %5364 = vrcp.f32 %v1169_v51 }
 0x46f   :  { %v5361_v49 = vpop.eup %5360 }
 0x470   :  { %v5363_v47 = vpop.eup %5362  ;;  %v1173_v38 = vmul.f32 %v5361_v49, %v5359_v43 }
 0x471   :  { %v1172_v59 = vmul.f32 %v5363_v47, %v6051_v4  ;;  %v5365_v8 = vpop.eup %5364 }
 0x473   :  { %v6097_v50 = vadd.f32 %v1173_v38, %v1172_v59 }
 0x475   :  { %5366 = vtanh.f32 %v6097_v50 }
 0x47f   :  { %v5367_v16 = vpop.eup %5366 }
 0x480   :  { %v6100_v36 = vmul.f32 %v5367_v16, %v5365_v8 }
 0x482   :  { %1247 = vmatmul.mubr.f32.vlgmr.msra.gmra.mrb[8].mxu0 %v6100_v36  ;;  %1318 = vmatmul.mubr.f32.vlgmr.msra.gmra.mrb[24].mxu1 %v6100_v36 }
 0x483   :  { %4374 = vmatpush1.bf16.msra.mxu0 %v5696_v13  ;;  %4406 = vmatpush1.bf16.msra.mxu1 %v5822_v63 }
 0x484   :  { %4376 = vmatprep.subr.bf16.mxu0 %v5700_v22  ;;  %4408 = vmatprep.subr.bf16.mxu1 %v5825_v2 }
 0x485   :  { %1421 = vmatprep.mubr.f32.mxu0 %v6834_v0  ;;  %1492 = vmatprep.mubr.f32.mxu1 %v6834_v0 }
 0x487   :  { %4378 = vmatpush1.bf16.msra.mxu0 %v5702_v26  ;;  %4410 = vmatpush1.bf16.msra.mxu1 %v5832_v10 }
 0x488   :  { %4380 = vmatprep.subr.bf16.mxu0 %v5705_v35  ;;  %4412 = vmatprep.subr.bf16.mxu1 %v5835_v11 }
 0x48b   :  { %4382 = vmatpush1.bf16.msra.mxu0 %v5708_v39  ;;  %4414 = vmatpush1.bf16.msra.mxu1 %v5840_v48 }
 0x48c   :  { %4384 = vmatprep.subr.bf16.mxu0 %v5711_v44  ;;  %4416 = vmatprep.subr.bf16.mxu1 %v5843_v19 }
 0x48f   :  { %4386 = vmatpush1.bf16.msra.mxu0 %v5714_v52  ;;  %4418 = vmatpush1.bf16.msra.mxu1 %v5848_v58 }
 0x490   :  { %4388 = vmatprep.subr.bf16.mxu0 %v5717_v57  ;;  %4420 = vmatprep.subr.bf16.mxu1 %v5851_v28 }
 0x493   :  { %4390 = vmatpush1.bf16.msra.mxu0 %v5720_v1  ;;  %4422 = vmatpush1.bf16.msra.mxu1 %v5856_v3 }
 0x494   :  { %4392 = vmatprep.subr.bf16.mxu0 %v5723_v6  ;;  %4424 = vmatprep.subr.bf16.mxu1 %v5859_v37 }
 0x497   :  { %4394 = vmatpush1.bf16.msra.mxu0 %v5726_v15  ;;  %4426 = vmatpush1.bf16.msra.mxu1 %v5864_v12 }
 0x498   :  { %4396 = vmatprep.subr.bf16.mxu0 %v5729_v20  ;;  %4428 = vmatprep.subr.bf16.mxu1 %v5867_v46 }
 0x49b   :  { %4398 = vmatpush1.bf16.msra.mxu0 %v5732_v29  ;;  %4430 = vmatpush1.bf16.msra.mxu1 %v5872_v23 }
 0x49c   :  { %4400 = vmatprep.subr.bf16.mxu0 %v5735_v34  ;;  %4432 = vmatprep.subr.bf16.mxu1 %v5875_v55 }
 0x49f   :  { %4402 = vmatpush1.bf16.msra.mxu0 %v5738_v41  ;;  %4434 = vmatpush1.bf16.msra.mxu1 %v5880_v61 }
 0x4a0   :  { %4436 = vmatprep.subr.bf16.mxu0 %v5694_v9  ;;  %4468 = vmatprep.subr.bf16.mxu1 %v5816_v56 }
 0x555   :  { %v1248_v4 = vpop.f32.mrb[8].mxu0  ;;  %v1319_v32 = vpop.f32.mrb[24].mxu1 }
 0x556   :  { %v1324_v40 = vadd.f32 %v1248_v4, %v5928_v53  ;;  %v1250_v62 = vpop.f32.mrb[9].mxu0  ;;  %v1321_v24 = vpop.f32.mrb[25].mxu1  ;;  %v5211_v49 = vadd.f32 %v1319_v32, %v5948_v18 }
 0x557   :  { %v1325_v21 = vadd.f32 %v1250_v62, %v5930_v60  ;;  %v5212_v45 = vadd.f32 %v1321_v24, %v5952_v5 }
 0x558   :  { %v3877_v27 = vmul.f32 -1.442695, %v1324_v40 }
 0x559   :  { %v3878_v42 = vmul.f32 -1.442695, %v1325_v21  ;;  %v3879_v43 = vmul.f32 -1.442695, %v5212_v45 }
 0x55a   :  { %5368 = vpow2.f32 %v3877_v27 }
 0x55b   :  { %5370 = vpow2.f32 %v3878_v42 }
 0x55c   :  { %5372 = vpow2.f32 %v3879_v43 }
 0x55d   :  { %5374 = vtanh.f32 %v5211_v49 }
 0x564   :  { %v5369_v47 = vpop.eup %5368 }
 0x565   :  { %v5371_v38 = vpop.eup %5370  ;;  %v1331_v51 = vadd.f32 1.0, %v5369_v47 }
 0x566   :  { %v1337_v59 = vadd.f32 1.0, %v5371_v38  ;;  %v5373_v53 = vpop.eup %5372 }
 0x567   :  { %5376 = vrcp.f32 %v1331_v51  ;;  %v5375_v8 = vpop.eup %5374  ;;  %v1344_v40 = vadd.f32 1.0, %v5373_v53 }
 0x568   :  { %5378 = vrcp.f32 %v1337_v59 }
 0x569   :  { %5380 = vrcp.f32 %v1344_v40 }
 0x571   :  { %v5377_v60 = vpop.eup %5376 }
 0x572   :  { %v5379_v16 = vpop.eup %5378  ;;  %v1348_v4 = vmul.f32 %v5377_v60, %v5375_v8 }
 0x573   :  { %v1347_v62 = vmul.f32 %v5379_v16, %v6097_v50  ;;  %v5381_v32 = vpop.eup %5380 }
 0x575   :  { %v6143_v24 = vadd.f32 %v1348_v4, %v1347_v62 }
 0x577   :  { %5382 = vtanh.f32 %v6143_v24 }
 0x581   :  { %v5383_v21 = vpop.eup %5382 }
 0x582   :  { %v6146_v27 = vmul.f32 %v5383_v21, %v5381_v32 }
 0x584   :  { %1422 = vmatmul.mubr.f32.vlgmr.msra.gmra.mrb[10].mxu0 %v6146_v27  ;;  %1493 = vmatmul.mubr.f32.vlgmr.msra.gmra.mrb[26].mxu1 %v6146_v27 }
 0x585   :  { %4438 = vmatpush1.bf16.msra.mxu0 %v5696_v13  ;;  %4470 = vmatpush1.bf16.msra.mxu1 %v5822_v63 }
 0x586   :  { %4440 = vmatprep.subr.bf16.mxu0 %v5700_v22  ;;  %4472 = vmatprep.subr.bf16.mxu1 %v5825_v2 }
 0x587   :  { %1596 = vmatprep.mubr.f32.mxu0 %v6834_v0  ;;  %1667 = vmatprep.mubr.f32.mxu1 %v6834_v0 }
 0x589   :  { %4442 = vmatpush1.bf16.msra.mxu0 %v5702_v26  ;;  %4474 = vmatpush1.bf16.msra.mxu1 %v5832_v10 }
 0x58a   :  { %4444 = vmatprep.subr.bf16.mxu0 %v5705_v35  ;;  %4476 = vmatprep.subr.bf16.mxu1 %v5835_v11 }
 0x58d   :  { %4446 = vmatpush1.bf16.msra.mxu0 %v5708_v39  ;;  %4478 = vmatpush1.bf16.msra.mxu1 %v5840_v48 }
 0x58e   :  { %4448 = vmatprep.subr.bf16.mxu0 %v5711_v44  ;;  %4480 = vmatprep.subr.bf16.mxu1 %v5843_v19 }
 0x591   :  { %4450 = vmatpush1.bf16.msra.mxu0 %v5714_v52  ;;  %4482 = vmatpush1.bf16.msra.mxu1 %v5848_v58 }
 0x592   :  { %4452 = vmatprep.subr.bf16.mxu0 %v5717_v57  ;;  %4484 = vmatprep.subr.bf16.mxu1 %v5851_v28 }
 0x595   :  { %4454 = vmatpush1.bf16.msra.mxu0 %v5720_v1  ;;  %4486 = vmatpush1.bf16.msra.mxu1 %v5856_v3 }
 0x596   :  { %4456 = vmatprep.subr.bf16.mxu0 %v5723_v6  ;;  %4488 = vmatprep.subr.bf16.mxu1 %v5859_v37 }
 0x599   :  { %4458 = vmatpush1.bf16.msra.mxu0 %v5726_v15  ;;  %4490 = vmatpush1.bf16.msra.mxu1 %v5864_v12 }
 0x59a   :  { %4460 = vmatprep.subr.bf16.mxu0 %v5729_v20  ;;  %4492 = vmatprep.subr.bf16.mxu1 %v5867_v46 }
 0x59d   :  { %4462 = vmatpush1.bf16.msra.mxu0 %v5732_v29  ;;  %4494 = vmatpush1.bf16.msra.mxu1 %v5872_v23 }
 0x59e   :  { %4464 = vmatprep.subr.bf16.mxu0 %v5735_v34  ;;  %4496 = vmatprep.subr.bf16.mxu1 %v5875_v55 }
 0x5a1   :  { %4466 = vmatpush1.bf16.msra.mxu0 %v5738_v41  ;;  %4498 = vmatpush1.bf16.msra.mxu1 %v5880_v61 }
 0x5a2   :  { %4500 = vmatprep.subr.bf16.mxu0 %v5694_v9  ;;  %4532 = vmatprep.subr.bf16.mxu1 %v5816_v56 }
 0x657   :  { %v1423_v50 = vpop.f32.mrb[10].mxu0  ;;  %v1494_v42 = vpop.f32.mrb[26].mxu1 }
 0x658   :  { %v1499_v45 = vadd.f32 %v1423_v50, %v5932_v7  ;;  %v1425_v43 = vpop.f32.mrb[11].mxu0  ;;  %v1496_v49 = vpop.f32.mrb[27].mxu1  ;;  %v5213_v8 = vadd.f32 %v1494_v42, %v5948_v18 }
 0x659   :  { %v1500_v47 = vadd.f32 %v1425_v43, %v5934_v14  ;;  %v5214_v59 = vadd.f32 %v1496_v49, %v5952_v5  ;;  %v1898_v49 = vld [vmem:[#allocation4 + $0x248] sm:$0xff] }
 0x65a   :  { %v3880_v38 = vmul.f32 -1.442695, %v1499_v45 }
 0x65b   :  { %v3881_v51 = vmul.f32 -1.442695, %v1500_v47  ;;  %v3882_v53 = vmul.f32 -1.442695, %v5214_v59  ;;  %v1902_v47 = vld [vmem:[#allocation4 + $0x268] sm:$0xff] }
 0x65c   :  { %5384 = vpow2.f32 %v3880_v38  ;;  %v1900_v38 = vld [vmem:[#allocation4 + $0x258] sm:$0xff] }
 0x65d   :  { %5386 = vpow2.f32 %v3881_v51  ;;  %v1904_v51 = vld [vmem:[#allocation4 + $0x278] sm:$0xff] }
 0x65e   :  { %5388 = vpow2.f32 %v3882_v53 }
 0x65f   :  { %5390 = vtanh.f32 %v5213_v8 }
 0x666   :  { %v5385_v9 = vpop.eup %5384 }
 0x667   :  { %v5387_v60 = vpop.eup %5386  ;;  %v1506_v56 = vadd.f32 1.0, %v5385_v9 }
 0x668   :  { %v1512_v16 = vadd.f32 1.0, %v5387_v60  ;;  %v5389_v7 = vpop.eup %5388  ;;  %v1897_v60 = vld [vmem:[#allocation4 + $0x240] sm:$0xff] }
 0x669   :  { %5392 = vrcp.f32 %v1506_v56  ;;  %v5391_v4 = vpop.eup %5390  ;;  %v1519_v32 = vadd.f32 1.0, %v5389_v7  ;;  %v1901_v56 = vld [vmem:[#allocation4 + $0x260] sm:$0xff]  ;;  %v4567_v7 = vpack.c.bf16 %v1902_v47, %v1898_v49  ;;  %v1932_v49 = vld [vmem:[#allocation4 + $0x358] sm:$0xff] }
 0x66a   :  { %5394 = vrcp.f32 %v1512_v16  ;;  %v1936_v47 = vld [vmem:[#allocation4 + $0x378] sm:$0xff] }
 0x66b   :  { %5396 = vrcp.f32 %v1519_v32  ;;  %v1910_v32 = vld [vmem:[#allocation4 + $0x2a8] sm:$0xff] }
 0x673   :  { %v5393_v14 = vpop.eup %5392 }
 0x674   :  { %v5395_v40 = vpop.eup %5394  ;;  %v1523_v62 = vmul.f32 %v5393_v14, %v5391_v4  ;;  %v4599_v4 = vpack.c.bf16 %v1904_v51, %v1900_v38  ;;  %v1899_v14 = vld [vmem:[#allocation4 + $0x250] sm:$0xff] }
 0x675   :  { %v1522_v21 = vmul.f32 %v5395_v40, %v6143_v24  ;;  %v5397_v42 = vpop.eup %5396  ;;  %v1895_v24 = vld [vmem:[#allocation4 + $0x230] sm:$0xff] }
 0x676   :  { %v1903_v40 = vld [vmem:[#allocation4 + $0x270] sm:$0xff] }
 0x677   :  { %v6189_v50 = vadd.f32 %v1523_v62, %v1522_v21  ;;  %v1906_v62 = vld [vmem:[#allocation4 + $0x288] sm:$0xff]  ;;  %v1908_v21 = vld [vmem:[#allocation4 + $0x298] sm:$0xff] }
 0x679   :  { %5398 = vtanh.f32 %v6189_v50 }
 0x683   :  { %v5399_v45 = vpop.eup %5398 }
 0x684   :  { %v6192_v43 = vmul.f32 %v5399_v45, %v5397_v42  ;;  %v4569_v42 = vpack.c.bf16 %v1901_v56, %v1897_v60  ;;  %v4601_v45 = vpack.c.bf16 %v1903_v40, %v1899_v14  ;;  %v1931_v60 = vld [vmem:[#allocation4 + $0x350] sm:$0xff]  ;;  %v1940_v14 = vld [vmem:[#allocation4 + $0x398] sm:$0xff] }
 0x685   :  { %v1935_v56 = vld [vmem:[#allocation4 + $0x370] sm:$0xff]  ;;  %v1944_v40 = vld [vmem:[#allocation4 + $0x3b8] sm:$0xff] }
 0x686   :  { %1597 = vmatmul.mubr.f32.vlgmr.msra.gmra.mrb[12].mxu0 %v6192_v43  ;;  %1668 = vmatmul.mubr.f32.vlgmr.msra.gmra.mrb[28].mxu1 %v6192_v43 }
 0x687   :  { %4502 = vmatpush1.bf16.msra.mxu0 %v5696_v13  ;;  %4534 = vmatpush1.bf16.msra.mxu1 %v5822_v63  ;;  %v1890_v13 = vld [vmem:[#allocation4 + $0x208] sm:$0xff] }
 0x688   :  { %4504 = vmatprep.subr.bf16.mxu0 %v5700_v22  ;;  %4536 = vmatprep.subr.bf16.mxu1 %v5825_v2  ;;  %v1894_v22 = vld [vmem:[#allocation4 + $0x228] sm:$0xff] }
 0x689   :  { %1771 = vmatprep.mubr.f32.mxu0 %v6834_v0  ;;  %1842 = vmatprep.mubr.f32.mxu1 %v6834_v0 }
 0x68b   :  { %4506 = vmatpush1.bf16.msra.mxu0 %v5702_v26  ;;  %4538 = vmatpush1.bf16.msra.mxu1 %v5832_v10  ;;  %v1892_v26 = vld [vmem:[#allocation4 + $0x218] sm:$0xff] }
 0x68c   :  { %4508 = vmatprep.subr.bf16.mxu0 %v5705_v35  ;;  %4540 = vmatprep.subr.bf16.mxu1 %v5835_v11  ;;  %v4563_v35 = vpack.c.bf16 %v1894_v22, %v1890_v13  ;;  %v1905_v13 = vld [vmem:[#allocation4 + $0x280] sm:$0xff] }
 0x68d   :  { %v1909_v22 = vld [vmem:[#allocation4 + $0x2a0] sm:$0xff] }
 0x68f   :  { %4510 = vmatpush1.bf16.msra.mxu0 %v5708_v39  ;;  %4542 = vmatpush1.bf16.msra.mxu1 %v5840_v48  ;;  %v1896_v39 = vld [vmem:[#allocation4 + $0x238] sm:$0xff] }
 0x690   :  { %4512 = vmatprep.subr.bf16.mxu0 %v5711_v44  ;;  %4544 = vmatprep.subr.bf16.mxu1 %v5843_v19  ;;  %v4595_v44 = vpack.c.bf16 %v1896_v39, %v1892_v26  ;;  %v4571_v26 = vpack.c.bf16 %v1910_v32, %v1906_v62  ;;  %v1907_v39 = vld [vmem:[#allocation4 + $0x290] sm:$0xff]  ;;  %v4617_v32 = vpack.c.bf16 %v1935_v56, %v1931_v60 }
 0x693   :  { %4514 = vmatpush1.bf16.msra.mxu0 %v5714_v52  ;;  %4546 = vmatpush1.bf16.msra.mxu1 %v5848_v58 }
 0x694   :  { %4516 = vmatprep.subr.bf16.mxu0 %v5717_v57  ;;  %4548 = vmatprep.subr.bf16.mxu1 %v5851_v28 }
 0x697   :  { %4518 = vmatpush1.bf16.msra.mxu0 %v5720_v1  ;;  %4550 = vmatpush1.bf16.msra.mxu1 %v5856_v3 }
 0x698   :  { %4520 = vmatprep.subr.bf16.mxu0 %v5723_v6  ;;  %4552 = vmatprep.subr.bf16.mxu1 %v5859_v37 }
 0x69b   :  { %4522 = vmatpush1.bf16.msra.mxu0 %v5726_v15  ;;  %4554 = vmatpush1.bf16.msra.mxu1 %v5864_v12 }
 0x69c   :  { %4524 = vmatprep.subr.bf16.mxu0 %v5729_v20  ;;  %4556 = vmatprep.subr.bf16.mxu1 %v5867_v46 }
 0x69f   :  { %4526 = vmatpush1.bf16.msra.mxu0 %v5732_v29  ;;  %4558 = vmatpush1.bf16.msra.mxu1 %v5872_v23 }
 0x6a0   :  { %4528 = vmatprep.subr.bf16.mxu0 %v5735_v34  ;;  %4560 = vmatprep.subr.bf16.mxu1 %v5875_v55 }
 0x6a3   :  { %4530 = vmatpush1.bf16.msra.mxu0 %v5738_v41  ;;  %4562 = vmatpush1.bf16.msra.mxu1 %v5880_v61  ;;  %v1889_v61 = vld [vmem:[#allocation4 + $0x200] sm:$0xff] }
 0x6a4   :  { %4564 = vmatprep.subr.bf16.mxu0 %v4563_v35  ;;  %4596 = vmatprep.subr.bf16.mxu1 %v4595_v44  ;;  %v1911_v44 = vld [vmem:[#allocation4 + $0x2b0] sm:$0xff] }
 0x759   :  { %v1598_v52 = vpop.f32.mrb[12].mxu0  ;;  %v1669_v57 = vpop.f32.mrb[28].mxu1 }
 0x75a   :  { %v1674_v1 = vadd.f32 %v1598_v52, %v5936_v17  ;;  %v1600_v6 = vpop.f32.mrb[13].mxu0  ;;  %v1671_v15 = vpop.f32.mrb[29].mxu1  ;;  %v5215_v2 = vadd.f32 %v1669_v57, %v5948_v18  ;;  %v1893_v17 = vld [vmem:[#allocation4 + $0x220] sm:$0xff]  ;;  %v1914_v52 = vld [vmem:[#allocation4 + $0x2c8] sm:$0xff] }
 0x75b   :  { %v1675_v20 = vadd.f32 %v1600_v6, %v5938_v25  ;;  %v5216_v41 = vadd.f32 %v1671_v15, %v5952_v5  ;;  %v1891_v25 = vld [vmem:[#allocation4 + $0x210] sm:$0xff]  ;;  %v4565_v8 = vpack.c.bf16 %v1893_v17, %v1889_v61  ;;  %v1918_v57 = vld [vmem:[#allocation4 + $0x2e8] sm:$0xff]  ;;  %v1920_v6 = vld [vmem:[#allocation4 + $0x2f8] sm:$0xff]  ;;  %v4573_v15 = vpack.c.bf16 %v1909_v22, %v1905_v13 }
 0x75c   :  { %v3883_v29 = vmul.f32 -1.442695, %v1674_v1  ;;  %v4597_v9 = vpack.c.bf16 %v1895_v24, %v1891_v25  ;;  %v1916_v1 = vld [vmem:[#allocation4 + $0x2d8] sm:$0xff]  ;;  %v1923_v61 = vld [vmem:[#allocation4 + $0x310] sm:$0xff]  ;;  %v1930_v25 = vld [vmem:[#allocation4 + $0x348] sm:$0xff] }
 0x75d   :  { %v3884_v34 = vmul.f32 -1.442695, %v1675_v20  ;;  %v3885_v63 = vmul.f32 -1.442695, %v5216_v41  ;;  %v4605_v20 = vpack.c.bf16 %v1911_v44, %v1907_v39  ;;  %v4575_v41 = vpack.c.bf16 %v1918_v57, %v1914_v52  ;;  %v1927_v17 = vld [vmem:[#allocation4 + $0x330] sm:$0xff]  ;;  %v1934_v24 = vld [vmem:[#allocation4 + $0x368] sm:$0xff] }
 0x75e   :  { %5400 = vpow2.f32 %v3883_v29  ;;  %v1913_v29 = vld [vmem:[#allocation4 + $0x2c0] sm:$0xff]  ;;  %v4613_v51 = vpack.c.bf16 %v1927_v17, %v1923_v61  ;;  %v1939_v13 = vld [vmem:[#allocation4 + $0x390] sm:$0xff]  ;;  %v1948_v39 = vld [vmem:[#allocation4 + $0x3d8] sm:$0xff] }
 0x75f   :  { %5402 = vpow2.f32 %v3884_v34  ;;  %v1917_v34 = vld [vmem:[#allocation4 + $0x2e0] sm:$0xff]  ;;  %v1943_v22 = vld [vmem:[#allocation4 + $0x3b0] sm:$0xff]  ;;  %v1952_v44 = vld [vmem:[#allocation4 + $0x3f8] sm:$0xff] }
 0x760   :  { %5404 = vpow2.f32 %v3885_v63  ;;  %v4607_v63 = vpack.c.bf16 %v1920_v6, %v1916_v1  ;;  %v4621_v57 = vpack.c.bf16 %v1943_v22, %v1939_v13  ;;  %v1945_v1 = vld [vmem:[#allocation4 + $0x3c0] sm:$0xff] }
 0x761   :  { %5406 = vtanh.f32 %v5215_v2  ;;  %v1915_v2 = vld [vmem:[#allocation4 + $0x2d0] sm:$0xff] }
 0x768   :  { %v5401_v10 = vpop.eup %5400 }
 0x769   :  { %v5403_v11 = vpop.eup %5402  ;;  %v1681_v48 = vadd.f32 1.0, %v5401_v10  ;;  %v1919_v10 = vld [vmem:[#allocation4 + $0x2f0] sm:$0xff] }
 0x76a   :  { %v1687_v19 = vadd.f32 1.0, %v5403_v11  ;;  %v5405_v58 = vpop.eup %5404  ;;  %v1922_v11 = vld [vmem:[#allocation4 + $0x308] sm:$0xff] }
 0x76b   :  { %5408 = vrcp.f32 %v1681_v48  ;;  %v5407_v28 = vpop.eup %5406  ;;  %v1694_v46 = vadd.f32 1.0, %v5405_v58  ;;  %v1926_v48 = vld [vmem:[#allocation4 + $0x328] sm:$0xff]  ;;  %v1928_v58 = vld [vmem:[#allocation4 + $0x338] sm:$0xff] }
 0x76c   :  { %5410 = vrcp.f32 %v1687_v19  ;;  %v1924_v19 = vld [vmem:[#allocation4 + $0x318] sm:$0xff] }
 0x76d   :  { %5412 = vrcp.f32 %v1694_v46  ;;  %v4579_v46 = vpack.c.bf16 %v1926_v48, %v1922_v11  ;;  %v2241_v48 = vld [vmem:[#allocation6 + $0x210] sm:$0xff] }
 0x775   :  { %v5409_v3 = vpop.eup %5408 }
 0x776   :  { %v5411_v37 = vpop.eup %5410  ;;  %v1698_v12 = vmul.f32 %v5409_v3, %v5407_v28  ;;  %v4577_v28 = vpack.c.bf16 %v1917_v34, %v1913_v29  ;;  %v4609_v3 = vpack.c.bf16 %v1919_v10, %v1915_v2  ;;  %v1947_v29 = vld [vmem:[#allocation4 + $0x3d0] sm:$0xff]  ;;  %v2239_v2 = vld [vmem:[#allocation6 + $0x200] sm:$0xff] }
 0x777   :  { %v1697_v23 = vmul.f32 %v5411_v37, %v6189_v50  ;;  %v5413_v59 = vpop.eup %5412  ;;  %v1912_v50 = vld [vmem:[#allocation4 + $0x2b8] sm:$0xff]  ;;  %v1921_v37 = vld [vmem:[#allocation4 + $0x300] sm:$0xff]  ;;  %v1951_v34 = vld [vmem:[#allocation4 + $0x3f0] sm:$0xff] }
 0x778   :  { %v4603_v35 = vpack.c.bf16 %v1912_v50, %v1908_v21  ;;  %v1937_v21 = vld [vmem:[#allocation4 + $0x380] sm:$0xff] }
 0x779   :  { %v6233_v55 = vadd.f32 %v1698_v12, %v1697_v23  ;;  %v1925_v12 = vld [vmem:[#allocation4 + $0x320] sm:$0xff]  ;;  %v4611_v23 = vpack.c.bf16 %v1928_v58, %v1924_v19  ;;  %v2245_v19 = vld [vmem:[#allocation6 + $0x230] sm:$0xff]  ;;  %v2248_v58 = vld [vmem:[#allocation6 + $0x248] sm:$0xff] }
 0x77a   :  { %v4581_v38 = vpack.c.bf16 %v1925_v12, %v1921_v37  ;;  %v1941_v50 = vld [vmem:[#allocation4 + $0x3a0] sm:$0xff]  ;;  %v2254_v12 = vld [vmem:[#allocation6 + $0x278] sm:$0xff] }
 0x77b   :  { %5414 = vtanh.f32 %v6233_v55  ;;  %v4589_v52 = vpack.c.bf16 %v1941_v50, %v1937_v21  ;;  %v2270_v50 = vld [vmem:[#allocation6 + $0x2f8] sm:$0xff] }
 0x785   :  { %v5415_v53 = vpop.eup %5414 }
 0x786   :  { %v6236_v16 = vmul.f32 %v5415_v53, %v5413_v59  ;;  %v1929_v59 = vld [vmem:[#allocation4 + $0x340] sm:$0xff] }
 0x787   :  { %v1933_v53 = vld [vmem:[#allocation4 + $0x360] sm:$0xff] }
 0x788   :  { %1772 = vmatmul.mubr.f32.vlgmr.msra.gmra.mrb[14].mxu0 %v6236_v16  ;;  %1843 = vmatmul.mubr.f32.vlgmr.msra.gmra.mrb[30].mxu1 %v6236_v16  ;;  %v4585_v62 = vpack.c.bf16 %v1933_v53, %v1929_v59  ;;  %v2262_v53 = vld [vmem:[#allocation6 + $0x2b8] sm:$0xff] }
 0x789   :  { %4566 = vmatpush1.bf16.msra.mxu0 %v4565_v8  ;;  %4598 = vmatpush1.bf16.msra.mxu1 %v4597_v9  ;;  %v4583_v8 = vpack.c.bf16 %v1934_v24, %v1930_v25  ;;  %v4615_v9 = vpack.c.bf16 %v1936_v47, %v1932_v49  ;;  %v2249_v25 = vld [vmem:[#allocation6 + $0x250] sm:$0xff]  ;;  %v2256_v47 = vld [vmem:[#allocation6 + $0x288] sm:$0xff] }
 0x78a   :  { %4568 = vmatprep.subr.bf16.mxu0 %v4567_v7  ;;  %4600 = vmatprep.subr.bf16.mxu1 %v4599_v4  ;;  %v1938_v7 = vld [vmem:[#allocation4 + $0x388] sm:$0xff]  ;;  %v2253_v24 = vld [vmem:[#allocation6 + $0x270] sm:$0xff] }
 0x78b   :  { %2040 = vmatprep.mubr.f32.mxu0 %v6834_v0  ;;  %2153 = vmatprep.mubr.f32.mxu1 %v6834_v0  ;;  %v1942_v4 = vld [vmem:[#allocation4 + $0x3a8] sm:$0xff]  ;;  %v6289_v49 = vpack.c.bf16 %v2253_v24, %v2249_v25  ;;  %v2290_v25 = vld [vmem:[#allocation6 + $0x398] sm:$0xff] }
 0x78d   :  { %4570 = vmatpush1.bf16.msra.mxu0 %v4569_v42  ;;  %4602 = vmatpush1.bf16.msra.mxu1 %v4601_v45  ;;  %v4587_v42 = vpack.c.bf16 %v1942_v4, %v1938_v7  ;;  %v4619_v45 = vpack.c.bf16 %v1944_v40, %v1940_v14  ;;  %v2257_v7 = vld [vmem:[#allocation6 + $0x290] sm:$0xff]  ;;  %v2264_v40 = vld [vmem:[#allocation6 + $0x2c8] sm:$0xff] }
 0x78e   :  { %4572 = vmatprep.subr.bf16.mxu0 %v4571_v26  ;;  %4604 = vmatprep.subr.bf16.mxu1 %v4603_v35  ;;  %v1946_v26 = vld [vmem:[#allocation4 + $0x3c8] sm:$0xff]  ;;  %v2261_v4 = vld [vmem:[#allocation6 + $0x2b0] sm:$0xff] }
 0x78f   :  { %v1950_v35 = vld [vmem:[#allocation4 + $0x3e8] sm:$0xff]  ;;  %v6301_v14 = vpack.c.bf16 %v2261_v4, %v2257_v7  ;;  %v2293_v7 = vld [vmem:[#allocation6 + $0x3b0] sm:$0xff] }
 0x790   :  { %v4591_v6 = vpack.c.bf16 %v1950_v35, %v1946_v26  ;;  %v2265_v26 = vld [vmem:[#allocation6 + $0x2d0] sm:$0xff] }
 0x791   :  { %4574 = vmatpush1.bf16.msra.mxu0 %v4573_v15  ;;  %4606 = vmatpush1.bf16.msra.mxu1 %v4605_v20  ;;  %v4623_v15 = vpack.c.bf16 %v1952_v44, %v1948_v39  ;;  %v1949_v20 = vld [vmem:[#allocation4 + $0x3e0] sm:$0xff]  ;;  %v2269_v35 = vld [vmem:[#allocation6 + $0x2f0] sm:$0xff]  ;;  %v2272_v39 = vld [vmem:[#allocation6 + $0x308] sm:$0xff] }
 0x792   :  { %4576 = vmatprep.subr.bf16.mxu0 %v4575_v41  ;;  %4608 = vmatprep.subr.bf16.mxu1 %v4607_v63  ;;  %v4593_v41 = vpack.c.bf16 %v1949_v20, %v1945_v1  ;;  %v4625_v63 = vpack.c.bf16 %v1951_v34, %v1947_v29  ;;  %v6313_v44 = vpack.c.bf16 %v2269_v35, %v2265_v26  ;;  %v2278_v1 = vld [vmem:[#allocation6 + $0x338] sm:$0xff]  ;;  %v2271_v20 = vld [vmem:[#allocation6 + $0x300] sm:$0xff]  ;;  %v2273_v34 = vld [vmem:[#allocation6 + $0x310] sm:$0xff] }
 0x793   :  { %v2275_v29 = vld [vmem:[#allocation6 + $0x320] sm:$0xff] }
 0x794   :  { %v2295_v26 = vld [vmem:[#allocation6 + $0x3c0] sm:$0xff] }
 0x795   :  { %4578 = vmatpush1.bf16.msra.mxu0 %v4577_v28  ;;  %4610 = vmatpush1.bf16.msra.mxu1 %v4609_v3  ;;  %v2252_v28 = vld [vmem:[#allocation6 + $0x268] sm:$0xff]  ;;  %v2250_v3 = vld [vmem:[#allocation6 + $0x258] sm:$0xff]  ;;  %v2299_v35 = vld [vmem:[#allocation6 + $0x3e0] sm:$0xff] }
 0x796   :  { %4580 = vmatprep.subr.bf16.mxu0 %v4579_v46  ;;  %4612 = vmatprep.subr.bf16.mxu1 %v4611_v23  ;;  %v6282_v37 = vpack.c.bf16 %v2252_v28, %v2248_v58  ;;  %v2247_v46 = vld [vmem:[#allocation6 + $0x240] sm:$0xff]  ;;  %v6284_v61 = vpack.c.bf16 %v2254_v12, %v2250_v3  ;;  %v2281_v28 = vld [vmem:[#allocation6 + $0x350] sm:$0xff] }
 0x797   :  { %v2251_v23 = vld [vmem:[#allocation6 + $0x260] sm:$0xff]  ;;  %v2285_v3 = vld [vmem:[#allocation6 + $0x370] sm:$0xff] }
 0x798   :  { %v6286_v17 = vpack.c.bf16 %v2251_v23, %v2247_v46  ;;  %v2283_v58 = vld [vmem:[#allocation6 + $0x360] sm:$0xff]  ;;  %v2288_v46 = vld [vmem:[#allocation6 + $0x388] sm:$0xff]  ;;  %v6337_v24 = vpack.c.bf16 %v2285_v3, %v2281_v28 }
 0x799   :  { %4582 = vmatpush1.bf16.msra.mxu0 %v4581_v38  ;;  %4614 = vmatpush1.bf16.msra.mxu1 %v4613_v51  ;;  %v2260_v38 = vld [vmem:[#allocation6 + $0x2a8] sm:$0xff]  ;;  %v2258_v51 = vld [vmem:[#allocation6 + $0x298] sm:$0xff] }
 0x79a   :  { %4584 = vmatprep.subr.bf16.mxu0 %v4583_v8  ;;  %4616 = vmatprep.subr.bf16.mxu1 %v4615_v9  ;;  %v6294_v59 = vpack.c.bf16 %v2260_v38, %v2256_v47  ;;  %v2255_v8 = vld [vmem:[#allocation6 + $0x280] sm:$0xff]  ;;  %v6296_v60 = vpack.c.bf16 %v2262_v53, %v2258_v51  ;;  %v2292_v23 = vld [vmem:[#allocation6 + $0x3a8] sm:$0xff]  ;;  %v2294_v38 = vld [vmem:[#allocation6 + $0x3b8] sm:$0xff] }
 0x79b   :  { %v2259_v9 = vld [vmem:[#allocation6 + $0x2a0] sm:$0xff]  ;;  %v6339_v47 = vpack.c.bf16 %v2292_v23, %v2288_v46 }
 0x79c   :  { %v6298_v56 = vpack.c.bf16 %v2259_v9, %v2255_v8  ;;  %v2287_v51 = vld [vmem:[#allocation6 + $0x380] sm:$0xff]  ;;  %v6342_v8 = vpack.c.bf16 %v2294_v38, %v2290_v25  ;;  %v2289_v9 = vld [vmem:[#allocation6 + $0x390] sm:$0xff] }
 0x79d   :  { %4586 = vmatpush1.bf16.msra.mxu0 %v4585_v62  ;;  %4618 = vmatpush1.bf16.msra.mxu1 %v4617_v32  ;;  %v2268_v62 = vld [vmem:[#allocation6 + $0x2e8] sm:$0xff]  ;;  %v2266_v32 = vld [vmem:[#allocation6 + $0x2d8] sm:$0xff]  ;;  %v2291_v53 = vld [vmem:[#allocation6 + $0x3a0] sm:$0xff] }
 0x79e   :  { %4588 = vmatprep.subr.bf16.mxu0 %v4587_v42  ;;  %4620 = vmatprep.subr.bf16.mxu1 %v4619_v45  ;;  %v6306_v21 = vpack.c.bf16 %v2268_v62, %v2264_v40  ;;  %v2263_v42 = vld [vmem:[#allocation6 + $0x2c0] sm:$0xff]  ;;  %v6308_v13 = vpack.c.bf16 %v2270_v50, %v2266_v32  ;;  %v6345_v4 = vpack.c.bf16 %v2291_v53, %v2287_v51  ;;  %v2296_v62 = vld [vmem:[#allocation6 + $0x3c8] sm:$0xff]  ;;  %v2298_v50 = vld [vmem:[#allocation6 + $0x3d8] sm:$0xff] }
 0x79f   :  { %v2267_v45 = vld [vmem:[#allocation6 + $0x2e0] sm:$0xff]  ;;  %v6349_v40 = vpack.c.bf16 %v2293_v7, %v2289_v9  ;;  %v2300_v32 = vld [vmem:[#allocation6 + $0x3e8] sm:$0xff] }
 0x7a0   :  { %v6310_v22 = vpack.c.bf16 %v2267_v45, %v2263_v42  ;;  %v6354_v42 = vpack.c.bf16 %v2300_v32, %v2296_v62  ;;  %v2302_v45 = vld [vmem:[#allocation6 + $0x3f8] sm:$0xff] }
 0x7a1   :  { %4590 = vmatpush1.bf16.msra.mxu0 %v4589_v52  ;;  %4622 = vmatpush1.bf16.msra.mxu1 %v4621_v57  ;;  %v2276_v52 = vld [vmem:[#allocation6 + $0x328] sm:$0xff]  ;;  %v2274_v57 = vld [vmem:[#allocation6 + $0x318] sm:$0xff] }
 0x7a2   :  { %4592 = vmatprep.subr.bf16.mxu0 %v4591_v6  ;;  %4624 = vmatprep.subr.bf16.mxu1 %v4623_v15  ;;  %v6317_v6 = vpack.c.bf16 %v2276_v52, %v2272_v39  ;;  %v6319_v15 = vpack.c.bf16 %v2278_v1, %v2274_v57  ;;  %v6356_v39 = vpack.c.bf16 %v2302_v45, %v2298_v50  ;;  %v2297_v57 = vld [vmem:[#allocation6 + $0x3d0] sm:$0xff] }
 0x7a3   :  { %v6358_v52 = vpack.c.bf16 %v2299_v35, %v2295_v26  ;;  %v2301_v1 = vld [vmem:[#allocation6 + $0x3f0] sm:$0xff]  ;;  %v3889_v35 = vld [vmem:[%s6818_s5 + $0x4] sm:$0xf] }
 0x7a5   :  { %4594 = vmatpush1.bf16.msra.mxu0 %v4593_v41  ;;  %4626 = vmatpush1.bf16.msra.mxu1 %v4625_v63  ;;  %v6322_v41 = vpack.c.bf16 %v2275_v29, %v2271_v20  ;;  %v2277_v63 = vld [vmem:[#allocation6 + $0x330] sm:$0xff]  ;;  %v6361_v20 = vpack.c.bf16 %v2301_v1, %v2297_v57  ;;  %v6836_v57 = vld [vmem:[#allocation10_spill] sm:$0xff] }
 0x7a6   :  { %v6837_v1 = vsub.s32 0, %v6836_v57 }
 0x7a8   :  { %2041 = vmatmul.mubr.f32.vlgmr.msra.gmra.mrb[16].mxu0 %v5962_v30  ;;  %2154 = vmatmul.mubr.f32.vlgmr.msra.gmra.mrb[32].mxu1 %v5962_v30  ;;  %v2240_v30 = vld [vmem:[#allocation6 + $0x208] sm:$0xff] }
 0x7a9   :  { %2046 = vmatprep.mubr.f32.mxu0 %v6834_v0  ;;  %2159 = vmatprep.mubr.f32.mxu1 %v6834_v0 }
 0x7ac   :  { %2047 = vmatmul.mubr.f32.gmra.mrb[18].mxu0 %v6008_v54  ;;  %2160 = vmatmul.mubr.f32.gmra.mrb[34].mxu1 %v6008_v54  ;;  %v2244_v54 = vld [vmem:[#allocation6 + $0x228] sm:$0xff] }
 0x7ad   :  { %2052 = vmatprep.mubr.f32.mxu0 %v6834_v0  ;;  %2165 = vmatprep.mubr.f32.mxu1 %v6834_v0 }
 0x7b0   :  { %2053 = vmatmul.mubr.f32.gmra.mrb[20].mxu0 %v6054_v31  ;;  %2166 = vmatmul.mubr.f32.gmra.mrb[36].mxu1 %v6054_v31  ;;  %v2242_v31 = vld [vmem:[#allocation6 + $0x218] sm:$0xff] }
 0x7b1   :  { %2058 = vmatprep.mubr.f32.mxu0 %v6834_v0  ;;  %2171 = vmatprep.mubr.f32.mxu1 %v6834_v0 }
 0x7b4   :  { %2059 = vmatmul.mubr.f32.gmra.mrb[22].mxu0 %v6100_v36  ;;  %2172 = vmatmul.mubr.f32.gmra.mrb[38].mxu1 %v6100_v36  ;;  %v6270_v36 = vpack.c.bf16 %v2244_v54, %v2240_v30  ;;  %v2280_v30 = vld [vmem:[#allocation6 + $0x348] sm:$0xff] }
 0x7b5   :  { %2064 = vmatprep.mubr.f32.mxu0 %v6834_v0  ;;  %2177 = vmatprep.mubr.f32.mxu1 %v6834_v0  ;;  %v2284_v54 = vld [vmem:[#allocation6 + $0x368] sm:$0xff] }
 0x7b6   :  { %4628 = vmatprep.subr.bf16.mxu0 %v6270_v36 }
 0x7b8   :  { %2065 = vmatmul.mubr.f32.gmra.mrb[24].mxu0 %v6146_v27  ;;  %2178 = vmatmul.mubr.f32.gmra.mrb[40].mxu1 %v6146_v27  ;;  %v2246_v27 = vld [vmem:[#allocation6 + $0x238] sm:$0xff] }
 0x7b9   :  { %2070 = vmatprep.mubr.f32.mxu0 %v6834_v0  ;;  %2183 = vmatprep.mubr.f32.mxu1 %v6834_v0  ;;  %v6272_v10 = vpack.c.bf16 %v2246_v27, %v2242_v31  ;;  %v6326_v31 = vpack.c.bf16 %v2277_v63, %v2273_v34  ;;  %v6328_v27 = vpack.c.bf16 %v2284_v54, %v2280_v30 }
 0x7bb   :  { %4660 = vmatprep.subr.bf16.mxu1 %v6272_v10 }
 0x7bc   :  { %2071 = vmatmul.mubr.f32.gmra.mrb[26].mxu0 %v6192_v43  ;;  %2184 = vmatmul.mubr.f32.gmra.mrb[42].mxu1 %v6192_v43  ;;  %v2243_v43 = vld [vmem:[#allocation6 + $0x220] sm:$0xff] }
 0x7bd   :  { %2076 = vmatprep.mubr.f32.mxu0 %v6834_v0  ;;  %2189 = vmatprep.mubr.f32.mxu1 %v6834_v0  ;;  %v6274_v11 = vpack.c.bf16 %v2243_v43, %v2239_v2  ;;  %v2282_v2 = vld [vmem:[#allocation6 + $0x358] sm:$0xff] }
 0x7be   :  { %v2286_v43 = vld [vmem:[#allocation6 + $0x378] sm:$0xff] }
 0x7bf   :  { %4630 = vmatpush1.bf16.msra.mxu0 %v6274_v11 }
 0x7c0   :  { %2077 = vmatmul.mubr.f32.gmra.mrb[28].mxu0 %v6236_v16  ;;  %2190 = vmatmul.mubr.f32.gmra.mrb[44].mxu1 %v6236_v16  ;;  %v6277_v16 = vpack.c.bf16 %v2245_v19, %v2241_v48  ;;  %v2279_v48 = vld [vmem:[#allocation6 + $0x340] sm:$0xff]  ;;  %v6330_v19 = vpack.c.bf16 %v2286_v43, %v2282_v2  ;;  %v6835_v2 = vld [vmem:[#allocation11_spill] sm:$0xff] }
 0x7c1   :  { %2082 = vmatprep.mubr.f32.mxu0 %v6834_v0  ;;  %2195 = vmatprep.mubr.f32.mxu1 %v6834_v0  ;;  %v6333_v12 = vpack.c.bf16 %v2283_v58, %v2279_v48 }
 0x7c2   :  { %4662 = vmatpush1.bf16.msra.mxu1 %v6277_v16  ;;  %4632 = vmatprep.subr.bf16.mxu0 %v6282_v37 }
 0x7c3   :  { %4664 = vmatprep.subr.bf16.mxu1 %v6284_v61  ;;  %4634 = vmatpush1.bf16.msra.mxu0 %v6286_v17 }
 0x7c4   :  { %4636 = vmatprep.subr.bf16.mxu0 %v6294_v59 }
 0x7c6   :  { %4666 = vmatpush1.bf16.msra.mxu1 %v6289_v49 }
 0x7c7   :  { %4668 = vmatprep.subr.bf16.mxu1 %v6296_v60  ;;  %4638 = vmatpush1.bf16.msra.mxu0 %v6298_v56 }
 0x7c8   :  { %4640 = vmatprep.subr.bf16.mxu0 %v6306_v21 }
 0x7ca   :  { %4670 = vmatpush1.bf16.msra.mxu1 %v6301_v14 }
 0x7cb   :  { %4672 = vmatprep.subr.bf16.mxu1 %v6308_v13  ;;  %4642 = vmatpush1.bf16.msra.mxu0 %v6310_v22 }
 0x7cc   :  { %4644 = vmatprep.subr.bf16.mxu0 %v6317_v6 }
 0x7ce   :  { %4674 = vmatpush1.bf16.msra.mxu1 %v6313_v44 }
 0x7cf   :  { %4676 = vmatprep.subr.bf16.mxu1 %v6319_v15  ;;  %4646 = vmatpush1.bf16.msra.mxu0 %v6322_v41 }
 0x7d0   :  { %4648 = vmatprep.subr.bf16.mxu0 %v6328_v27 }
 0x7d2   :  { %4678 = vmatpush1.bf16.msra.mxu1 %v6326_v31 }
 0x7d3   :  { %4680 = vmatprep.subr.bf16.mxu1 %v6330_v19  ;;  %4650 = vmatpush1.bf16.msra.mxu0 %v6333_v12 }
 0x7d4   :  { %4652 = vmatprep.subr.bf16.mxu0 %v6339_v47 }
 0x7d6   :  { %4682 = vmatpush1.bf16.msra.mxu1 %v6337_v24 }
 0x7d7   :  { %4684 = vmatprep.subr.bf16.mxu1 %v6342_v8  ;;  %4654 = vmatpush1.bf16.msra.mxu0 %v6345_v4 }
 0x7d8   :  { %4656 = vmatprep.subr.bf16.mxu0 %v6354_v42 }
 0x7da   :  { %4686 = vmatpush1.bf16.msra.mxu1 %v6349_v40 }
 0x7db   :  { %4688 = vmatprep.subr.bf16.mxu1 %v6356_v39  ;;  %4658 = vmatpush1.bf16.msra.mxu0 %v6358_v52 }
 0x7dc   :  { %4692 = vmatprep.subr.bf16.mxu0 %v6270_v36 }
 0x7de   :  { %4690 = vmatpush1.bf16.msra.mxu1 %v6361_v20 }
 0x7df   :  { %4724 = vmatprep.subr.bf16.mxu1 %v6272_v10 }
 0x85b   :  { %v1773_v29 = vpop.f32.mrb[14].mxu0  ;;  %v1844_v34 = vpop.f32.mrb[30].mxu1 }
 0x85c   :  { %v1849_v63 = vadd.f32 %v1773_v29, %v5940_v33  ;;  %v1775_v30 = vpop.f32.mrb[15].mxu0  ;;  %v1846_v54 = vpop.f32.mrb[31].mxu1  ;;  %v5217_v46 = vadd.f32 %v1844_v34, %v5948_v18  ;;  %v6423_v29 = vrot.slane %v3889_v35, %v6837_v1  ;;  %v6838_v34 = vsub.s32 1, %v6836_v57 }
 0x85d   :  { %v1850_v43 = vadd.f32 %v1775_v30, %v6835_v2  ;;  %v5218_v28 = vadd.f32 %v1846_v54, %v5952_v5 }
 0x85e   :  { %v3886_v48 = vmul.f32 -1.442695, %v1849_v63  ;;  %v6427_v63 = vrot.slane %v3889_v35, %v6838_v34 }
 0x85f   :  { %v3887_v58 = vmul.f32 -1.442695, %v1850_v43  ;;  %v3888_v3 = vmul.f32 -1.442695, %v5218_v28 }
 0x860   :  { %5416 = vpow2.f32 %v3886_v48 }
 0x861   :  { %5418 = vpow2.f32 %v3887_v58 }
 0x862   :  { %5420 = vpow2.f32 %v3888_v3 }
 0x863   :  { %5422 = vtanh.f32 %v5217_v46  ;;  %v6839_v46 = vsub.s32 3, %v6836_v57 }
 0x86a   :  { %v5417_v23 = vpop.eup %5416 }
 0x86b   :  { %v5419_v25 = vpop.eup %5418  ;;  %v1856_v38 = vadd.f32 1.0, %v5417_v23  ;;  %v6433_v23 = vrot.slane %v3889_v35, %v6839_v46 }
 0x86c   :  { %v1862_v51 = vadd.f32 1.0, %v5419_v25  ;;  %v5421_v33 = vpop.eup %5420 }
 0x86d   :  { %5424 = vrcp.f32 %v1856_v38  ;;  %v5423_v53 = vpop.eup %5422  ;;  %v1869_v32 = vadd.f32 1.0, %v5421_v33  ;;  %v6840_v38 = vsub.s32 2, %v6836_v57 }
 0x86e   :  { %5426 = vrcp.f32 %v1862_v51 }
 0x86f   :  { %5428 = vrcp.f32 %v1869_v32  ;;  %v6438_v51 = vrot.slane %v3889_v35, %v6840_v38 }
 0x877   :  { %v5425_v9 = vpop.eup %5424 }
 0x878   :  { %v5427_v7 = vpop.eup %5426  ;;  %v1873_v62 = vmul.f32 %v5425_v9, %v5423_v53 }
 0x879   :  { %v1872_v50 = vmul.f32 %v5427_v7, %v6233_v55  ;;  %v5429_v18 = vpop.eup %5428  ;;  %v3890_v55 = vld [vmem:[%s6814_s1 + $0x8] sm:$0xff] }
 0x87b   :  { %v1874_v5 = vadd.f32 %v1873_v62, %v1872_v50 }
 0x87d   :  { %5430 = vtanh.f32 %v1874_v5  ;;  %1879 = vst [vmem:[%s6823_s10] sm:$0xff] %v1874_v5 }
 0x887   :  { %v5431_v45 = vpop.eup %5430 }
 0x888   :  { %v1876_v26 = vmul.f32 %v5431_v45, %v5429_v18  ;;  %v3891_v18 = vld [vmem:[%s6815_s2 + $0x8] sm:$0xff] }
 0x88a   :  { %1878 = vst [vmem:[%s6822_s9] sm:$0xff] %v1876_v26  ;;  %2083 = vmatmul.mubr.f32.gmra.mrb[30].mxu0 %v1876_v26  ;;  %2196 = vmatmul.mubr.f32.gmra.mrb[46].mxu1 %v1876_v26 }
 0x88b   :  { %2371 = vmatprep.mubr.f32.mxu0 %v6834_v0  ;;  %2442 = vmatprep.mubr.f32.mxu1 %v6834_v0 }
 0x88e   :  { %2372 = vmatmul.mubr.f32.vlgmr.msra.gmra.mrb[16].mxu0 %v3890_v55  ;;  %2443 = vmatmul.mubr.f32.vlgmr.msra.gmra.mrb[32].mxu1 %v3890_v55 }
 0x88f   :  { %4694 = vmatpush1.bf16.msra.mxu0 %v6274_v11  ;;  %4726 = vmatpush1.bf16.msra.mxu1 %v6277_v16 }
 0x890   :  { %4696 = vmatprep.subr.bf16.mxu0 %v6282_v37  ;;  %4728 = vmatprep.subr.bf16.mxu1 %v6284_v61 }
 0x891   :  { %2546 = vmatprep.mubr.f32.mxu0 %v6834_v0  ;;  %2617 = vmatprep.mubr.f32.mxu1 %v6834_v0 }
 0x893   :  { %4698 = vmatpush1.bf16.msra.mxu0 %v6286_v17  ;;  %4730 = vmatpush1.bf16.msra.mxu1 %v6289_v49 }
 0x894   :  { %4700 = vmatprep.subr.bf16.mxu0 %v6294_v59  ;;  %4732 = vmatprep.subr.bf16.mxu1 %v6296_v60 }
 0x897   :  { %4702 = vmatpush1.bf16.msra.mxu0 %v6298_v56  ;;  %4734 = vmatpush1.bf16.msra.mxu1 %v6301_v14 }
 0x898   :  { %4704 = vmatprep.subr.bf16.mxu0 %v6306_v21  ;;  %4736 = vmatprep.subr.bf16.mxu1 %v6308_v13 }
 0x89b   :  { %4706 = vmatpush1.bf16.msra.mxu0 %v6310_v22  ;;  %4738 = vmatpush1.bf16.msra.mxu1 %v6313_v44 }
 0x89c   :  { %4708 = vmatprep.subr.bf16.mxu0 %v6317_v6  ;;  %4740 = vmatprep.subr.bf16.mxu1 %v6319_v15 }
 0x89f   :  { %4710 = vmatpush1.bf16.msra.mxu0 %v6322_v41  ;;  %4742 = vmatpush1.bf16.msra.mxu1 %v6326_v31 }
 0x8a0   :  { %4712 = vmatprep.subr.bf16.mxu0 %v6328_v27  ;;  %4744 = vmatprep.subr.bf16.mxu1 %v6330_v19 }
 0x8a3   :  { %4714 = vmatpush1.bf16.msra.mxu0 %v6333_v12  ;;  %4746 = vmatpush1.bf16.msra.mxu1 %v6337_v24 }
 0x8a4   :  { %4716 = vmatprep.subr.bf16.mxu0 %v6339_v47  ;;  %4748 = vmatprep.subr.bf16.mxu1 %v6342_v8 }
 0x8a7   :  { %4718 = vmatpush1.bf16.msra.mxu0 %v6345_v4  ;;  %4750 = vmatpush1.bf16.msra.mxu1 %v6349_v40 }
 0x8a8   :  { %4720 = vmatprep.subr.bf16.mxu0 %v6354_v42  ;;  %4752 = vmatprep.subr.bf16.mxu1 %v6356_v39 }
 0x8ab   :  { %4722 = vmatpush1.bf16.msra.mxu0 %v6358_v52  ;;  %4754 = vmatpush1.bf16.msra.mxu1 %v6361_v20 }
 0x8ac   :  { %4756 = vmatprep.subr.bf16.mxu0 %v6270_v36  ;;  %4788 = vmatprep.subr.bf16.mxu1 %v6272_v10 }
 0x961   :  { %v2373_v30 = vpop.f32.mrb[16].mxu0  ;;  %v2444_v54 = vpop.f32.mrb[32].mxu1 }
 0x962   :  { %v5219_v2 = vadd.f32 %v2373_v30, %v6423_v29  ;;  %v2375_v43 = vpop.f32.mrb[17].mxu0  ;;  %v2446_v48 = vpop.f32.mrb[33].mxu1  ;;  %v5235_v53 = vadd.f32 %v2444_v54, %v6438_v51 }
 0x963   :  { %v5220_v58 = vadd.f32 %v2375_v43, %v6427_v63  ;;  %v5236_v25 = vadd.f32 %v2446_v48, %v6433_v23 }
 0x964   :  { %v3892_v28 = vmul.f32 -1.442695, %v5219_v2 }
 0x965   :  { %v3893_v3 = vmul.f32 -1.442695, %v5220_v58  ;;  %v3894_v33 = vmul.f32 -1.442695, %v5236_v25 }
 0x966   :  { %5432 = vpow2.f32 %v3892_v28 }
 0x967   :  { %5434 = vpow2.f32 %v3893_v3 }
 0x968   :  { %5436 = vpow2.f32 %v3894_v33 }
 0x969   :  { %5438 = vtanh.f32 %v5235_v53 }
 0x970   :  { %v5433_v9 = vpop.eup %5432 }
 0x971   :  { %v5435_v7 = vpop.eup %5434  ;;  %v2456_v62 = vadd.f32 1.0, %v5433_v9 }
 0x972   :  { %v2462_v32 = vadd.f32 1.0, %v5435_v7  ;;  %v5437_v50 = vpop.eup %5436 }
 0x973   :  { %5440 = vrcp.f32 %v2456_v62  ;;  %v5439_v5 = vpop.eup %5438  ;;  %v2469_v35 = vadd.f32 1.0, %v5437_v50 }
 0x974   :  { %5442 = vrcp.f32 %v2462_v32 }
 0x975   :  { %5444 = vrcp.f32 %v2469_v35 }
 0x97d   :  { %v5441_v45 = vpop.eup %5440 }
 0x97e   :  { %v5443_v26 = vpop.eup %5442  ;;  %v2473_v55 = vmul.f32 %v5441_v45, %v5439_v5 }
 0x97f   :  { %v2472_v57 = vmul.f32 %v5443_v26, %v3891_v18  ;;  %v5445_v34 = vpop.eup %5444 }
 0x981   :  { %v6444_v1 = vadd.f32 %v2473_v55, %v2472_v57 }
 0x983   :  { %5446 = vtanh.f32 %v6444_v1 }
 0x98d   :  { %v5447_v30 = vpop.eup %5446 }
 0x98e   :  { %v6447_v54 = vmul.f32 %v5447_v30, %v5445_v34 }
 0x990   :  { %2547 = vmatmul.mubr.f32.vlgmr.msra.gmra.mrb[18].mxu0 %v6447_v54  ;;  %2618 = vmatmul.mubr.f32.vlgmr.msra.gmra.mrb[34].mxu1 %v6447_v54 }
 0x991   :  { %4758 = vmatpush1.bf16.msra.mxu0 %v6274_v11  ;;  %4790 = vmatpush1.bf16.msra.mxu1 %v6277_v16 }
 0x992   :  { %4760 = vmatprep.subr.bf16.mxu0 %v6282_v37  ;;  %4792 = vmatprep.subr.bf16.mxu1 %v6284_v61 }
 0x993   :  { %2721 = vmatprep.mubr.f32.mxu0 %v6834_v0  ;;  %2792 = vmatprep.mubr.f32.mxu1 %v6834_v0 }
 0x995   :  { %4762 = vmatpush1.bf16.msra.mxu0 %v6286_v17  ;;  %4794 = vmatpush1.bf16.msra.mxu1 %v6289_v49 }
 0x996   :  { %4764 = vmatprep.subr.bf16.mxu0 %v6294_v59  ;;  %4796 = vmatprep.subr.bf16.mxu1 %v6296_v60 }
 0x999   :  { %4766 = vmatpush1.bf16.msra.mxu0 %v6298_v56  ;;  %4798 = vmatpush1.bf16.msra.mxu1 %v6301_v14 }
 0x99a   :  { %4768 = vmatprep.subr.bf16.mxu0 %v6306_v21  ;;  %4800 = vmatprep.subr.bf16.mxu1 %v6308_v13 }
 0x99d   :  { %4770 = vmatpush1.bf16.msra.mxu0 %v6310_v22  ;;  %4802 = vmatpush1.bf16.msra.mxu1 %v6313_v44 }
 0x99e   :  { %4772 = vmatprep.subr.bf16.mxu0 %v6317_v6  ;;  %4804 = vmatprep.subr.bf16.mxu1 %v6319_v15 }
 0x9a1   :  { %4774 = vmatpush1.bf16.msra.mxu0 %v6322_v41  ;;  %4806 = vmatpush1.bf16.msra.mxu1 %v6326_v31 }
 0x9a2   :  { %4776 = vmatprep.subr.bf16.mxu0 %v6328_v27  ;;  %4808 = vmatprep.subr.bf16.mxu1 %v6330_v19 }
 0x9a5   :  { %4778 = vmatpush1.bf16.msra.mxu0 %v6333_v12  ;;  %4810 = vmatpush1.bf16.msra.mxu1 %v6337_v24 }
 0x9a6   :  { %4780 = vmatprep.subr.bf16.mxu0 %v6339_v47  ;;  %4812 = vmatprep.subr.bf16.mxu1 %v6342_v8 }
 0x9a9   :  { %4782 = vmatpush1.bf16.msra.mxu0 %v6345_v4  ;;  %4814 = vmatpush1.bf16.msra.mxu1 %v6349_v40 }
 0x9aa   :  { %4784 = vmatprep.subr.bf16.mxu0 %v6354_v42  ;;  %4816 = vmatprep.subr.bf16.mxu1 %v6356_v39 }
 0x9ad   :  { %4786 = vmatpush1.bf16.msra.mxu0 %v6358_v52  ;;  %4818 = vmatpush1.bf16.msra.mxu1 %v6361_v20 }
 0x9ae   :  { %4820 = vmatprep.subr.bf16.mxu0 %v6270_v36  ;;  %4852 = vmatprep.subr.bf16.mxu1 %v6272_v10 }
 0xa63   :  { %v2548_v2 = vpop.f32.mrb[18].mxu0  ;;  %v2619_v43 = vpop.f32.mrb[34].mxu1 }
 0xa64   :  { %v5221_v48 = vadd.f32 %v2548_v2, %v6423_v29  ;;  %v2550_v58 = vpop.f32.mrb[19].mxu0  ;;  %v2621_v28 = vpop.f32.mrb[35].mxu1  ;;  %v5237_v53 = vadd.f32 %v2619_v43, %v6438_v51 }
 0xa65   :  { %v5222_v3 = vadd.f32 %v2550_v58, %v6427_v63  ;;  %v5238_v38 = vadd.f32 %v2621_v28, %v6433_v23 }
 0xa66   :  { %v3895_v46 = vmul.f32 -1.442695, %v5221_v48 }
 0xa67   :  { %v3896_v25 = vmul.f32 -1.442695, %v5222_v3  ;;  %v3897_v33 = vmul.f32 -1.442695, %v5238_v38 }
 0xa68   :  { %5448 = vpow2.f32 %v3895_v46 }
 0xa69   :  { %5450 = vpow2.f32 %v3896_v25 }
 0xa6a   :  { %5452 = vpow2.f32 %v3897_v33 }
 0xa6b   :  { %5454 = vtanh.f32 %v5237_v53 }
 0xa72   :  { %v5449_v9 = vpop.eup %5448 }
 0xa73   :  { %v5451_v7 = vpop.eup %5450  ;;  %v2631_v62 = vadd.f32 1.0, %v5449_v9 }
 0xa74   :  { %v2637_v32 = vadd.f32 1.0, %v5451_v7  ;;  %v5453_v50 = vpop.eup %5452 }
 0xa75   :  { %5456 = vrcp.f32 %v2631_v62  ;;  %v5455_v5 = vpop.eup %5454  ;;  %v2644_v55 = vadd.f32 1.0, %v5453_v50 }
 0xa76   :  { %5458 = vrcp.f32 %v2637_v32 }
 0xa77   :  { %5460 = vrcp.f32 %v2644_v55 }
 0xa7f   :  { %v5457_v18 = vpop.eup %5456 }
 0xa80   :  { %v5459_v45 = vpop.eup %5458  ;;  %v2648_v26 = vmul.f32 %v5457_v18, %v5455_v5 }
 0xa81   :  { %v2647_v35 = vmul.f32 %v5459_v45, %v6444_v1  ;;  %v5461_v34 = vpop.eup %5460 }
 0xa83   :  { %v6490_v57 = vadd.f32 %v2648_v26, %v2647_v35 }
 0xa85   :  { %5462 = vtanh.f32 %v6490_v57 }
 0xa8f   :  { %v5463_v30 = vpop.eup %5462 }
 0xa90   :  { %v6493_v2 = vmul.f32 %v5463_v30, %v5461_v34 }
 0xa92   :  { %2722 = vmatmul.mubr.f32.vlgmr.msra.gmra.mrb[20].mxu0 %v6493_v2  ;;  %2793 = vmatmul.mubr.f32.vlgmr.msra.gmra.mrb[36].mxu1 %v6493_v2 }
 0xa93   :  { %4822 = vmatpush1.bf16.msra.mxu0 %v6274_v11  ;;  %4854 = vmatpush1.bf16.msra.mxu1 %v6277_v16 }
 0xa94   :  { %4824 = vmatprep.subr.bf16.mxu0 %v6282_v37  ;;  %4856 = vmatprep.subr.bf16.mxu1 %v6284_v61 }
 0xa95   :  { %2896 = vmatprep.mubr.f32.mxu0 %v6834_v0  ;;  %2967 = vmatprep.mubr.f32.mxu1 %v6834_v0 }
 0xa97   :  { %4826 = vmatpush1.bf16.msra.mxu0 %v6286_v17  ;;  %4858 = vmatpush1.bf16.msra.mxu1 %v6289_v49 }
 0xa98   :  { %4828 = vmatprep.subr.bf16.mxu0 %v6294_v59  ;;  %4860 = vmatprep.subr.bf16.mxu1 %v6296_v60 }
 0xa9b   :  { %4830 = vmatpush1.bf16.msra.mxu0 %v6298_v56  ;;  %4862 = vmatpush1.bf16.msra.mxu1 %v6301_v14 }
 0xa9c   :  { %4832 = vmatprep.subr.bf16.mxu0 %v6306_v21  ;;  %4864 = vmatprep.subr.bf16.mxu1 %v6308_v13 }
 0xa9f   :  { %4834 = vmatpush1.bf16.msra.mxu0 %v6310_v22  ;;  %4866 = vmatpush1.bf16.msra.mxu1 %v6313_v44 }
 0xaa0   :  { %4836 = vmatprep.subr.bf16.mxu0 %v6317_v6  ;;  %4868 = vmatprep.subr.bf16.mxu1 %v6319_v15 }
 0xaa3   :  { %4838 = vmatpush1.bf16.msra.mxu0 %v6322_v41  ;;  %4870 = vmatpush1.bf16.msra.mxu1 %v6326_v31 }
 0xaa4   :  { %4840 = vmatprep.subr.bf16.mxu0 %v6328_v27  ;;  %4872 = vmatprep.subr.bf16.mxu1 %v6330_v19 }
 0xaa7   :  { %4842 = vmatpush1.bf16.msra.mxu0 %v6333_v12  ;;  %4874 = vmatpush1.bf16.msra.mxu1 %v6337_v24 }
 0xaa8   :  { %4844 = vmatprep.subr.bf16.mxu0 %v6339_v47  ;;  %4876 = vmatprep.subr.bf16.mxu1 %v6342_v8 }
 0xaab   :  { %4846 = vmatpush1.bf16.msra.mxu0 %v6345_v4  ;;  %4878 = vmatpush1.bf16.msra.mxu1 %v6349_v40 }
 0xaac   :  { %4848 = vmatprep.subr.bf16.mxu0 %v6354_v42  ;;  %4880 = vmatprep.subr.bf16.mxu1 %v6356_v39 }
 0xaaf   :  { %4850 = vmatpush1.bf16.msra.mxu0 %v6358_v52  ;;  %4882 = vmatpush1.bf16.msra.mxu1 %v6361_v20 }
 0xab0   :  { %4884 = vmatprep.subr.bf16.mxu0 %v6270_v36  ;;  %4916 = vmatprep.subr.bf16.mxu1 %v6272_v10 }
 0xb65   :  { %v2723_v1 = vpop.f32.mrb[20].mxu0  ;;  %v2794_v43 = vpop.f32.mrb[36].mxu1 }
 0xb66   :  { %v5223_v48 = vadd.f32 %v2723_v1, %v6423_v29  ;;  %v2725_v58 = vpop.f32.mrb[21].mxu0  ;;  %v2796_v28 = vpop.f32.mrb[37].mxu1  ;;  %v5239_v53 = vadd.f32 %v2794_v43, %v6438_v51 }
 0xb67   :  { %v5224_v3 = vadd.f32 %v2725_v58, %v6427_v63  ;;  %v5240_v38 = vadd.f32 %v2796_v28, %v6433_v23 }
 0xb68   :  { %v3898_v46 = vmul.f32 -1.442695, %v5223_v48 }
 0xb69   :  { %v3899_v25 = vmul.f32 -1.442695, %v5224_v3  ;;  %v3900_v33 = vmul.f32 -1.442695, %v5240_v38 }
 0xb6a   :  { %5464 = vpow2.f32 %v3898_v46 }
 0xb6b   :  { %5466 = vpow2.f32 %v3899_v25 }
 0xb6c   :  { %5468 = vpow2.f32 %v3900_v33 }
 0xb6d   :  { %5470 = vtanh.f32 %v5239_v53 }
 0xb74   :  { %v5465_v9 = vpop.eup %5464 }
 0xb75   :  { %v5467_v7 = vpop.eup %5466  ;;  %v2806_v62 = vadd.f32 1.0, %v5465_v9 }
 0xb76   :  { %v2812_v32 = vadd.f32 1.0, %v5467_v7  ;;  %v5469_v50 = vpop.eup %5468 }
 0xb77   :  { %5472 = vrcp.f32 %v2806_v62  ;;  %v5471_v5 = vpop.eup %5470  ;;  %v2819_v55 = vadd.f32 1.0, %v5469_v50 }
 0xb78   :  { %5474 = vrcp.f32 %v2812_v32 }
 0xb79   :  { %5476 = vrcp.f32 %v2819_v55 }
 0xb81   :  { %v5473_v18 = vpop.eup %5472 }
 0xb82   :  { %v5475_v45 = vpop.eup %5474  ;;  %v2823_v26 = vmul.f32 %v5473_v18, %v5471_v5 }
 0xb83   :  { %v2822_v35 = vmul.f32 %v5475_v45, %v6490_v57  ;;  %v5477_v30 = vpop.eup %5476 }
 0xb85   :  { %v6536_v34 = vadd.f32 %v2823_v26, %v2822_v35 }
 0xb87   :  { %5478 = vtanh.f32 %v6536_v34 }
 0xb91   :  { %v5479_v1 = vpop.eup %5478 }
 0xb92   :  { %v6539_v43 = vmul.f32 %v5479_v1, %v5477_v30 }
 0xb94   :  { %2897 = vmatmul.mubr.f32.vlgmr.msra.gmra.mrb[22].mxu0 %v6539_v43  ;;  %2968 = vmatmul.mubr.f32.vlgmr.msra.gmra.mrb[38].mxu1 %v6539_v43 }
 0xb95   :  { %4886 = vmatpush1.bf16.msra.mxu0 %v6274_v11  ;;  %4918 = vmatpush1.bf16.msra.mxu1 %v6277_v16 }
 0xb96   :  { %4888 = vmatprep.subr.bf16.mxu0 %v6282_v37  ;;  %4920 = vmatprep.subr.bf16.mxu1 %v6284_v61 }
 0xb97   :  { %3071 = vmatprep.mubr.f32.mxu0 %v6834_v0  ;;  %3142 = vmatprep.mubr.f32.mxu1 %v6834_v0 }
 0xb99   :  { %4890 = vmatpush1.bf16.msra.mxu0 %v6286_v17  ;;  %4922 = vmatpush1.bf16.msra.mxu1 %v6289_v49 }
 0xb9a   :  { %4892 = vmatprep.subr.bf16.mxu0 %v6294_v59  ;;  %4924 = vmatprep.subr.bf16.mxu1 %v6296_v60 }
 0xb9d   :  { %4894 = vmatpush1.bf16.msra.mxu0 %v6298_v56  ;;  %4926 = vmatpush1.bf16.msra.mxu1 %v6301_v14 }
 0xb9e   :  { %4896 = vmatprep.subr.bf16.mxu0 %v6306_v21  ;;  %4928 = vmatprep.subr.bf16.mxu1 %v6308_v13 }
 0xba1   :  { %4898 = vmatpush1.bf16.msra.mxu0 %v6310_v22  ;;  %4930 = vmatpush1.bf16.msra.mxu1 %v6313_v44 }
 0xba2   :  { %4900 = vmatprep.subr.bf16.mxu0 %v6317_v6  ;;  %4932 = vmatprep.subr.bf16.mxu1 %v6319_v15 }
 0xba5   :  { %4902 = vmatpush1.bf16.msra.mxu0 %v6322_v41  ;;  %4934 = vmatpush1.bf16.msra.mxu1 %v6326_v31 }
 0xba6   :  { %4904 = vmatprep.subr.bf16.mxu0 %v6328_v27  ;;  %4936 = vmatprep.subr.bf16.mxu1 %v6330_v19 }
 0xba9   :  { %4906 = vmatpush1.bf16.msra.mxu0 %v6333_v12  ;;  %4938 = vmatpush1.bf16.msra.mxu1 %v6337_v24 }
 0xbaa   :  { %4908 = vmatprep.subr.bf16.mxu0 %v6339_v47  ;;  %4940 = vmatprep.subr.bf16.mxu1 %v6342_v8 }
 0xbad   :  { %4910 = vmatpush1.bf16.msra.mxu0 %v6345_v4  ;;  %4942 = vmatpush1.bf16.msra.mxu1 %v6349_v40 }
 0xbae   :  { %4912 = vmatprep.subr.bf16.mxu0 %v6354_v42  ;;  %4944 = vmatprep.subr.bf16.mxu1 %v6356_v39 }
 0xbb1   :  { %4914 = vmatpush1.bf16.msra.mxu0 %v6358_v52  ;;  %4946 = vmatpush1.bf16.msra.mxu1 %v6361_v20 }
 0xbb2   :  { %4948 = vmatprep.subr.bf16.mxu0 %v6270_v36  ;;  %4980 = vmatprep.subr.bf16.mxu1 %v6272_v10 }
 0xc67   :  { %v2898_v57 = vpop.f32.mrb[22].mxu0  ;;  %v2969_v48 = vpop.f32.mrb[38].mxu1 }
 0xc68   :  { %v5225_v58 = vadd.f32 %v2898_v57, %v6423_v29  ;;  %v2900_v28 = vpop.f32.mrb[23].mxu0  ;;  %v2971_v3 = vpop.f32.mrb[39].mxu1  ;;  %v5241_v9 = vadd.f32 %v2969_v48, %v6438_v51 }
 0xc69   :  { %v5226_v46 = vadd.f32 %v2900_v28, %v6427_v63  ;;  %v5242_v33 = vadd.f32 %v2971_v3, %v6433_v23 }
 0xc6a   :  { %v3901_v25 = vmul.f32 -1.442695, %v5225_v58 }
 0xc6b   :  { %v3902_v38 = vmul.f32 -1.442695, %v5226_v46  ;;  %v3903_v53 = vmul.f32 -1.442695, %v5242_v33 }
 0xc6c   :  { %5480 = vpow2.f32 %v3901_v25 }
 0xc6d   :  { %5482 = vpow2.f32 %v3902_v38 }
 0xc6e   :  { %5484 = vpow2.f32 %v3903_v53 }
 0xc6f   :  { %5486 = vtanh.f32 %v5241_v9 }
 0xc76   :  { %v5481_v7 = vpop.eup %5480 }
 0xc77   :  { %v5483_v62 = vpop.eup %5482  ;;  %v2981_v32 = vadd.f32 1.0, %v5481_v7 }
 0xc78   :  { %v2987_v50 = vadd.f32 1.0, %v5483_v62  ;;  %v5485_v5 = vpop.eup %5484 }
 0xc79   :  { %5488 = vrcp.f32 %v2981_v32  ;;  %v5487_v18 = vpop.eup %5486  ;;  %v2994_v35 = vadd.f32 1.0, %v5485_v5 }
 0xc7a   :  { %5490 = vrcp.f32 %v2987_v50 }
 0xc7b   :  { %5492 = vrcp.f32 %v2994_v35 }
 0xc83   :  { %v5489_v45 = vpop.eup %5488 }
 0xc84   :  { %v5491_v26 = vpop.eup %5490  ;;  %v2998_v55 = vmul.f32 %v5489_v45, %v5487_v18 }
 0xc85   :  { %v2997_v30 = vmul.f32 %v5491_v26, %v6536_v34  ;;  %v5493_v57 = vpop.eup %5492 }
 0xc87   :  { %v6582_v1 = vadd.f32 %v2998_v55, %v2997_v30 }
 0xc89   :  { %5494 = vtanh.f32 %v6582_v1 }
 0xc93   :  { %v5495_v48 = vpop.eup %5494 }
 0xc94   :  { %v6585_v58 = vmul.f32 %v5495_v48, %v5493_v57 }
 0xc96   :  { %3072 = vmatmul.mubr.f32.vlgmr.msra.gmra.mrb[24].mxu0 %v6585_v58  ;;  %3143 = vmatmul.mubr.f32.vlgmr.msra.gmra.mrb[40].mxu1 %v6585_v58 }
 0xc97   :  { %4950 = vmatpush1.bf16.msra.mxu0 %v6274_v11  ;;  %4982 = vmatpush1.bf16.msra.mxu1 %v6277_v16 }
 0xc98   :  { %4952 = vmatprep.subr.bf16.mxu0 %v6282_v37  ;;  %4984 = vmatprep.subr.bf16.mxu1 %v6284_v61 }
 0xc99   :  { %3246 = vmatprep.mubr.f32.mxu0 %v6834_v0  ;;  %3317 = vmatprep.mubr.f32.mxu1 %v6834_v0 }
 0xc9b   :  { %4954 = vmatpush1.bf16.msra.mxu0 %v6286_v17  ;;  %4986 = vmatpush1.bf16.msra.mxu1 %v6289_v49 }
 0xc9c   :  { %4956 = vmatprep.subr.bf16.mxu0 %v6294_v59  ;;  %4988 = vmatprep.subr.bf16.mxu1 %v6296_v60 }
 0xc9f   :  { %4958 = vmatpush1.bf16.msra.mxu0 %v6298_v56  ;;  %4990 = vmatpush1.bf16.msra.mxu1 %v6301_v14 }
 0xca0   :  { %4960 = vmatprep.subr.bf16.mxu0 %v6306_v21  ;;  %4992 = vmatprep.subr.bf16.mxu1 %v6308_v13 }
 0xca3   :  { %4962 = vmatpush1.bf16.msra.mxu0 %v6310_v22  ;;  %4994 = vmatpush1.bf16.msra.mxu1 %v6313_v44 }
 0xca4   :  { %4964 = vmatprep.subr.bf16.mxu0 %v6317_v6  ;;  %4996 = vmatprep.subr.bf16.mxu1 %v6319_v15 }
 0xca7   :  { %4966 = vmatpush1.bf16.msra.mxu0 %v6322_v41  ;;  %4998 = vmatpush1.bf16.msra.mxu1 %v6326_v31 }
 0xca8   :  { %4968 = vmatprep.subr.bf16.mxu0 %v6328_v27  ;;  %5000 = vmatprep.subr.bf16.mxu1 %v6330_v19 }
 0xcab   :  { %4970 = vmatpush1.bf16.msra.mxu0 %v6333_v12  ;;  %5002 = vmatpush1.bf16.msra.mxu1 %v6337_v24 }
 0xcac   :  { %4972 = vmatprep.subr.bf16.mxu0 %v6339_v47  ;;  %5004 = vmatprep.subr.bf16.mxu1 %v6342_v8 }
 0xcaf   :  { %4974 = vmatpush1.bf16.msra.mxu0 %v6345_v4  ;;  %5006 = vmatpush1.bf16.msra.mxu1 %v6349_v40 }
 0xcb0   :  { %4976 = vmatprep.subr.bf16.mxu0 %v6354_v42  ;;  %5008 = vmatprep.subr.bf16.mxu1 %v6356_v39 }
 0xcb3   :  { %4978 = vmatpush1.bf16.msra.mxu0 %v6358_v52  ;;  %5010 = vmatpush1.bf16.msra.mxu1 %v6361_v20 }
 0xcb4   :  { %5012 = vmatprep.subr.bf16.mxu0 %v6270_v36  ;;  %5044 = vmatprep.subr.bf16.mxu1 %v6272_v10 }
 0xd69   :  { %v3073_v34 = vpop.f32.mrb[24].mxu0  ;;  %v3144_v28 = vpop.f32.mrb[40].mxu1 }
 0xd6a   :  { %v5227_v3 = vadd.f32 %v3073_v34, %v6423_v29  ;;  %v3075_v46 = vpop.f32.mrb[25].mxu0  ;;  %v3146_v25 = vpop.f32.mrb[41].mxu1  ;;  %v5243_v62 = vadd.f32 %v3144_v28, %v6438_v51 }
 0xd6b   :  { %v5228_v38 = vadd.f32 %v3075_v46, %v6427_v63  ;;  %v5244_v9 = vadd.f32 %v3146_v25, %v6433_v23 }
 0xd6c   :  { %v3904_v33 = vmul.f32 -1.442695, %v5227_v3 }
 0xd6d   :  { %v3905_v53 = vmul.f32 -1.442695, %v5228_v38  ;;  %v3906_v7 = vmul.f32 -1.442695, %v5244_v9 }
 0xd6e   :  { %5496 = vpow2.f32 %v3904_v33 }
 0xd6f   :  { %5498 = vpow2.f32 %v3905_v53 }
 0xd70   :  { %5500 = vpow2.f32 %v3906_v7 }
 0xd71   :  { %5502 = vtanh.f32 %v5243_v62 }
 0xd78   :  { %v5497_v32 = vpop.eup %5496 }
 0xd79   :  { %v5499_v50 = vpop.eup %5498  ;;  %v3156_v5 = vadd.f32 1.0, %v5497_v32 }
 0xd7a   :  { %v3162_v18 = vadd.f32 1.0, %v5499_v50  ;;  %v5501_v45 = vpop.eup %5500 }
 0xd7b   :  { %5504 = vrcp.f32 %v3156_v5  ;;  %v5503_v26 = vpop.eup %5502  ;;  %v3169_v57 = vadd.f32 1.0, %v5501_v45 }
 0xd7c   :  { %5506 = vrcp.f32 %v3162_v18 }
 0xd7d   :  { %5508 = vrcp.f32 %v3169_v57 }
 0xd85   :  { %v5505_v55 = vpop.eup %5504 }
 0xd86   :  { %v5507_v35 = vpop.eup %5506  ;;  %v3173_v30 = vmul.f32 %v5505_v55, %v5503_v26 }
 0xd87   :  { %v3172_v48 = vmul.f32 %v5507_v35, %v6582_v1  ;;  %v5509_v28 = vpop.eup %5508 }
 0xd89   :  { %v6628_v34 = vadd.f32 %v3173_v30, %v3172_v48 }
 0xd8b   :  { %5510 = vtanh.f32 %v6628_v34 }
 0xd95   :  { %v5511_v3 = vpop.eup %5510 }
 0xd96   :  { %v6631_v46 = vmul.f32 %v5511_v3, %v5509_v28 }
 0xd98   :  { %3247 = vmatmul.mubr.f32.vlgmr.msra.gmra.mrb[26].mxu0 %v6631_v46  ;;  %3318 = vmatmul.mubr.f32.vlgmr.msra.gmra.mrb[42].mxu1 %v6631_v46 }
 0xd99   :  { %5014 = vmatpush1.bf16.msra.mxu0 %v6274_v11  ;;  %5046 = vmatpush1.bf16.msra.mxu1 %v6277_v16 }
 0xd9a   :  { %5016 = vmatprep.subr.bf16.mxu0 %v6282_v37  ;;  %5048 = vmatprep.subr.bf16.mxu1 %v6284_v61 }
 0xd9b   :  { %3421 = vmatprep.mubr.f32.mxu0 %v6834_v0  ;;  %3492 = vmatprep.mubr.f32.mxu1 %v6834_v0 }
 0xd9d   :  { %5018 = vmatpush1.bf16.msra.mxu0 %v6286_v17  ;;  %5050 = vmatpush1.bf16.msra.mxu1 %v6289_v49 }
 0xd9e   :  { %5020 = vmatprep.subr.bf16.mxu0 %v6294_v59  ;;  %5052 = vmatprep.subr.bf16.mxu1 %v6296_v60 }
 0xda1   :  { %5022 = vmatpush1.bf16.msra.mxu0 %v6298_v56  ;;  %5054 = vmatpush1.bf16.msra.mxu1 %v6301_v14 }
 0xda2   :  { %5024 = vmatprep.subr.bf16.mxu0 %v6306_v21  ;;  %5056 = vmatprep.subr.bf16.mxu1 %v6308_v13 }
 0xda5   :  { %5026 = vmatpush1.bf16.msra.mxu0 %v6310_v22  ;;  %5058 = vmatpush1.bf16.msra.mxu1 %v6313_v44 }
 0xda6   :  { %5028 = vmatprep.subr.bf16.mxu0 %v6317_v6  ;;  %5060 = vmatprep.subr.bf16.mxu1 %v6319_v15 }
 0xda9   :  { %5030 = vmatpush1.bf16.msra.mxu0 %v6322_v41  ;;  %5062 = vmatpush1.bf16.msra.mxu1 %v6326_v31 }
 0xdaa   :  { %5032 = vmatprep.subr.bf16.mxu0 %v6328_v27  ;;  %5064 = vmatprep.subr.bf16.mxu1 %v6330_v19 }
 0xdad   :  { %5034 = vmatpush1.bf16.msra.mxu0 %v6333_v12  ;;  %5066 = vmatpush1.bf16.msra.mxu1 %v6337_v24 }
 0xdae   :  { %5036 = vmatprep.subr.bf16.mxu0 %v6339_v47  ;;  %5068 = vmatprep.subr.bf16.mxu1 %v6342_v8 }
 0xdb1   :  { %5038 = vmatpush1.bf16.msra.mxu0 %v6345_v4  ;;  %5070 = vmatpush1.bf16.msra.mxu1 %v6349_v40 }
 0xdb2   :  { %5040 = vmatprep.subr.bf16.mxu0 %v6354_v42  ;;  %5072 = vmatprep.subr.bf16.mxu1 %v6356_v39 }
 0xdb5   :  { %5042 = vmatpush1.bf16.msra.mxu0 %v6358_v52  ;;  %5074 = vmatpush1.bf16.msra.mxu1 %v6361_v20 }
 0xdb6   :  { %5076 = vmatprep.subr.bf16.mxu0 %v6270_v36  ;;  %5108 = vmatprep.subr.bf16.mxu1 %v6272_v10 }
 0xe6b   :  { %v3248_v1 = vpop.f32.mrb[26].mxu0  ;;  %v3319_v25 = vpop.f32.mrb[42].mxu1 }
 0xe6c   :  { %v5229_v38 = vadd.f32 %v3248_v1, %v6423_v29  ;;  %v3250_v33 = vpop.f32.mrb[27].mxu0  ;;  %v3321_v53 = vpop.f32.mrb[43].mxu1  ;;  %v5245_v5 = vadd.f32 %v3319_v25, %v6438_v51 }
 0xe6d   :  { %v5230_v9 = vadd.f32 %v3250_v33, %v6427_v63  ;;  %v5246_v32 = vadd.f32 %v3321_v53, %v6433_v23  ;;  %v3719_v33 = vld [vmem:[%s6819_s6 + $0x20] sm:$0xff]  ;;  %v3720_v53 = vld [vmem:[%s6819_s6 + $0x28] sm:$0xff] }
 0xe6e   :  { %v3907_v7 = vmul.f32 -1.442695, %v5229_v38 }
 0xe6f   :  { %v3908_v62 = vmul.f32 -1.442695, %v5230_v9  ;;  %v3909_v50 = vmul.f32 -1.442695, %v5246_v32  ;;  %v5147_v9 = vpack.c.bf16 %v3720_v53, %v3719_v33 }
 0xe70   :  { %5512 = vpow2.f32 %v3907_v7  ;;  %v3721_v7 = vld [vmem:[%s6819_s6 + $0x30] sm:$0xff] }
 0xe71   :  { %5514 = vpow2.f32 %v3908_v62  ;;  %v3722_v62 = vld [vmem:[%s6819_s6 + $0x38] sm:$0xff] }
 0xe72   :  { %5516 = vpow2.f32 %v3909_v50  ;;  %v5151_v32 = vpack.c.bf16 %v3722_v62, %v3721_v7  ;;  %v3723_v50 = vld [vmem:[%s6819_s6 + $0x40] sm:$0xff] }
 0xe73   :  { %5518 = vtanh.f32 %v5245_v5 }
 0xe7a   :  { %v5513_v36 = vpop.eup %5512 }
 0xe7b   :  { %v5515_v18 = vpop.eup %5514  ;;  %v3331_v10 = vadd.f32 1.0, %v5513_v36  ;;  %v3725_v36 = vld [vmem:[%s6819_s6 + $0x50] sm:$0xff] }
 0xe7c   :  { %v3337_v45 = vadd.f32 1.0, %v5515_v18  ;;  %v5517_v26 = vpop.eup %5516  ;;  %v3726_v18 = vld [vmem:[%s6819_s6 + $0x58] sm:$0xff] }
 0xe7d   :  { %5520 = vrcp.f32 %v3331_v10  ;;  %v5519_v55 = vpop.eup %5518  ;;  %v3344_v48 = vadd.f32 1.0, %v5517_v26  ;;  %v5159_v10 = vpack.c.bf16 %v3726_v18, %v3725_v36  ;;  %v3728_v26 = vld [vmem:[%s6819_s6 + $0x68] sm:$0xff] }
 0xe7e   :  { %5522 = vrcp.f32 %v3337_v45  ;;  %v3727_v45 = vld [vmem:[%s6819_s6 + $0x60] sm:$0xff] }
 0xe7f   :  { %5524 = vrcp.f32 %v3344_v48 }
 0xe87   :  { %v5521_v35 = vpop.eup %5520 }
 0xe88   :  { %v5523_v30 = vpop.eup %5522  ;;  %v3348_v57 = vmul.f32 %v5521_v35, %v5519_v55  ;;  %v5163_v55 = vpack.c.bf16 %v3728_v26, %v3727_v45  ;;  %v3729_v35 = vld [vmem:[%s6819_s6 + $0x70] sm:$0xff] }
 0xe89   :  { %v3347_v28 = vmul.f32 %v5523_v30, %v6628_v34  ;;  %v5525_v1 = vpop.eup %5524  ;;  %v3730_v30 = vld [vmem:[%s6819_s6 + $0x78] sm:$0xff] }
 0xe8b   :  { %v6674_v3 = vadd.f32 %v3348_v57, %v3347_v28  ;;  %v5167_v57 = vpack.c.bf16 %v3730_v30, %v3729_v35 }
 0xe8d   :  { %5526 = vtanh.f32 %v6674_v3 }
 0xe97   :  { %v5527_v25 = vpop.eup %5526 }
 0xe98   :  { %v6677_v38 = vmul.f32 %v5527_v25, %v5525_v1 }
 0xe9a   :  { %3422 = vmatmul.mubr.f32.vlgmr.msra.gmra.mrb[28].mxu0 %v6677_v38  ;;  %3493 = vmatmul.mubr.f32.vlgmr.msra.gmra.mrb[44].mxu1 %v6677_v38 }
 0xe9b   :  { %5078 = vmatpush1.bf16.msra.mxu0 %v6274_v11  ;;  %5110 = vmatpush1.bf16.msra.mxu1 %v6277_v16  ;;  %v3716_v11 = vld [vmem:[%s6819_s6 + $0x8] sm:$0xff] }
 0xe9c   :  { %5080 = vmatprep.subr.bf16.mxu0 %v6282_v37  ;;  %5112 = vmatprep.subr.bf16.mxu1 %v6284_v61 }
 0xe9d   :  { %3596 = vmatprep.mubr.f32.mxu0 %v6834_v0  ;;  %3667 = vmatprep.mubr.f32.mxu1 %v6834_v0  ;;  %v3715_v0 = vld [vmem:[%s6819_s6] sm:$0xff] }
 0xe9e   :  { %v5139_v16 = vpack.c.bf16 %v3716_v11, %v3715_v0 }
 0xe9f   :  { %5082 = vmatpush1.bf16.msra.mxu0 %v6286_v17  ;;  %5114 = vmatpush1.bf16.msra.mxu1 %v6289_v49 }
 0xea0   :  { %5084 = vmatprep.subr.bf16.mxu0 %v6294_v59  ;;  %5116 = vmatprep.subr.bf16.mxu1 %v6296_v60 }
 0xea3   :  { %5086 = vmatpush1.bf16.msra.mxu0 %v6298_v56  ;;  %5118 = vmatpush1.bf16.msra.mxu1 %v6301_v14 }
 0xea4   :  { %5088 = vmatprep.subr.bf16.mxu0 %v6306_v21  ;;  %5120 = vmatprep.subr.bf16.mxu1 %v6308_v13 }
 0xea7   :  { %5090 = vmatpush1.bf16.msra.mxu0 %v6310_v22  ;;  %5122 = vmatpush1.bf16.msra.mxu1 %v6313_v44 }
 0xea8   :  { %5092 = vmatprep.subr.bf16.mxu0 %v6317_v6  ;;  %5124 = vmatprep.subr.bf16.mxu1 %v6319_v15 }
 0xeab   :  { %5094 = vmatpush1.bf16.msra.mxu0 %v6322_v41  ;;  %5126 = vmatpush1.bf16.msra.mxu1 %v6326_v31 }
 0xeac   :  { %5096 = vmatprep.subr.bf16.mxu0 %v6328_v27  ;;  %5128 = vmatprep.subr.bf16.mxu1 %v6330_v19 }
 0xeaf   :  { %5098 = vmatpush1.bf16.msra.mxu0 %v6333_v12  ;;  %5130 = vmatpush1.bf16.msra.mxu1 %v6337_v24 }
 0xeb0   :  { %5100 = vmatprep.subr.bf16.mxu0 %v6339_v47  ;;  %5132 = vmatprep.subr.bf16.mxu1 %v6342_v8 }
 0xeb3   :  { %5102 = vmatpush1.bf16.msra.mxu0 %v6345_v4  ;;  %5134 = vmatpush1.bf16.msra.mxu1 %v6349_v40  ;;  %v3717_v40 = vld [vmem:[%s6819_s6 + $0x10] sm:$0xff] }
 0xeb4   :  { %5104 = vmatprep.subr.bf16.mxu0 %v6354_v42  ;;  %5136 = vmatprep.subr.bf16.mxu1 %v6356_v39  ;;  %v3718_v42 = vld [vmem:[%s6819_s6 + $0x18] sm:$0xff] }
 0xeb5   :  { %v5143_v34 = vpack.c.bf16 %v3718_v42, %v3717_v40 }
 0xeb7   :  { %5106 = vmatpush1.bf16.msra.mxu0 %v6358_v52  ;;  %5138 = vmatpush1.bf16.msra.mxu1 %v6361_v20 }
 0xeb8   :  { %5140 = vmatprep.subr.bf16.mxu0 %v5139_v16 }
 0xf6d   :  { %v3423_v37 = vpop.f32.mrb[28].mxu0  ;;  %v3494_v61 = vpop.f32.mrb[44].mxu1 }
 0xf6e   :  { %v5231_v17 = vadd.f32 %v3423_v37, %v6423_v29  ;;  %v3425_v49 = vpop.f32.mrb[29].mxu0  ;;  %v3496_v59 = vpop.f32.mrb[45].mxu1  ;;  %v5247_v22 = vadd.f32 %v3494_v61, %v6438_v51 }
 0xf6f   :  { %v5232_v60 = vadd.f32 %v3425_v49, %v6427_v63  ;;  %v5248_v21 = vadd.f32 %v3496_v59, %v6433_v23 }
 0xf70   :  { %v3910_v56 = vmul.f32 -1.442695, %v5231_v17 }
 0xf71   :  { %v3911_v14 = vmul.f32 -1.442695, %v5232_v60  ;;  %v3912_v13 = vmul.f32 -1.442695, %v5248_v21 }
 0xf72   :  { %5528 = vpow2.f32 %v3910_v56 }
 0xf73   :  { %5530 = vpow2.f32 %v3911_v14 }
 0xf74   :  { %5532 = vpow2.f32 %v3912_v13 }
 0xf75   :  { %5534 = vtanh.f32 %v5247_v22 }
 0xf7c   :  { %v5529_v44 = vpop.eup %5528 }
 0xf7d   :  { %v5531_v6 = vpop.eup %5530  ;;  %v3506_v15 = vadd.f32 1.0, %v5529_v44 }
 0xf7e   :  { %v3512_v41 = vadd.f32 1.0, %v5531_v6  ;;  %v5533_v31 = vpop.eup %5532 }
 0xf7f   :  { %5536 = vrcp.f32 %v3506_v15  ;;  %v5535_v27 = vpop.eup %5534  ;;  %v3519_v47 = vadd.f32 1.0, %v5533_v31 }
 0xf80   :  { %5538 = vrcp.f32 %v3512_v41 }
 0xf81   :  { %5540 = vrcp.f32 %v3519_v47 }
 0xf89   :  { %v5537_v19 = vpop.eup %5536 }
 0xf8a   :  { %v5539_v12 = vpop.eup %5538  ;;  %v3523_v24 = vmul.f32 %v5537_v19, %v5535_v27 }
 0xf8b   :  { %v3522_v8 = vmul.f32 %v5539_v12, %v6674_v3  ;;  %v5541_v39 = vpop.eup %5540 }
 0xf8d   :  { %v6724_v4 = vadd.f32 %v3523_v24, %v3522_v8 }
 0xf8f   :  { %5542 = vtanh.f32 %v6724_v4 }
 0xf99   :  { %v5543_v52 = vpop.eup %5542 }
 0xf9a   :  { %v3526_v20 = vmul.f32 %v5543_v52, %v5541_v39 }
 0xf9c   :  { %3597 = vmatmul.mubr.f32.vlgmr.msra.gmra.mrb[30].mxu0 %v3526_v20  ;;  %3668 = vmatmul.mubr.f32.vlgmr.msra.gmra.mrb[46].mxu1 %v3526_v20 }
 0xf9d   :  { %5142 = vmatpush3.bf16.msra.mxu0 %v5139_v16  ;;  %3975 = vmatprep.mubr.f32.mxu0 %v6447_v54  ;;  %v3724_v54 = vld [vmem:[%s6819_s6 + $0x48] sm:$0xff] }
 0xf9e   :  { %5144 = vmatprep.subr.bf16.mxu0 %v5143_v34  ;;  %v5155_v5 = vpack.c.bf16 %v3724_v54, %v3723_v50 }
 0xfa1   :  { %5146 = vmatpush3.bf16.msra.mxu0 %v5143_v34 }
 0xfa2   :  { %5148 = vmatprep.subr.bf16.mxu0 %v5147_v9 }
 0xfa5   :  { %5150 = vmatpush3.bf16.msra.mxu0 %v5147_v9 }
 0xfa6   :  { %5152 = vmatprep.subr.bf16.mxu0 %v5151_v32 }
 0xfa9   :  { %5154 = vmatpush3.bf16.msra.mxu0 %v5151_v32 }
 0xfaa   :  { %5156 = vmatprep.subr.bf16.mxu0 %v5155_v5 }
 0xfad   :  { %5158 = vmatpush3.bf16.msra.mxu0 %v5155_v5 }
 0xfae   :  { %5160 = vmatprep.subr.bf16.mxu0 %v5159_v10 }
 0xfb1   :  { %5162 = vmatpush3.bf16.msra.mxu0 %v5159_v10 }
 0xfb2   :  { %5164 = vmatprep.subr.bf16.mxu0 %v5163_v55 }
 0xfb5   :  { %5166 = vmatpush3.bf16.msra.mxu0 %v5163_v55 }
 0xfb6   :  { %5168 = vmatprep.subr.bf16.mxu0 %v5167_v57 }
 0xfb9   :  { %5170 = vmatpush3.bf16.msra.mxu0 %v5167_v57 }
 0xfbc   :  { %3976 = vmatmul.mubr.f32.vlgmr.msra.gmra.mrb[32].mxu0 %v6493_v2 }
 0xfbd   :  { %3978 = vmatprep.mubr.f32.mxu0 %v6539_v43 }
 0xfc0   :  { %3979 = vmatmul.mubr.f32.gmra.mrb[34].mxu0 %v6585_v58 }
 0xfc1   :  { %3981 = vmatprep.mubr.f32.mxu0 %v6631_v46 }
 0xfc4   :  { %3982 = vmatmul.mubr.f32.gmra.mrb[36].mxu0 %v6677_v38 }
 0xfc5   :  { %3984 = vmatprep.mubr.f32.mxu0 %v3526_v20 }
0x106f   :  { %v3598_v48 = vpop.f32.mrb[30].mxu0  ;;  %v3669_v28 = vpop.f32.mrb[46].mxu1 }
0x1070   :  { %v5233_v3 = vadd.f32 %v3598_v48, %v6423_v29  ;;  %v3600_v1 = vpop.f32.mrb[31].mxu0  ;;  %v3671_v25 = vpop.f32.mrb[47].mxu1  ;;  %v5249_v58 = vadd.f32 %v3669_v28, %v6438_v51 }
0x1071   :  { %v5234_v0 = vadd.f32 %v3600_v1, %v6427_v63  ;;  %v5250_v2 = vadd.f32 %v3671_v25, %v6433_v23  ;;  %v3918_v23 = vld [vmem:[%s6820_s7] ss:$0 sm:$0xff] }
0x1072   :  { %v3913_v11 = vmul.f32 -1.442695, %v5233_v3 }
0x1073   :  { %v3914_v16 = vmul.f32 -1.442695, %v5234_v0  ;;  %v3915_v43 = vmul.f32 -1.442695, %v5250_v2 }
0x1074   :  { %5544 = vpow2.f32 %v3913_v11 }
0x1075   :  { %5546 = vpow2.f32 %v3914_v16 }
0x1076   :  { %5548 = vpow2.f32 %v3915_v43 }
0x1077   :  { %5550 = vtanh.f32 %v5249_v58 }
0x107e   :  { %v5545_v46 = vpop.eup %5544 }
0x107f   :  { %v5547_v38 = vpop.eup %5546  ;;  %v3681_v37 = vadd.f32 1.0, %v5545_v46 }
0x1080   :  { %v3687_v61 = vadd.f32 1.0, %v5547_v38  ;;  %v5549_v29 = vpop.eup %5548 }
0x1081   :  { %5552 = vrcp.f32 %v3681_v37  ;;  %v5551_v17 = vpop.eup %5550  ;;  %v3694_v60 = vadd.f32 1.0, %v5549_v29 }
0x1082   :  { %5554 = vrcp.f32 %v3687_v61 }
0x1083   :  { %5556 = vrcp.f32 %v3694_v60 }
0x108b   :  { %v5553_v63 = vpop.eup %5552 }
0x108c   :  { %v5555_v49 = vpop.eup %5554  ;;  %v3698_v59 = vmul.f32 %v5553_v63, %v5551_v17 }
0x108d   :  { %v3697_v56 = vmul.f32 %v5555_v49, %v6724_v4  ;;  %v5557_v24 = vpop.eup %5556 }
0x108f   :  { %v3977_v51 = vpop.f32.mrb[32].mxu0  ;;  %v3699_v14 = vadd.f32 %v3698_v59, %v3697_v56 }
0x1090   :  { %v3810_v21 = vadd.f32 %v3977_v51, %v3918_v23  ;;  %v3804_v13 = vpop.f32.mrb[33].mxu0 }
0x1091   :  { %v3805_v22 = vadd.f32 %v3918_v23, %v3804_v13  ;;  %5558 = vtanh.f32 %v3699_v14  ;;  %3917 = vst [vmem:[%s6823_s10 + $0x8] sm:$0xff] %v3699_v14 }
0x1092   :  { %3844 = vst [vmem:[%s6821_s8 + $0x8] sm:$0xff] %v3810_v21 }
0x1093   :  { %3843 = vst [vmem:[%s6821_s8] sm:$0xff] %v3805_v22  ;;  %v3980_v44 = vpop.f32.mrb[34].mxu0 }
0x1094   :  { %v3820_v6 = vadd.f32 %v3980_v44, %v3918_v23  ;;  %v3814_v15 = vpop.f32.mrb[35].mxu0 }
0x1095   :  { %v3815_v41 = vadd.f32 %v3918_v23, %v3814_v15 }
0x1096   :  { %3846 = vst [vmem:[%s6821_s8 + $0x18] sm:$0xff] %v3820_v6 }
0x1097   :  { %3845 = vst [vmem:[%s6821_s8 + $0x10] sm:$0xff] %v3815_v41  ;;  %v3983_v31 = vpop.f32.mrb[36].mxu0 }
0x1098   :  { %v3830_v27 = vadd.f32 %v3983_v31, %v3918_v23  ;;  %v3824_v19 = vpop.f32.mrb[37].mxu0 }
0x1099   :  { %v3825_v12 = vadd.f32 %v3918_v23, %v3824_v19 }
0x109a   :  { %3848 = vst [vmem:[%s6821_s8 + $0x28] sm:$0xff] %v3830_v27 }
0x109b   :  { %v5559_v47 = vpop.eup %5558  ;;  %3847 = vst [vmem:[%s6821_s8 + $0x20] sm:$0xff] %v3825_v12 }
0x109c   :  { %v3701_v8 = vmul.f32 %v5559_v47, %v5557_v24 }
0x109e   :  { %3916 = vst [vmem:[%s6822_s9 + $0x8] sm:$0xff] %v3701_v8  ;;  %3985 = vmatmul.mubr.f32.gmra.mrb[38].mxu0 %v3701_v8 }
0x1171   :  { %v3986_v4 = vpop.f32.mrb[38].mxu0 }
0x1172   :  { %v3840_v40 = vadd.f32 %v3986_v4, %v3918_v23  ;;  %v3834_v42 = vpop.f32.mrb[39].mxu0 }
0x1173   :  { %v3835_v39 = vadd.f32 %v3918_v23, %v3834_v42 }
0x1174   :  { %3850 = vst [vmem:[%s6821_s8 + $0x38] sm:$0xff] %v3840_v40 }
0x1175   :  { %3849 = vst [vmem:[%s6821_s8 + $0x30] sm:$0xff] %v3835_v39 }
0x1176   :  { %3863 = vsyncpa [#allocation5], 1 }
0x1177   :  { %3864 = vsyncpa [#allocation7], 1 }

</bundles_post_ra>
